<compile_context>
chip_gen: v5e
topology: v5e:2x2
jax: 0.10.0
libtpu: 0.0.40
codegen_flags: <defaults>
</compile_context>

<pallas_src>
import functools
import math

import jax
import jax.numpy as jnp
from jax.experimental import pallas as pl
from jax.experimental.pallas import tpu as pltpu


def _round_up(x, m):
    return ((x + m - 1) // m) * m


def _gelu_tanh(y):
    # TODO(synk): PyTorch F.gelu defaults to the exact erf form; the tanh
    # approximation is used here (max abs err ~3e-3) for robust Mosaic lowering.
    c = math.sqrt(2.0 / math.pi)
    return 0.5 * y * (1.0 + jnp.tanh(c * (y + 0.044715 * y * y * y)))


def _mlp_kernel(x_ref, w1_ref, b1_ref, w2_ref, b2_ref, o_ref, acc_ref):
    """One (row-tile i, mlp-chunk j) grid step of gelu(gelu(x@W1+b1)@W2+b2)."""
    j = pl.program_id(1)

    @pl.when(j == 0)
    def _init():
        acc_ref[...] = jnp.zeros_like(acc_ref)

    # fc1 chunk + GELU, stays in VMEM (never written back to HBM).
    x = x_ref[...].astype(w1_ref.dtype)
    h = jnp.dot(x, w1_ref[...], preferred_element_type=jnp.float32) + b1_ref[...]
    h = _gelu_tanh(h)

    # fc2 partial contraction over this mlp-dim chunk.
    acc_ref[...] += jnp.dot(h.astype(w2_ref.dtype), w2_ref[...],
                            preferred_element_type=jnp.float32)

    @pl.when(j == pl.num_programs(1) - 1)
    def _finalize():
        o_ref[...] = _gelu_tanh(acc_ref[...] + b2_ref[...]).astype(o_ref.dtype)


def _pad2(a, rows, cols):
    pr, pc = rows - a.shape[0], cols - a.shape[1]
    if pr or pc:
        a = jnp.pad(a, ((0, pr), (0, pc)))
    return a


def mlp_forward(x, params, *, tile_m=512, tile_j=512,
                compute_dtype=jnp.bfloat16):
    """TransUnet MLP forward (eval mode: both Dropouts are identity).

    x: (..., hidden_ch) float32.
    params: w1 (hidden, mlp), b1 (mlp,), w2 (mlp, hidden), b2 (hidden,)
            [w* = PyTorch Linear.weight.T; same math].
    """
    w1, b1, w2, b2 = params["w1"], params["b1"], params["w2"], params["b2"]
    hidden, mlp = w1.shape
    assert w2.shape == (mlp, hidden)

    lead_shape = x.shape[:-1]
    x2 = x.reshape(-1, hidden)
    M = x2.shape[0]

    LANE, SUB = 128, 8
    # Lane-dense, (8,128)-aligned tiles; cap sizes so the double-buffered
    # working set stays well under v7x's 64 MiB physical VMEM.
    Hp = _round_up(hidden, LANE)
    tm = _round_up(min(tile_m, _round_up(M, SUB)), SUB)
    Mp = _round_up(M, tm)
    tj = _round_up(min(tile_j, _round_up(mlp, LANE)), LANE)
    Jp = _round_up(mlp, tj)

    # Zero-padding is exact: gelu(0) == 0 and zero weight rows/cols contribute
    # nothing to the contraction; padded output rows/cols are sliced off.
    xp = _pad2(x2, Mp, Hp)
    w1p = _pad2(w1.astype(compute_dtype), Hp, Jp)
    b1p = _pad2(b1.reshape(1, mlp).astype(jnp.float32), 1, Jp)
    w2p = _pad2(w2.astype(compute_dtype), Jp, Hp)
    b2p = _pad2(b2.reshape(1, hidden).astype(jnp.float32), 1, Hp)

    grid = (Mp // tm, Jp // tj)
    out = pl.pallas_call(
        _mlp_kernel,
        out_shape=jax.ShapeDtypeStruct((Mp, Hp), x.dtype),
        grid_spec=pltpu.PrefetchScalarGridSpec(
            num_scalar_prefetch=0,
            grid=grid,
            in_specs=[
                pl.BlockSpec((tm, Hp), lambda i, j: (i, 0)),   # x row tile
                pl.BlockSpec((Hp, tj), lambda i, j: (0, j)),   # W1 chunk
                pl.BlockSpec((1, tj), lambda i, j: (0, j)),    # b1 chunk
                pl.BlockSpec((tj, Hp), lambda i, j: (j, 0)),   # W2 chunk
                pl.BlockSpec((1, Hp), lambda i, j: (0, 0)),    # b2
            ],
            out_specs=pl.BlockSpec((tm, Hp), lambda i, j: (i, 0)),
            scratch_shapes=[pltpu.VMEM((tm, Hp), jnp.float32)],
        ),
        compiler_params=pltpu.CompilerParams(
            dimension_semantics=("parallel", "arbitrary"),
            vmem_limit_bytes=64 * 1024 * 1024,
        ),
    )(xp, w1p, b1p, w2p, b2p)

    return out[:M, :hidden].reshape(*lead_shape, hidden)


# ----------------------------------- main ------------------------------------

if __name__ == "__main__":
    # Small shapes consistent with the module: MLP acts on (B, n_patches, hidden).
    hidden_ch, mlp_dim, dp_rate = 64, 256, 0.1   # dropout = identity (eval mode)
    B, P = 2, 256

    key = jax.random.PRNGKey(0)
    kx, k1, k2, k3, k4 = jax.random.split(key, 5)
    params = {
        "w1": 0.05 * jax.random.normal(k1, (hidden_ch, mlp_dim), jnp.float32),
        "b1": 0.01 * jax.random.normal(k2, (mlp_dim,), jnp.float32),
        "w2": 0.05 * jax.random.normal(k3, (mlp_dim, hidden_ch), jnp.float32),
        "b2": 0.01 * jax.random.normal(k4, (hidden_ch,), jnp.float32),
    }
    x = jax.random.normal(kx, (B, P, hidden_ch), jnp.float32)

    fwd = jax.jit(mlp_forward)
    y = fwd(x, params)
    jax.block_until_ready(y)

    # Pure-JAX reference (eval mode; PyTorch F.gelu == exact erf form).
    def ref(xx, p):
        h = jax.nn.gelu(xx @ p["w1"] + p["b1"], approximate=False)
        return jax.nn.gelu(h @ p["w2"] + p["b2"], approximate=False)

    y_ref = ref(x, params)
    err = float(jnp.max(jnp.abs(y - y_ref)))
    assert err < 2e-2, f"max abs err {err}"
    print("KERNEL_OK")
</pallas_src>

<mosaic_0001>
module attributes {stable_mosaic.version = 11 : i64} {
  func.func @_mlp_kernel(%arg0: i32, %arg1: i32, %arg2: memref<512x128xf32, #tpu.memory_space<vmem>>, %arg3: memref<128x256xbf16, #tpu.memory_space<vmem>>, %arg4: memref<1x256xf32, #tpu.memory_space<vmem>>, %arg5: memref<256x128xbf16, #tpu.memory_space<vmem>>, %arg6: memref<1x128xf32, #tpu.memory_space<vmem>>, %arg7: memref<512x128xf32, #tpu.memory_space<vmem>>, %arg8: memref<512x128xf32, #tpu.memory_space<vmem>>) attributes {dimension_semantics = [#tpu.dimension_semantics<parallel>, #tpu.dimension_semantics<arbitrary>], iteration_bounds = array<i64: 1, 1>, scalar_prefetch = 0 : i64, scratch_operands = 1 : i64, tpu.core_type = #tpu.core_type<tc>, window_params = [{transform_indices = @transform_0, window_bounds = array<i64: 512, 128>}, {transform_indices = @transform_1, window_bounds = array<i64: 128, 256>}, {transform_indices = @transform_2, window_bounds = array<i64: 1, 256>}, {transform_indices = @transform_3, window_bounds = array<i64: 256, 128>}, {pipeline_mode = #tpu.pipeline_mode<synchronous>, transform_indices = @transform_4, window_bounds = array<i64: 1, 128>}, {transform_indices = @transform_5, window_bounds = array<i64: 512, 128>}]} {
    %c0_i32 = arith.constant 0 : i32
    %0 = arith.cmpi eq, %arg1, %c0_i32 : i32
    %1 = arith.extui %0 : i1 to i32
    %c0_i32_0 = arith.constant 0 : i32
    %2 = arith.cmpi ne, %1, %c0_i32_0 : i32
    scf.if %2 {
      %cst_19 = arith.constant 0.000000e+00 : f32
      %32 = vector.broadcast %cst_19 : f32 to vector<512x128xf32>
      %c0_20 = arith.constant 0 : index
      %c0_21 = arith.constant 0 : index
      %33 = vector.load %arg8[%c0_20, %c0_21] : memref<512x128xf32, #tpu.memory_space<vmem>>, vector<512x128xf32>
      tpu.vector_store %arg8[%c0_20, %c0_21], %32 {strides = array<i32>} : memref<512x128xf32, #tpu.memory_space<vmem>>, vector<512x128xf32>,
    } else {
    }
    %c0 = arith.constant 0 : index
    %c0_1 = arith.constant 0 : index
    %3 = vector.load %arg2[%c0, %c0_1] : memref<512x128xf32, #tpu.memory_space<vmem>>, vector<512x128xf32>
    %4 = arith.truncf %3 : vector<512x128xf32> to vector<512x128xbf16>
    %c0_2 = arith.constant 0 : index
    %c0_3 = arith.constant 0 : index
    %5 = vector.load %arg3[%c0_2, %c0_3] : memref<128x256xbf16, #tpu.memory_space<vmem>>, vector<128x256xbf16>
    %cst = arith.constant dense<0.000000e+00> : vector<512x256xf32>
    %6 = tpu.matmul %4, %5, %cst {dimension_numbers = #tpu.dot_dimension_numbers<[1], [0], [0], [1], [0, 0, 1, 1], [], []>} : vector<512x128xbf16>, vector<128x256xbf16>, vector<512x256xf32> -> vector<512x256xf32>
    %c0_4 = arith.constant 0 : index
    %c0_5 = arith.constant 0 : index
    %7 = vector.load %arg4[%c0_4, %c0_5] : memref<1x256xf32, #tpu.memory_space<vmem>>, vector<1x256xf32>
    %8 = vector.broadcast %7 : vector<1x256xf32> to vector<512x256xf32>
    %9 = arith.addf %6, %8 : vector<512x256xf32>
    %cst_6 = arith.constant 5.000000e-01 : f32
    %10 = vector.broadcast %cst_6 : f32 to vector<512x256xf32>
    %11 = arith.mulf %10, %9 : vector<512x256xf32>
    %cst_7 = arith.constant 4.471500e-02 : f32
    %12 = vector.broadcast %cst_7 : f32 to vector<512x256xf32>
    %13 = arith.mulf %12, %9 : vector<512x256xf32>
    %14 = arith.mulf %13, %9 : vector<512x256xf32>
    %15 = arith.mulf %14, %9 : vector<512x256xf32>
    %16 = arith.addf %9, %15 : vector<512x256xf32>
    %cst_8 = arith.constant 0.797884583 : f32
    %17 = vector.broadcast %cst_8 : f32 to vector<512x256xf32>
    %18 = arith.mulf %17, %16 : vector<512x256xf32>
    %19 = math.tanh %18 : vector<512x256xf32>
    %cst_9 = arith.constant 1.000000e+00 : f32
    %20 = vector.broadcast %cst_9 : f32 to vector<512x256xf32>
    %21 = arith.addf %20, %19 : vector<512x256xf32>
    %22 = arith.mulf %11, %21 : vector<512x256xf32>
    %c0_10 = arith.constant 0 : index
    %c0_11 = arith.constant 0 : index
    %23 = vector.load %arg8[%c0_10, %c0_11] : memref<512x128xf32, #tpu.memory_space<vmem>>, vector<512x128xf32>
    %24 = arith.truncf %22 : vector<512x256xf32> to vector<512x256xbf16>
    %c0_12 = arith.constant 0 : index
    %c0_13 = arith.constant 0 : index
    %25 = vector.load %arg5[%c0_12, %c0_13] : memref<256x128xbf16, #tpu.memory_space<vmem>>, vector<256x128xbf16>
    %cst_14 = arith.constant dense<0.000000e+00> : vector<512x128xf32>
    %26 = tpu.matmul %24, %25, %cst_14 {dimension_numbers = #tpu.dot_dimension_numbers<[1], [0], [0], [1], [0, 0, 1, 1], [], []>} : vector<512x256xbf16>, vector<256x128xbf16>, vector<512x128xf32> -> vector<512x128xf32>
    %27 = arith.addf %23, %26 : vector<512x128xf32>
    %c0_15 = arith.constant 0 : index
    %c0_16 = arith.constant 0 : index
    %28 = vector.load %arg8[%c0_15, %c0_16] : memref<512x128xf32, #tpu.memory_space<vmem>>, vector<512x128xf32>
    tpu.vector_store %arg8[%c0_15, %c0_16], %27 {strides = array<i32>} : memref<512x128xf32, #tpu.memory_space<vmem>>, vector<512x128xf32>,
    %c0_i32_17 = arith.constant 0 : i32
    %29 = arith.cmpi eq, %arg1, %c0_i32_17 : i32
    %30 = arith.extui %29 : i1 to i32
    %c0_i32_18 = arith.constant 0 : i32
    %31 = arith.cmpi ne, %30, %c0_i32_18 : i32
    scf.if %31 {
      %c0_19 = arith.constant 0 : index
      %c0_20 = arith.constant 0 : index
      %32 = vector.load %arg8[%c0_19, %c0_20] : memref<512x128xf32, #tpu.memory_space<vmem>>, vector<512x128xf32>
      %c0_21 = arith.constant 0 : index
      %c0_22 = arith.constant 0 : index
      %33 = vector.load %arg6[%c0_21, %c0_22] : memref<1x128xf32, #tpu.memory_space<vmem>>, vector<1x128xf32>
      %34 = vector.broadcast %33 : vector<1x128xf32> to vector<512x128xf32>
      %35 = arith.addf %32, %34 : vector<512x128xf32>
      %cst_23 = arith.constant 5.000000e-01 : f32
      %36 = vector.broadcast %cst_23 : f32 to vector<512x128xf32>
      %37 = arith.mulf %36, %35 : vector<512x128xf32>
      %cst_24 = arith.constant 4.471500e-02 : f32
      %38 = vector.broadcast %cst_24 : f32 to vector<512x128xf32>
      %39 = arith.mulf %38, %35 : vector<512x128xf32>
      %40 = arith.mulf %39, %35 : vector<512x128xf32>
      %41 = arith.mulf %40, %35 : vector<512x128xf32>
      %42 = arith.addf %35, %41 : vector<512x128xf32>
      %cst_25 = arith.constant 0.797884583 : f32
      %43 = vector.broadcast %cst_25 : f32 to vector<512x128xf32>
      %44 = arith.mulf %43, %42 : vector<512x128xf32>
      %45 = math.tanh %44 : vector<512x128xf32>
      %cst_26 = arith.constant 1.000000e+00 : f32
      %46 = vector.broadcast %cst_26 : f32 to vector<512x128xf32>
      %47 = arith.addf %46, %45 : vector<512x128xf32>
      %48 = arith.mulf %37, %47 : vector<512x128xf32>
      %c0_27 = arith.constant 0 : index
      %c0_28 = arith.constant 0 : index
      %49 = vector.load %arg7[%c0_27, %c0_28] : memref<512x128xf32, #tpu.memory_space<vmem>>, vector<512x128xf32>
      tpu.vector_store %arg7[%c0_27, %c0_28], %48 {strides = array<i32>} : memref<512x128xf32, #tpu.memory_space<vmem>>, vector<512x128xf32>,
    } else {
    }
    return
  }
  func.func @transform_0(%arg0: i32, %arg1: i32) -> (i32, i32) {
    %c0_i32 = arith.constant 0 : i32
    %c0_i32_0 = arith.constant 0 : i32
    return %arg0, %c0_i32 : i32, i32
  }
  func.func @transform_1(%arg0: i32, %arg1: i32) -> (i32, i32) {
    %c0_i32 = arith.constant 0 : i32
    %c0_i32_0 = arith.constant 0 : i32
    return %c0_i32, %arg1 : i32, i32
  }
  func.func @transform_2(%arg0: i32, %arg1: i32) -> (i32, i32) {
    %c0_i32 = arith.constant 0 : i32
    %c0_i32_0 = arith.constant 0 : i32
    return %c0_i32, %arg1 : i32, i32
  }
  func.func @transform_3(%arg0: i32, %arg1: i32) -> (i32, i32) {
    %c0_i32 = arith.constant 0 : i32
    %c0_i32_0 = arith.constant 0 : i32
    return %arg1, %c0_i32 : i32, i32
  }
  func.func @transform_4(%arg0: i32, %arg1: i32) -> (i32, i32) {
    %c0_i32 = arith.constant 0 : i32
    %c0_i32_0 = arith.constant 0 : i32
    %c0_i32_1 = arith.constant 0 : i32
    return %c0_i32, %c0_i32_0 : i32, i32
  }
  func.func @transform_5(%arg0: i32, %arg1: i32) -> (i32, i32) {
    %c0_i32 = arith.constant 0 : i32
    %c0_i32_0 = arith.constant 0 : i32
    return %arg0, %c0_i32 : i32, i32
  }
}

</mosaic_0001>

<bundles_post_ra>
// kernel: mlp_forward.1
= control target key start
LH: loop header
LB: loop body
LE: loop exit
PB: predicated region body
PF: predicated region fallthrough
CT: control target
= control target key end

     0   :  { %s5752_s1 = inlined_call_operand.vmem [shape: bf16[128,256], index: 1, kind: input, shape index: {}]   ;;  %s5753_s0 = inlined_call_operand.vmem [shape: f32[512,128], index: 0, kind: input, shape index: {}]   ;;  %s5754_s3 = inlined_call_operand.vmem [shape: bf16[256,128], index: 3, kind: input, shape index: {}]   ;;  %s5755_s2 = inlined_call_operand.vmem [shape: f32[1,256], index: 2, kind: input, shape index: {}]   ;;  %s5756_s4 = inlined_call_operand.vmem [shape: f32[1,128], index: 4, kind: input, shape index: {}]   ;;  %s5757_s5 = inlined_call_operand.vmem [shape: f32[512,128], index: 5, kind: output, shape index: {}]  }
   0x1   :  { %v3335_v0 = vld [vmem:[%s5752_s1 + $0x70] sm:$0xf]  ;;  %v3420_v1 = vld [vmem:[%s5752_s1 + $0x74] sm:$0xf0]  ;;  %v3419_v2 = vld [vmem:[%s5752_s1 + $0x74] sm:$0xf] }
   0x2   :  { %v3336_v3 = vor.u32 %v3420_v1, %v3335_v0  ;;  %v3337_v4 = vld [vmem:[%s5752_s1 + $0x78] sm:$0xf0]  ;;  %v3327_v5 = vld [vmem:[%s5752_s1 + $0x60] sm:$0xf]  ;;  %v3418_v6 = vld [vmem:[%s5752_s1 + $0x64] sm:$0xf0] }
   0x3   :  { %v3340_v7 = vor.u32 %v3419_v2, %v3337_v4  ;;  %v3417_v8 = vld [vmem:[%s5752_s1 + $0x64] sm:$0xf]  ;;  %v3329_v9 = vld [vmem:[%s5752_s1 + $0x68] sm:$0xf0]  ;;  %v3328_v10 = vor.u32 %v3418_v6, %v3327_v5  ;;  %v3319_v12 = vld [vmem:[%s5752_s1 + $0x50] sm:$0xf] }
   0x4   :  { %286 = vmatpush.bf16.msra.mxu0 %v3336_v3  ;;  %v3332_v11 = vor.u32 %v3417_v8, %v3329_v9  ;;  %v3416_v13 = vld [vmem:[%s5752_s1 + $0x54] sm:$0xf0]  ;;  %v3415_v14 = vld [vmem:[%s5752_s1 + $0x54] sm:$0xf]  ;;  %v3321_v15 = vld [vmem:[%s5752_s1 + $0x58] sm:$0xf0] }
   0x5   :  { %455 = vmatpush.bf16.msra.mxu1 %v3340_v7  ;;  %v3320_v16 = vor.u32 %v3416_v13, %v3319_v12  ;;  %v3324_v17 = vor.u32 %v3415_v14, %v3321_v15  ;;  %v3311_v18 = vld [vmem:[%s5752_s1 + $0x40] sm:$0xf]  ;;  %v3414_v19 = vld [vmem:[%s5752_s1 + $0x44] sm:$0xf0]  ;;  %v3413_v20 = vld [vmem:[%s5752_s1 + $0x44] sm:$0xf] }
   0x6   :  { %v3313_v21 = vld [vmem:[%s5752_s1 + $0x48] sm:$0xf0]  ;;  %v3312_v22 = vor.u32 %v3414_v19, %v3311_v18  ;;  %v3303_v24 = vld [vmem:[%s5752_s1 + $0x30] sm:$0xf]  ;;  %v3412_v25 = vld [vmem:[%s5752_s1 + $0x34] sm:$0xf0] }
   0x7   :  { %v3316_v23 = vor.u32 %v3413_v20, %v3313_v21  ;;  %v3411_v26 = vld [vmem:[%s5752_s1 + $0x34] sm:$0xf]  ;;  %v3305_v27 = vld [vmem:[%s5752_s1 + $0x38] sm:$0xf0]  ;;  %v3304_v28 = vor.u32 %v3412_v25, %v3303_v24  ;;  %v3295_v30 = vld [vmem:[%s5752_s1 + $0x20] sm:$0xf] }
   0x8   :  { %287 = vmatpush.bf16.msra.mxu0 %v3328_v10  ;;  %v3308_v29 = vor.u32 %v3411_v26, %v3305_v27  ;;  %v3410_v31 = vld [vmem:[%s5752_s1 + $0x24] sm:$0xf0]  ;;  %v3409_v32 = vld [vmem:[%s5752_s1 + $0x24] sm:$0xf]  ;;  %v3297_v33 = vld [vmem:[%s5752_s1 + $0x28] sm:$0xf0] }
   0x9   :  { %456 = vmatpush.bf16.msra.mxu1 %v3332_v11  ;;  %v3296_v34 = vor.u32 %v3410_v31, %v3295_v30  ;;  %v3300_v35 = vor.u32 %v3409_v32, %v3297_v33  ;;  %v3287_v36 = vld [vmem:[%s5752_s1 + $0x10] sm:$0xf]  ;;  %v3408_v37 = vld [vmem:[%s5752_s1 + $0x14] sm:$0xf0]  ;;  %v3407_v38 = vld [vmem:[%s5752_s1 + $0x14] sm:$0xf] }
   0xa   :  { %v3289_v39 = vld [vmem:[%s5752_s1 + $0x18] sm:$0xf0]  ;;  %v3288_v40 = vor.u32 %v3408_v37, %v3287_v36  ;;  %v3279_v42 = vld [vmem:[%s5752_s1] sm:$0xf]  ;;  %v3406_v43 = vld [vmem:[%s5752_s1 + $0x4] sm:$0xf0] }
   0xb   :  { %v3292_v41 = vor.u32 %v3407_v38, %v3289_v39  ;;  %v3405_v44 = vld [vmem:[%s5752_s1 + $0x4] sm:$0xf]  ;;  %v3281_v45 = vld [vmem:[%s5752_s1 + $0x8] sm:$0xf0]  ;;  %v3280_v46 = vor.u32 %v3406_v43, %v3279_v42  ;;  %v90_v51 = vld [vmem:[%s5753_s0 + $0x10] sm:$0xff] }
   0xc   :  { %288 = vmatpush.bf16.msra.mxu0 %v3320_v16  ;;  %v88_v47 = vld [vmem:[%s5753_s0] sm:$0xff]  ;;  %v89_v48 = vld [vmem:[%s5753_s0 + $0x8] sm:$0xff]  ;;  %v3284_v49 = vor.u32 %v3405_v44, %v3281_v45  ;;  %v91_v52 = vld [vmem:[%s5753_s0 + $0x18] sm:$0xff] }
   0xd   :  { %457 = vmatpush.bf16.msra.mxu1 %v3324_v17  ;;  %v152_v50 = vpack.c.bf16 %v89_v48, %v88_v47  ;;  %v153_v53 = vpack.c.bf16 %v91_v52, %v90_v51  ;;  %v92_v54 = vld [vmem:[%s5753_s0 + $0x20] sm:$0xff]  ;;  %v93_v55 = vld [vmem:[%s5753_s0 + $0x28] sm:$0xff]  ;;  %v94_v57 = vld [vmem:[%s5753_s0 + $0x30] sm:$0xff] }
   0xe   :  { %v154_v56 = vpack.c.bf16 %v93_v55, %v92_v54  ;;  %v95_v58 = vld [vmem:[%s5753_s0 + $0x38] sm:$0xff]  ;;  %v96_v60 = vld [vmem:[%s5753_s0 + $0x40] sm:$0xff]  ;;  %v97_v61 = vld [vmem:[%s5753_s0 + $0x48] sm:$0xff] }
   0xf   :  { %v155_v59 = vpack.c.bf16 %v95_v58, %v94_v57  ;;  %v156_v62 = vpack.c.bf16 %v97_v61, %v96_v60  ;;  %v98_v63 = vld [vmem:[%s5753_s0 + $0x50] sm:$0xff]  ;;  %v99_v0 = vld [vmem:[%s5753_s0 + $0x58] sm:$0xff]  ;;  %v100_v2 = vld [vmem:[%s5753_s0 + $0x60] sm:$0xff] }
  0x10   :  { %289 = vmatpush.bf16.msra.mxu0 %v3312_v22  ;;  %v157_v1 = vpack.c.bf16 %v99_v0, %v98_v63  ;;  %v101_v3 = vld [vmem:[%s5753_s0 + $0x68] sm:$0xff]  ;;  %v3428_v5 = vld [vmem:[%s5754_s3 + $0x38] sm:$0xff]  ;;  %v3427_v7 = vld [vmem:[%s5754_s3 + $0x30] sm:$0xff] }
  0x11   :  { %458 = vmatpush.bf16.msra.mxu1 %v3316_v23  ;;  %v158_v4 = vpack.c.bf16 %v101_v3, %v100_v2  ;;  %v3436_v6 = vld [vmem:[%s5754_s3 + $0x78] sm:$0xff]  ;;  %2032 = vmatpush.bf16.msra.mxu2 %v3428_v5  ;;  %v3435_v8 = vld [vmem:[%s5754_s3 + $0x70] sm:$0xff]  ;;  %v3426_v9 = vld [vmem:[%s5754_s3 + $0x28] sm:$0xff] }
  0x12   :  { %2201 = vmatpush.bf16.msra.mxu3 %v3436_v6  ;;  %v3434_v10 = vld [vmem:[%s5754_s3 + $0x68] sm:$0xff]  ;;  %v102_v11 = vld [vmem:[%s5753_s0 + $0x70] sm:$0xff]  ;;  %v103_v12 = vld [vmem:[%s5753_s0 + $0x78] sm:$0xff] }
  0x13   :  { %v3425_v13 = vld [vmem:[%s5754_s3 + $0x20] sm:$0xff]  ;;  %v159_v15 = vpack.c.bf16 %v103_v12, %v102_v11  ;;  %v3424_v16 = vld [vmem:[%s5754_s3 + $0x18] sm:$0xff]  ;;  %v3423_v18 = vld [vmem:[%s5754_s3 + $0x10] sm:$0xff] }
  0x14   :  { %290 = vmatpush.bf16.msra.mxu0 %v3304_v28  ;;  %v3433_v14 = vld [vmem:[%s5754_s3 + $0x60] sm:$0xff]  ;;  %v3432_v17 = vld [vmem:[%s5754_s3 + $0x58] sm:$0xff]  ;;  %v3431_v19 = vld [vmem:[%s5754_s3 + $0x50] sm:$0xff] }
  0x15   :  { %459 = vmatpush.bf16.msra.mxu1 %v3308_v29  ;;  %2033 = vmatpush.bf16.msra.mxu2 %v3427_v7  ;;  %v200_v20 = vld [vmem:[%s5755_s2] sm:$0x3]  ;;  %v3422_v21 = vld [vmem:[%s5754_s3 + $0x8] sm:$0xff]  ;;  %v106_v47 = vld [vmem:[%s5753_s0 + $0x90] sm:$0xff] }
  0x16   :  { %2202 = vmatpush.bf16.msra.mxu3 %v3435_v8  ;;  %v3430_v22 = vld [vmem:[%s5754_s3 + $0x48] sm:$0xff]  ;;  %v104_v23 = vld [vmem:[%s5753_s0 + $0x80] sm:$0xff]  ;;  %v4054_v26 = vperm.slane %v200_v20, 0  ;;  %v4059_v28 = vperm.slane %v200_v20, 1  ;;  %v107_v48 = vld [vmem:[%s5753_s0 + $0x98] sm:$0xff] }
  0x17   :  { %v105_v24 = vld [vmem:[%s5753_s0 + $0x88] sm:$0xff]  ;;  %v3421_v25 = vld [vmem:[%s5754_s3] sm:$0xff]  ;;  %v161_v54 = vpack.c.bf16 %v107_v48, %v106_v47 }
  0x18   :  { %291 = vmatpush.bf16.msra.mxu0 %v3296_v34  ;;  %v3429_v27 = vld [vmem:[%s5754_s3 + $0x40] sm:$0xff]  ;;  %v160_v29 = vpack.c.bf16 %v105_v24, %v104_v23 }
  0x19   :  { %460 = vmatpush.bf16.msra.mxu1 %v3300_v35  ;;  %2034 = vmatpush.bf16.msra.mxu2 %v3426_v9 }
  0x1a   :  { %2203 = vmatpush.bf16.msra.mxu3 %v3434_v10 }
  0x1c   :  { %292 = vmatpush.bf16.msra.mxu0 %v3288_v40 }
  0x1d   :  { %461 = vmatpush.bf16.msra.mxu1 %v3292_v41  ;;  %2035 = vmatpush.bf16.msra.mxu2 %v3425_v13 }
  0x1e   :  { %2204 = vmatpush.bf16.msra.mxu3 %v3433_v14 }
  0x20   :  { %293 = vmatpush.bf16.msra.mxu0 %v3280_v46 }
  0x21   :  { %462 = vmatpush.bf16.msra.mxu1 %v3284_v49  ;;  %2036 = vmatpush.bf16.msra.mxu2 %v3424_v16 }
  0x22   :  { %2205 = vmatpush.bf16.msra.mxu3 %v3432_v17 }
  0x23   :  { %294 = vmatmul.bf16.vlgmr.msra.gmra.mxu0 %v152_v50 }
  0x24   :  { %463 = vmatmul.bf16.vlgmr.msra.gmra.mxu1 %v152_v50 }
  0x25   :  { %2037 = vmatpush.bf16.msra.mxu2 %v3423_v18 }
  0x26   :  { %2206 = vmatpush.bf16.msra.mxu3 %v3431_v19  ;;  %v108_v19 = vld [vmem:[%s5753_s0 + $0xa0] sm:$0xff] }
  0x29   :  { %2038 = vmatpush.bf16.msra.mxu2 %v3422_v21 }
  0x2a   :  { %2207 = vmatpush.bf16.msra.mxu3 %v3430_v22 }
  0x2d   :  { %2039 = vmatpush.bf16.msra.mxu2 %v3421_v25  ;;  %v109_v25 = vld [vmem:[%s5753_s0 + $0xa8] sm:$0xff] }
  0x2e   :  { %2208 = vmatpush.bf16.msra.mxu3 %v3429_v27 }
  0x33   :  { %299 = vmatmul.bf16.gmra.mxu0 %v153_v53 }
  0x34   :  { %468 = vmatmul.bf16.gmra.mxu1 %v153_v53 }
  0x43   :  { %304 = vmatmul.bf16.gmra.mxu0 %v154_v56 }
  0x44   :  { %473 = vmatmul.bf16.gmra.mxu1 %v154_v56 }
  0x53   :  { %309 = vmatmul.bf16.gmra.mxu0 %v155_v59 }
  0x54   :  { %478 = vmatmul.bf16.gmra.mxu1 %v155_v59 }
  0x63   :  { %314 = vmatmul.bf16.gmra.mxu0 %v156_v62 }
  0x64   :  { %483 = vmatmul.bf16.gmra.mxu1 %v156_v62 }
  0x73   :  { %319 = vmatmul.bf16.gmra.mxu0 %v157_v1 }
  0x74   :  { %488 = vmatmul.bf16.gmra.mxu1 %v157_v1 }
  0x83   :  { %324 = vmatmul.bf16.gmra.mxu0 %v158_v4 }
  0x84   :  { %493 = vmatmul.bf16.gmra.mxu1 %v158_v4 }
  0x93   :  { %329 = vmatmul.bf16.gmra.mxu0 %v159_v15 }
  0x94   :  { %498 = vmatmul.bf16.gmra.mxu1 %v159_v15 }
  0xa0   :  { %v295_v30 = vpop.f32.mrf.mxu0 }
  0xa1   :  { %v296_v31 = vadd.f32 %v295_v30, %v4054_v26  ;;  %v464_v32 = vpop.f32.mrf.mxu1 }
  0xa2   :  { %v465_v33 = vadd.f32 %v464_v32, %v4059_v28 }
  0xa3   :  { %v752_v34 = vmul.f32 0.044715, %v296_v31  ;;  %334 = vmatmul.bf16.gmra.mxu0 %v160_v29  ;;  %v624_v17 = vmul.f32 0.5, %v296_v31 }
  0xa4   :  { %v753_v35 = vmul.f32 0.044715, %v465_v33  ;;  %503 = vmatmul.bf16.gmra.mxu1 %v160_v29  ;;  %v625_v24 = vmul.f32 0.5, %v465_v33 }
  0xa5   :  { %v880_v36 = vmul.f32 %v752_v34, %v296_v31 }
  0xa6   :  { %v881_v37 = vmul.f32 %v753_v35, %v465_v33 }
  0xa7   :  { %v1008_v38 = vmul.f32 %v880_v36, %v296_v31 }
  0xa8   :  { %v297_v39 = vpop.f32.mrf.mxu0  ;;  %v1009_v40 = vmul.f32 %v881_v37, %v465_v33 }
  0xa9   :  { %v298_v41 = vadd.f32 %v297_v39, %v4054_v26  ;;  %v466_v42 = vpop.f32.mrf.mxu1  ;;  %v1136_v43 = vadd.f32 %v1008_v38, %v296_v31 }
  0xaa   :  { %v467_v44 = vadd.f32 %v466_v42, %v4059_v28  ;;  %v1137_v45 = vadd.f32 %v1009_v40, %v465_v33  ;;  %v162_v40 = vpack.c.bf16 %v109_v25, %v108_v19 }
  0xab   :  { %v754_v46 = vmul.f32 0.044715, %v298_v41  ;;  %v1264_v51 = vmul.f32 0.7978846, %v1136_v43  ;;  %v626_v22 = vmul.f32 0.5, %v298_v41 }
  0xac   :  { %v755_v49 = vmul.f32 0.044715, %v467_v44  ;;  %v1265_v53 = vmul.f32 0.7978846, %v1137_v45  ;;  %v627_v29 = vmul.f32 0.5, %v467_v44 }
  0xad   :  { %v882_v50 = vmul.f32 %v754_v46, %v298_v41  ;;  %3438 = vtanh.f32 %v1264_v51 }
  0xae   :  { %v883_v52 = vmul.f32 %v755_v49, %v467_v44  ;;  %3440 = vtanh.f32 %v1265_v53 }
  0xaf   :  { %v1010_v55 = vmul.f32 %v882_v50, %v298_v41 }
  0xb0   :  { %v300_v56 = vpop.f32.mrf.mxu0  ;;  %v1011_v57 = vmul.f32 %v883_v52, %v467_v44 }
  0xb1   :  { %v4072_v58 = vadd.f32 %v300_v56, %v4054_v26  ;;  %v469_v59 = vpop.f32.mrf.mxu1  ;;  %v1138_v60 = vadd.f32 %v1010_v55, %v298_v41 }
  0xb2   :  { %v4075_v61 = vadd.f32 %v469_v59, %v4059_v28  ;;  %v1139_v62 = vadd.f32 %v1011_v57, %v467_v44 }
  0xb3   :  { %v756_v63 = vmul.f32 0.044715, %v4072_v58  ;;  %339 = vmatmul.bf16.gmra.mxu0 %v161_v54  ;;  %v1266_v0 = vmul.f32 0.7978846, %v1138_v60  ;;  %v3439_v5 = vpop.eup %3438 }
  0xb4   :  { %v757_v1 = vmul.f32 0.044715, %v4075_v61  ;;  %508 = vmatmul.bf16.gmra.mxu1 %v161_v54  ;;  %v1267_v2 = vmul.f32 0.7978846, %v1139_v62  ;;  %v3441_v7 = vpop.eup %3440  ;;  %v1520_v14 = vadd.f32 1.0, %v3439_v5 }
  0xb5   :  { %3442 = vtanh.f32 %v1266_v0  ;;  %v884_v3 = vmul.f32 %v756_v63, %v4072_v58  ;;  %v1521_v18 = vadd.f32 1.0, %v3441_v7 }
  0xb6   :  { %3444 = vtanh.f32 %v1267_v2  ;;  %v885_v4 = vmul.f32 %v757_v1, %v4075_v61  ;;  %v1648_v34 = vmul.f32 %v1520_v14, %v624_v17 }
  0xb7   :  { %v1012_v6 = vmul.f32 %v884_v3, %v4072_v58  ;;  %v1649_v38 = vmul.f32 %v1521_v18, %v625_v24 }
  0xb8   :  { %v302_v8 = vpop.f32.mrf.mxu0  ;;  %v1013_v9 = vmul.f32 %v885_v4, %v4075_v61 }
  0xb9   :  { %v4084_v10 = vadd.f32 %v302_v8, %v4054_v26  ;;  %v471_v11 = vpop.f32.mrf.mxu1  ;;  %v1140_v12 = vadd.f32 %v1012_v6, %v4072_v58  ;;  %v628_v6 = vmul.f32 0.5, %v4072_v58  ;;  %v110_v8 = vld [vmem:[%s5753_s0 + $0xb0] sm:$0xff] }
  0xba   :  { %v4088_v13 = vadd.f32 %v471_v11, %v4059_v28  ;;  %v1141_v15 = vadd.f32 %v1013_v9, %v4075_v61 }
  0xbb   :  { %v3443_v16 = vpop.eup %3442  ;;  %v758_v20 = vmul.f32 0.044715, %v4084_v10  ;;  %v1268_v32 = vmul.f32 0.7978846, %v1140_v12  ;;  %v630_v12 = vmul.f32 0.5, %v4084_v10 }
  0xbc   :  { %v3445_v21 = vpop.eup %3444  ;;  %v1522_v23 = vadd.f32 1.0, %v3443_v16  ;;  %v759_v27 = vmul.f32 0.044715, %v4088_v13  ;;  %v1269_v37 = vmul.f32 0.7978846, %v1141_v15  ;;  %v629_v15 = vmul.f32 0.5, %v4075_v61 }
  0xbd   :  { %v1523_v30 = vadd.f32 1.0, %v3445_v21  ;;  %v886_v31 = vmul.f32 %v758_v20, %v4084_v10  ;;  %3446 = vtanh.f32 %v1268_v32  ;;  %v111_v16 = vld [vmem:[%s5753_s0 + $0xb8] sm:$0xff]  ;;  %v631_v58 = vmul.f32 0.5, %v4088_v13 }
  0xbe   :  { %v1650_v35 = vmul.f32 %v1522_v23, %v626_v22  ;;  %v887_v36 = vmul.f32 %v759_v27, %v4088_v13  ;;  %3448 = vtanh.f32 %v1269_v37  ;;  %v163_v61 = vpack.c.bf16 %v111_v16, %v110_v8 }
  0xbf   :  { %v1651_v39 = vmul.f32 %v1523_v30, %v627_v29  ;;  %v1014_v33 = vmul.f32 %v886_v31, %v4084_v10 }
  0xc0   :  { %v305_v41 = vpop.f32.mrf.mxu0  ;;  %v1840_v42 = vpack.c.bf16 %v1650_v35, %v1648_v34  ;;  %v1015_v43 = vmul.f32 %v887_v36, %v4088_v13 }
  0xc1   :  { %v4104_v44 = vadd.f32 %v305_v41, %v4054_v26  ;;  %v474_v45 = vpop.f32.mrf.mxu1  ;;  %v1841_v46 = vpack.c.bf16 %v1651_v39, %v1649_v38  ;;  %v1142_v47 = vadd.f32 %v1014_v33, %v4084_v10 }
  0xc2   :  { %v4108_v48 = vadd.f32 %v474_v45, %v4059_v28  ;;  %2040 = vmatmul.bf16.vlgmr.msra.gmra.mxu2 %v1840_v42  ;;  %v1143_v49 = vadd.f32 %v1015_v43, %v4088_v13 }
  0xc3   :  { %v760_v50 = vmul.f32 0.044715, %v4104_v44  ;;  %2209 = vmatmul.bf16.vlgmr.msra.gmra.mxu3 %v1841_v46  ;;  %344 = vmatmul.bf16.gmra.mxu0 %v162_v40  ;;  %v1270_v51 = vmul.f32 0.7978846, %v1142_v47  ;;  %v3447_v56 = vpop.eup %3446 }
  0xc4   :  { %v761_v52 = vmul.f32 0.044715, %v4108_v48  ;;  %513 = vmatmul.bf16.gmra.mxu1 %v162_v40  ;;  %v1271_v53 = vmul.f32 0.7978846, %v1143_v49  ;;  %v3449_v59 = vpop.eup %3448  ;;  %v1524_v3 = vadd.f32 1.0, %v3447_v56 }
  0xc5   :  { %3450 = vtanh.f32 %v1270_v51  ;;  %v888_v54 = vmul.f32 %v760_v50, %v4104_v44  ;;  %v1525_v7 = vadd.f32 1.0, %v3449_v59 }
  0xc6   :  { %3452 = vtanh.f32 %v1271_v53  ;;  %v889_v55 = vmul.f32 %v761_v52, %v4108_v48  ;;  %v1652_v21 = vmul.f32 %v1524_v3, %v628_v6 }
  0xc7   :  { %v1016_v57 = vmul.f32 %v888_v54, %v4104_v44  ;;  %v1653_v24 = vmul.f32 %v1525_v7, %v629_v15 }
  0xc8   :  { %v307_v60 = vpop.f32.mrf.mxu0  ;;  %v1017_v62 = vmul.f32 %v889_v55, %v4108_v48 }
  0xc9   :  { %v4118_v63 = vadd.f32 %v307_v60, %v4054_v26  ;;  %v476_v0 = vpop.f32.mrf.mxu1  ;;  %v1144_v1 = vadd.f32 %v1016_v57, %v4104_v44  ;;  %v632_v57 = vmul.f32 0.5, %v4104_v44  ;;  %v112_v60 = vld [vmem:[%s5753_s0 + $0xc0] sm:$0xff] }
  0xca   :  { %v4122_v2 = vadd.f32 %v476_v0, %v4059_v28  ;;  %v1145_v4 = vadd.f32 %v1017_v62, %v4108_v48 }
  0xcb   :  { %v3451_v5 = vpop.eup %3450  ;;  %v762_v9 = vmul.f32 0.044715, %v4118_v63  ;;  %v1272_v20 = vmul.f32 0.7978846, %v1144_v1  ;;  %v634_v1 = vmul.f32 0.5, %v4118_v63 }
  0xcc   :  { %v3453_v11 = vpop.eup %3452  ;;  %v1526_v14 = vadd.f32 1.0, %v3451_v5  ;;  %v763_v17 = vmul.f32 0.044715, %v4122_v2  ;;  %v1273_v10 = vmul.f32 0.7978846, %v1145_v4  ;;  %v633_v4 = vmul.f32 0.5, %v4108_v48 }
  0xcd   :  { %v1527_v18 = vadd.f32 1.0, %v3453_v11  ;;  %v890_v19 = vmul.f32 %v762_v9, %v4118_v63  ;;  %3454 = vtanh.f32 %v1272_v20  ;;  %v113_v5 = vld [vmem:[%s5753_s0 + $0xc8] sm:$0xff]  ;;  %v635_v44 = vmul.f32 0.5, %v4122_v2 }
  0xce   :  { %v1654_v22 = vmul.f32 %v1526_v14, %v630_v12  ;;  %v891_v23 = vmul.f32 %v763_v17, %v4122_v2  ;;  %3456 = vtanh.f32 %v1273_v10  ;;  %v164_v48 = vpack.c.bf16 %v113_v5, %v112_v60 }
  0xcf   :  { %v1655_v25 = vmul.f32 %v1527_v18, %v631_v58  ;;  %v1018_v27 = vmul.f32 %v890_v19, %v4118_v63 }
  0xd0   :  { %v310_v29 = vpop.f32.mrf.mxu0  ;;  %v1842_v30 = vpack.c.bf16 %v1654_v22, %v1652_v21  ;;  %v1019_v31 = vmul.f32 %v891_v23, %v4122_v2 }
  0xd1   :  { %v4142_v13 = vadd.f32 %v310_v29, %v4054_v26  ;;  %v479_v32 = vpop.f32.mrf.mxu1  ;;  %v1843_v34 = vpack.c.bf16 %v1655_v25, %v1653_v24  ;;  %v1146_v35 = vadd.f32 %v1018_v27, %v4118_v63 }
  0xd2   :  { %v4146_v36 = vadd.f32 %v479_v32, %v4059_v28  ;;  %2045 = vmatmul.bf16.gmra.mxu2 %v1842_v30  ;;  %v1147_v37 = vadd.f32 %v1019_v31, %v4122_v2 }
  0xd3   :  { %v764_v38 = vmul.f32 0.044715, %v4142_v13  ;;  %2214 = vmatmul.bf16.gmra.mxu3 %v1843_v34  ;;  %349 = vmatmul.bf16.gmra.mxu0 %v163_v61  ;;  %v1274_v39 = vmul.f32 0.7978846, %v1146_v35  ;;  %v3455_v43 = vpop.eup %3454 }
  0xd4   :  { %v765_v40 = vmul.f32 0.044715, %v4146_v36  ;;  %518 = vmatmul.bf16.gmra.mxu1 %v163_v61  ;;  %v1275_v33 = vmul.f32 0.7978846, %v1147_v37  ;;  %v3457_v46 = vpop.eup %3456  ;;  %v1528_v54 = vadd.f32 1.0, %v3455_v43 }
  0xd5   :  { %3458 = vtanh.f32 %v1274_v39  ;;  %v892_v41 = vmul.f32 %v764_v38, %v4142_v13  ;;  %v1529_v59 = vadd.f32 1.0, %v3457_v46 }
  0xd6   :  { %3460 = vtanh.f32 %v1275_v33  ;;  %v893_v42 = vmul.f32 %v765_v40, %v4146_v36  ;;  %v1656_v11 = vmul.f32 %v1528_v54, %v632_v57 }
  0xd7   :  { %v1020_v45 = vmul.f32 %v892_v41, %v4142_v13  ;;  %v1657_v15 = vmul.f32 %v1529_v59, %v633_v4 }
  0xd8   :  { %v312_v47 = vpop.f32.mrf.mxu0  ;;  %v1021_v49 = vmul.f32 %v893_v42, %v4146_v36 }
  0xd9   :  { %v4156_v50 = vadd.f32 %v312_v47, %v4054_v26  ;;  %v481_v51 = vpop.f32.mrf.mxu1  ;;  %v1148_v52 = vadd.f32 %v1020_v45, %v4142_v13  ;;  %v636_v45 = vmul.f32 0.5, %v4142_v13  ;;  %v114_v47 = vld [vmem:[%s5753_s0 + $0xd0] sm:$0xff] }
  0xda   :  { %v4160_v53 = vadd.f32 %v481_v51, %v4059_v28  ;;  %v1149_v55 = vadd.f32 %v1021_v49, %v4146_v36 }
  0xdb   :  { %v3459_v56 = vpop.eup %3458  ;;  %v766_v62 = vmul.f32 0.044715, %v4156_v50  ;;  %v1276_v9 = vmul.f32 0.7978846, %v1148_v52  ;;  %v638_v52 = vmul.f32 0.5, %v4156_v50 }
  0xdc   :  { %v3461_v0 = vpop.eup %3460  ;;  %v1530_v3 = vadd.f32 1.0, %v3459_v56  ;;  %v767_v6 = vmul.f32 0.044715, %v4160_v53  ;;  %v1277_v63 = vmul.f32 0.7978846, %v1149_v55  ;;  %v637_v55 = vmul.f32 0.5, %v4146_v36 }
  0xdd   :  { %v1531_v7 = vadd.f32 1.0, %v3461_v0  ;;  %v894_v8 = vmul.f32 %v766_v62, %v4156_v50  ;;  %3462 = vtanh.f32 %v1276_v9  ;;  %v115_v56 = vld [vmem:[%s5753_s0 + $0xd8] sm:$0xff]  ;;  %v639_v13 = vmul.f32 0.5, %v4160_v53 }
  0xde   :  { %v1658_v12 = vmul.f32 %v1530_v3, %v634_v1  ;;  %v895_v14 = vmul.f32 %v767_v6, %v4160_v53  ;;  %3464 = vtanh.f32 %v1277_v63  ;;  %v165_v36 = vpack.c.bf16 %v115_v56, %v114_v47 }
  0xdf   :  { %v1659_v16 = vmul.f32 %v1531_v7, %v635_v44  ;;  %v1022_v17 = vmul.f32 %v894_v8, %v4156_v50 }
  0xe0   :  { %v315_v58 = vpop.f32.mrf.mxu0  ;;  %v1844_v18 = vpack.c.bf16 %v1658_v12, %v1656_v11  ;;  %v1023_v19 = vmul.f32 %v895_v14, %v4160_v53 }
  0xe1   :  { %v4180_v2 = vadd.f32 %v315_v58, %v4054_v26  ;;  %v484_v20 = vpop.f32.mrf.mxu1  ;;  %v1845_v21 = vpack.c.bf16 %v1659_v16, %v1657_v15  ;;  %v1150_v22 = vadd.f32 %v1022_v17, %v4156_v50 }
  0xe2   :  { %v4184_v23 = vadd.f32 %v484_v20, %v4059_v28  ;;  %2050 = vmatmul.bf16.gmra.mxu2 %v1844_v18  ;;  %v1151_v10 = vadd.f32 %v1023_v19, %v4160_v53 }
  0xe3   :  { %v768_v24 = vmul.f32 0.044715, %v4180_v2  ;;  %2219 = vmatmul.bf16.gmra.mxu3 %v1845_v21  ;;  %354 = vmatmul.bf16.gmra.mxu0 %v164_v48  ;;  %v1278_v25 = vmul.f32 0.7978846, %v1150_v22  ;;  %v3463_v31 = vpop.eup %3462 }
  0xe4   :  { %v769_v61 = vmul.f32 0.044715, %v4184_v23  ;;  %523 = vmatmul.bf16.gmra.mxu1 %v164_v48  ;;  %v1279_v27 = vmul.f32 0.7978846, %v1151_v10  ;;  %v3465_v34 = vpop.eup %3464  ;;  %v1532_v41 = vadd.f32 1.0, %v3463_v31 }
  0xe5   :  { %3466 = vtanh.f32 %v1278_v25  ;;  %v896_v29 = vmul.f32 %v768_v24, %v4180_v2  ;;  %v1533_v46 = vadd.f32 1.0, %v3465_v34 }
  0xe6   :  { %3468 = vtanh.f32 %v1279_v27  ;;  %v897_v30 = vmul.f32 %v769_v61, %v4184_v23  ;;  %v1660_v0 = vmul.f32 %v1532_v41, %v636_v45 }
  0xe7   :  { %v1024_v32 = vmul.f32 %v896_v29, %v4180_v2  ;;  %v1661_v4 = vmul.f32 %v1533_v46, %v637_v55 }
  0xe8   :  { %v317_v35 = vpop.f32.mrf.mxu0  ;;  %v1025_v37 = vmul.f32 %v897_v30, %v4184_v23 }
  0xe9   :  { %v4194_v38 = vadd.f32 %v317_v35, %v4054_v26  ;;  %v486_v39 = vpop.f32.mrf.mxu1  ;;  %v1152_v40 = vadd.f32 %v1024_v32, %v4180_v2  ;;  %v640_v32 = vmul.f32 0.5, %v4180_v2  ;;  %v116_v35 = vld [vmem:[%s5753_s0 + $0xe0] sm:$0xff] }
  0xea   :  { %v4198_v33 = vadd.f32 %v486_v39, %v4059_v28  ;;  %v1153_v42 = vadd.f32 %v1025_v37, %v4184_v23 }
  0xeb   :  { %v3467_v43 = vpop.eup %3466  ;;  %v770_v49 = vmul.f32 0.044715, %v4194_v38  ;;  %v1280_v62 = vmul.f32 0.7978846, %v1152_v40  ;;  %v642_v40 = vmul.f32 0.5, %v4194_v38 }
  0xec   :  { %v3469_v51 = vpop.eup %3468  ;;  %v1534_v54 = vadd.f32 1.0, %v3467_v43  ;;  %v771_v57 = vmul.f32 0.044715, %v4198_v33  ;;  %v1281_v50 = vmul.f32 0.7978846, %v1153_v42  ;;  %v641_v42 = vmul.f32 0.5, %v4184_v23 }
  0xed   :  { %v1535_v59 = vadd.f32 1.0, %v3469_v51  ;;  %v898_v60 = vmul.f32 %v770_v49, %v4194_v38  ;;  %3470 = vtanh.f32 %v1280_v62  ;;  %v117_v43 = vld [vmem:[%s5753_s0 + $0xe8] sm:$0xff]  ;;  %v643_v2 = vmul.f32 0.5, %v4198_v33 }
  0xee   :  { %v1662_v1 = vmul.f32 %v1534_v54, %v638_v52  ;;  %v899_v3 = vmul.f32 %v771_v57, %v4198_v33  ;;  %3472 = vtanh.f32 %v1281_v50  ;;  %v166_v23 = vpack.c.bf16 %v117_v43, %v116_v35 }
  0xef   :  { %v1663_v5 = vmul.f32 %v1535_v59, %v639_v13  ;;  %v1026_v6 = vmul.f32 %v898_v60, %v4194_v38 }
  0xf0   :  { %v320_v44 = vpop.f32.mrf.mxu0  ;;  %v1846_v7 = vpack.c.bf16 %v1662_v1, %v1660_v0  ;;  %v1027_v8 = vmul.f32 %v899_v3, %v4198_v33 }
  0xf1   :  { %v4218_v53 = vadd.f32 %v320_v44, %v4054_v26  ;;  %v489_v9 = vpop.f32.mrf.mxu1  ;;  %v1847_v11 = vpack.c.bf16 %v1663_v5, %v1661_v4  ;;  %v1154_v12 = vadd.f32 %v1026_v6, %v4194_v38 }
  0xf2   :  { %v4222_v14 = vadd.f32 %v489_v9, %v4059_v28  ;;  %2055 = vmatmul.bf16.gmra.mxu2 %v1846_v7  ;;  %v1155_v63 = vadd.f32 %v1027_v8, %v4198_v33 }
  0xf3   :  { %v772_v15 = vmul.f32 0.044715, %v4218_v53  ;;  %2224 = vmatmul.bf16.gmra.mxu3 %v1847_v11  ;;  %359 = vmatmul.bf16.gmra.mxu0 %v165_v36  ;;  %v1282_v16 = vmul.f32 0.7978846, %v1154_v12  ;;  %v3471_v19 = vpop.eup %3470 }
  0xf4   :  { %v773_v48 = vmul.f32 0.044715, %v4222_v14  ;;  %528 = vmatmul.bf16.gmra.mxu1 %v165_v36  ;;  %v1283_v17 = vmul.f32 0.7978846, %v1155_v63  ;;  %v3473_v21 = vpop.eup %3472  ;;  %v1536_v29 = vadd.f32 1.0, %v3471_v19 }
  0xf5   :  { %3474 = vtanh.f32 %v1282_v16  ;;  %v900_v58 = vmul.f32 %v772_v15, %v4218_v53  ;;  %v1537_v34 = vadd.f32 1.0, %v3473_v21 }
  0xf6   :  { %3476 = vtanh.f32 %v1283_v17  ;;  %v901_v18 = vmul.f32 %v773_v48, %v4222_v14  ;;  %v1664_v51 = vmul.f32 %v1536_v29, %v640_v32 }
  0xf7   :  { %v1028_v20 = vmul.f32 %v900_v58, %v4218_v53  ;;  %v1665_v55 = vmul.f32 %v1537_v34, %v641_v42 }
  0xf8   :  { %v322_v22 = vpop.f32.mrf.mxu0  ;;  %v1029_v10 = vmul.f32 %v901_v18, %v4222_v14 }
  0xf9   :  { %v4232_v24 = vadd.f32 %v322_v22, %v4054_v26  ;;  %v491_v25 = vpop.f32.mrf.mxu1  ;;  %v1156_v61 = vadd.f32 %v1028_v20, %v4218_v53  ;;  %v644_v20 = vmul.f32 0.5, %v4218_v53  ;;  %v118_v22 = vld [vmem:[%s5753_s0 + $0xf0] sm:$0xff] }
  0xfa   :  { %v4236_v27 = vadd.f32 %v491_v25, %v4059_v28  ;;  %v1157_v30 = vadd.f32 %v1029_v10, %v4222_v14 }
  0xfb   :  { %v3475_v31 = vpop.eup %3474  ;;  %v774_v37 = vmul.f32 0.044715, %v4232_v24  ;;  %v1284_v49 = vmul.f32 0.7978846, %v1156_v61  ;;  %v646_v61 = vmul.f32 0.5, %v4232_v24 }
  0xfc   :  { %v3477_v39 = vpop.eup %3476  ;;  %v1538_v41 = vadd.f32 1.0, %v3475_v31  ;;  %v775_v45 = vmul.f32 0.044715, %v4236_v27  ;;  %v1285_v38 = vmul.f32 0.7978846, %v1157_v30  ;;  %v645_v30 = vmul.f32 0.5, %v4222_v14 }
  0xfd   :  { %v1539_v46 = vadd.f32 1.0, %v3477_v39  ;;  %v902_v47 = vmul.f32 %v774_v37, %v4232_v24  ;;  %3478 = vtanh.f32 %v1284_v49  ;;  %v119_v31 = vld [vmem:[%s5753_s0 + $0xf8] sm:$0xff]  ;;  %v647_v53 = vmul.f32 0.5, %v4236_v27 }
  0xfe   :  { %v1666_v52 = vmul.f32 %v1538_v41, %v642_v40  ;;  %v903_v54 = vmul.f32 %v775_v45, %v4236_v27  ;;  %3480 = vtanh.f32 %v1285_v38  ;;  %v167_v14 = vpack.c.bf16 %v119_v31, %v118_v22 }
  0xff   :  { %v1667_v56 = vmul.f32 %v1539_v46, %v643_v2  ;;  %v1030_v57 = vmul.f32 %v902_v47, %v4232_v24 }
 0x100   :  { %v325_v13 = vpop.f32.mrf.mxu0  ;;  %v1848_v59 = vpack.c.bf16 %v1666_v52, %v1664_v51  ;;  %v1031_v60 = vmul.f32 %v903_v54, %v4236_v27 }
 0x101   :  { %v4256_v33 = vadd.f32 %v325_v13, %v4054_v26  ;;  %v494_v62 = vpop.f32.mrf.mxu1  ;;  %v1849_v0 = vpack.c.bf16 %v1667_v56, %v1665_v55  ;;  %v1158_v1 = vadd.f32 %v1030_v57, %v4232_v24 }
 0x102   :  { %v4260_v3 = vadd.f32 %v494_v62, %v4059_v28  ;;  %2060 = vmatmul.bf16.gmra.mxu2 %v1848_v59  ;;  %v1159_v50 = vadd.f32 %v1031_v60, %v4236_v27 }
 0x103   :  { %v776_v4 = vmul.f32 0.044715, %v4256_v33  ;;  %2229 = vmatmul.bf16.gmra.mxu3 %v1849_v0  ;;  %364 = vmatmul.bf16.gmra.mxu0 %v166_v23  ;;  %v1286_v5 = vmul.f32 0.7978846, %v1158_v1  ;;  %v3479_v8 = vpop.eup %3478 }
 0x104   :  { %v777_v36 = vmul.f32 0.044715, %v4260_v3  ;;  %533 = vmatmul.bf16.gmra.mxu1 %v166_v23  ;;  %v1287_v6 = vmul.f32 0.7978846, %v1159_v50  ;;  %v3481_v11 = vpop.eup %3480  ;;  %v1540_v58 = vadd.f32 1.0, %v3479_v8 }
 0x105   :  { %3482 = vtanh.f32 %v1286_v5  ;;  %v904_v44 = vmul.f32 %v776_v4, %v4256_v33  ;;  %v1541_v21 = vadd.f32 1.0, %v3481_v11 }
 0x106   :  { %3484 = vtanh.f32 %v1287_v6  ;;  %v905_v7 = vmul.f32 %v777_v36, %v4260_v3  ;;  %v1668_v39 = vmul.f32 %v1540_v58, %v644_v20 }
 0x107   :  { %v1032_v9 = vmul.f32 %v904_v44, %v4256_v33  ;;  %v1669_v42 = vmul.f32 %v1541_v21, %v645_v30 }
 0x108   :  { %v327_v12 = vpop.f32.mrf.mxu0  ;;  %v1033_v63 = vmul.f32 %v905_v7, %v4260_v3 }
 0x109   :  { %v4270_v15 = vadd.f32 %v327_v12, %v4054_v26  ;;  %v496_v16 = vpop.f32.mrf.mxu1  ;;  %v1160_v48 = vadd.f32 %v1032_v9, %v4256_v33  ;;  %v648_v9 = vmul.f32 0.5, %v4256_v33  ;;  %v120_v12 = vld [vmem:[%s5753_s0 + $0x100] sm:$0xff] }
 0x10a   :  { %v4274_v17 = vadd.f32 %v496_v16, %v4059_v28  ;;  %v1161_v18 = vadd.f32 %v1033_v63, %v4260_v3 }
 0x10b   :  { %v3483_v19 = vpop.eup %3482  ;;  %v778_v10 = vmul.f32 0.044715, %v4270_v15  ;;  %v1288_v37 = vmul.f32 0.7978846, %v1160_v48  ;;  %v650_v48 = vmul.f32 0.5, %v4270_v15 }
 0x10c   :  { %v3485_v25 = vpop.eup %3484  ;;  %v1542_v29 = vadd.f32 1.0, %v3483_v19  ;;  %v779_v32 = vmul.f32 0.044715, %v4274_v17  ;;  %v1289_v24 = vmul.f32 0.7978846, %v1161_v18  ;;  %v649_v18 = vmul.f32 0.5, %v4260_v3 }
 0x10d   :  { %v1543_v34 = vadd.f32 1.0, %v3485_v25  ;;  %v906_v35 = vmul.f32 %v778_v10, %v4270_v15  ;;  %3486 = vtanh.f32 %v1288_v37  ;;  %v121_v19 = vld [vmem:[%s5753_s0 + $0x108] sm:$0xff]  ;;  %v651_v33 = vmul.f32 0.5, %v4274_v17 }
 0x10e   :  { %v1670_v40 = vmul.f32 %v1542_v29, %v646_v61  ;;  %v907_v41 = vmul.f32 %v779_v32, %v4274_v17  ;;  %3488 = vtanh.f32 %v1289_v24  ;;  %v168_v3 = vpack.c.bf16 %v121_v19, %v120_v12 }
 0x10f   :  { %v1671_v43 = vmul.f32 %v1543_v34, %v647_v53  ;;  %v1034_v45 = vmul.f32 %v906_v35, %v4270_v15 }
 0x110   :  { %v330_v2 = vpop.f32.mrf.mxu0  ;;  %v1850_v46 = vpack.c.bf16 %v1670_v40, %v1668_v39  ;;  %v1035_v47 = vmul.f32 %v907_v41, %v4274_v17 }
 0x111   :  { %v4294_v27 = vadd.f32 %v330_v2, %v4054_v26  ;;  %v499_v49 = vpop.f32.mrf.mxu1  ;;  %v1851_v51 = vpack.c.bf16 %v1671_v43, %v1669_v42  ;;  %v1162_v52 = vadd.f32 %v1034_v45, %v4270_v15 }
 0x112   :  { %v4298_v54 = vadd.f32 %v499_v49, %v4059_v28  ;;  %2065 = vmatmul.bf16.gmra.mxu2 %v1850_v46  ;;  %v1163_v38 = vadd.f32 %v1035_v47, %v4274_v17 }
 0x113   :  { %v780_v55 = vmul.f32 0.044715, %v4294_v27  ;;  %2234 = vmatmul.bf16.gmra.mxu3 %v1851_v51  ;;  %369 = vmatmul.bf16.gmra.mxu0 %v167_v14  ;;  %v1290_v56 = vmul.f32 0.7978846, %v1162_v52  ;;  %v3487_v60 = vpop.eup %3486 }
 0x114   :  { %v781_v23 = vmul.f32 0.044715, %v4298_v54  ;;  %538 = vmatmul.bf16.gmra.mxu1 %v167_v14  ;;  %v1291_v57 = vmul.f32 0.7978846, %v1163_v38  ;;  %v3489_v0 = vpop.eup %3488  ;;  %v1544_v44 = vadd.f32 1.0, %v3487_v60 }
 0x115   :  { %3490 = vtanh.f32 %v1290_v56  ;;  %v908_v13 = vmul.f32 %v780_v55, %v4294_v27  ;;  %v1545_v11 = vadd.f32 1.0, %v3489_v0 }
 0x116   :  { %3492 = vtanh.f32 %v1291_v57  ;;  %v909_v59 = vmul.f32 %v781_v23, %v4298_v54  ;;  %v1672_v25 = vmul.f32 %v1544_v44, %v648_v9 }
 0x117   :  { %v1036_v62 = vmul.f32 %v908_v13, %v4294_v27  ;;  %v1673_v30 = vmul.f32 %v1545_v11, %v649_v18 }
 0x118   :  { %v332_v1 = vpop.f32.mrf.mxu0  ;;  %v1037_v50 = vmul.f32 %v909_v59, %v4298_v54 }
 0x119   :  { %v4308_v4 = vadd.f32 %v332_v1, %v4054_v26  ;;  %v501_v5 = vpop.f32.mrf.mxu1  ;;  %v1164_v36 = vadd.f32 %v1036_v62, %v4294_v27  ;;  %v652_v62 = vmul.f32 0.5, %v4294_v27  ;;  %v122_v1 = vld [vmem:[%s5753_s0 + $0x110] sm:$0xff] }
 0x11a   :  { %v4312_v6 = vadd.f32 %v501_v5, %v4059_v28  ;;  %v1165_v7 = vadd.f32 %v1037_v50, %v4298_v54 }
 0x11b   :  { %v3491_v8 = vpop.eup %3490  ;;  %v782_v63 = vmul.f32 0.044715, %v4308_v4  ;;  %v1292_v10 = vmul.f32 0.7978846, %v1164_v36  ;;  %v654_v36 = vmul.f32 0.5, %v4308_v4 }
 0x11c   :  { %v3493_v16 = vpop.eup %3492  ;;  %v1546_v58 = vadd.f32 1.0, %v3491_v8  ;;  %v783_v20 = vmul.f32 0.044715, %v4312_v6  ;;  %v1293_v15 = vmul.f32 0.7978846, %v1165_v7  ;;  %v653_v7 = vmul.f32 0.5, %v4298_v54 }
 0x11d   :  { %v1547_v21 = vadd.f32 1.0, %v3493_v16  ;;  %v910_v22 = vmul.f32 %v782_v63, %v4308_v4  ;;  %3494 = vtanh.f32 %v1292_v10  ;;  %v123_v8 = vld [vmem:[%s5753_s0 + $0x118] sm:$0xff]  ;;  %v655_v27 = vmul.f32 0.5, %v4312_v6 }
 0x11e   :  { %v1674_v61 = vmul.f32 %v1546_v58, %v650_v48  ;;  %v911_v29 = vmul.f32 %v783_v20, %v4312_v6  ;;  %3496 = vtanh.f32 %v1293_v15  ;;  %v169_v54 = vpack.c.bf16 %v123_v8, %v122_v1 }
 0x11f   :  { %v1675_v31 = vmul.f32 %v1547_v21, %v651_v33  ;;  %v1038_v32 = vmul.f32 %v910_v22, %v4308_v4 }
 0x120   :  { %v335_v53 = vpop.f32.mrf.mxu0  ;;  %v1852_v34 = vpack.c.bf16 %v1674_v61, %v1672_v25  ;;  %v1039_v35 = vmul.f32 %v911_v29, %v4312_v6 }
 0x121   :  { %v4332_v17 = vadd.f32 %v335_v53, %v4054_v26  ;;  %v504_v37 = vpop.f32.mrf.mxu1  ;;  %v1853_v39 = vpack.c.bf16 %v1675_v31, %v1673_v30  ;;  %v1166_v40 = vadd.f32 %v1038_v32, %v4308_v4 }
 0x122   :  { %v4336_v41 = vadd.f32 %v504_v37, %v4059_v28  ;;  %2070 = vmatmul.bf16.gmra.mxu2 %v1852_v34  ;;  %v1167_v24 = vadd.f32 %v1039_v35, %v4312_v6 }
 0x123   :  { %v784_v42 = vmul.f32 0.044715, %v4332_v17  ;;  %2239 = vmatmul.bf16.gmra.mxu3 %v1853_v39  ;;  %374 = vmatmul.bf16.gmra.mxu0 %v168_v3  ;;  %v1294_v43 = vmul.f32 0.7978846, %v1166_v40  ;;  %v3495_v47 = vpop.eup %3494 }
 0x124   :  { %v785_v14 = vmul.f32 0.044715, %v4336_v41  ;;  %543 = vmatmul.bf16.gmra.mxu1 %v168_v3  ;;  %v1295_v45 = vmul.f32 0.7978846, %v1167_v24  ;;  %v3497_v51 = vpop.eup %3496  ;;  %v1548_v13 = vadd.f32 1.0, %v3495_v47  ;;  %v125_v47 = vld [vmem:[%s5753_s0 + $0x128] sm:$0xff] }
 0x125   :  { %3498 = vtanh.f32 %v1294_v43  ;;  %v912_v2 = vmul.f32 %v784_v42, %v4332_v17  ;;  %v1549_v0 = vadd.f32 1.0, %v3497_v51  ;;  %v657_v1 = vmul.f32 0.5, %v4336_v41 }
 0x126   :  { %3500 = vtanh.f32 %v1295_v45  ;;  %v913_v46 = vmul.f32 %v785_v14, %v4336_v41  ;;  %v1676_v16 = vmul.f32 %v1548_v13, %v652_v62 }
 0x127   :  { %v1040_v49 = vmul.f32 %v912_v2, %v4332_v17  ;;  %v1677_v18 = vmul.f32 %v1549_v0, %v653_v7 }
 0x128   :  { %v337_v52 = vpop.f32.mrf.mxu0  ;;  %v1041_v38 = vmul.f32 %v913_v46, %v4336_v41  ;;  %v124_v46 = vld [vmem:[%s5753_s0 + $0x120] sm:$0xff] }
 0x129   :  { %v4346_v55 = vadd.f32 %v337_v52, %v4054_v26  ;;  %v506_v56 = vpop.f32.mrf.mxu1  ;;  %v1168_v23 = vadd.f32 %v1040_v49, %v4332_v17  ;;  %v656_v52 = vmul.f32 0.5, %v4332_v17  ;;  %v170_v7 = vpack.c.bf16 %v125_v47, %v124_v46 }
 0x12a   :  { %v4350_v57 = vadd.f32 %v506_v56, %v4059_v28  ;;  %v1169_v59 = vadd.f32 %v1041_v38, %v4336_v41 }
 0x12b   :  { %v3499_v60 = vpop.eup %3498  ;;  %v786_v50 = vmul.f32 0.044715, %v4346_v55  ;;  %v1296_v63 = vmul.f32 0.7978846, %v1168_v23 }
 0x12c   :  { %v3501_v5 = vpop.eup %3500  ;;  %v1550_v44 = vadd.f32 1.0, %v3499_v60  ;;  %v787_v9 = vmul.f32 0.044715, %v4350_v57  ;;  %v1297_v4 = vmul.f32 0.7978846, %v1169_v59  ;;  %v658_v59 = vmul.f32 0.5, %v4346_v55 }
 0x12d   :  { %v1551_v11 = vadd.f32 1.0, %v3501_v5  ;;  %v914_v12 = vmul.f32 %v786_v50, %v4346_v55  ;;  %3502 = vtanh.f32 %v1296_v63  ;;  %v659_v50 = vmul.f32 0.5, %v4350_v57 }
 0x12e   :  { %v1678_v48 = vmul.f32 %v1550_v44, %v654_v36  ;;  %v915_v58 = vmul.f32 %v787_v9, %v4350_v57  ;;  %3504 = vtanh.f32 %v1297_v4 }
 0x12f   :  { %v1679_v19 = vmul.f32 %v1551_v11, %v655_v27  ;;  %v1042_v20 = vmul.f32 %v914_v12, %v4346_v55 }
 0x130   :  { %v340_v33 = vpop.f32.mrf.mxu0  ;;  %v1854_v21 = vpack.c.bf16 %v1678_v48, %v1676_v16  ;;  %v1043_v22 = vmul.f32 %v915_v58, %v4350_v57 }
 0x131   :  { %v4370_v6 = vadd.f32 %v340_v33, %v4054_v26  ;;  %v509_v10 = vpop.f32.mrf.mxu1  ;;  %v1855_v25 = vpack.c.bf16 %v1679_v19, %v1677_v18  ;;  %v1170_v61 = vadd.f32 %v1042_v20, %v4346_v55 }
 0x132   :  { %v4374_v29 = vadd.f32 %v509_v10, %v4059_v28  ;;  %2075 = vmatmul.bf16.gmra.mxu2 %v1854_v21  ;;  %v1171_v15 = vadd.f32 %v1043_v22, %v4350_v57  ;;  %v4420_v22 = vld [vmem:[%s5756_s4] ss:$0 sm:$0xff]  ;;  %v126_v10 = vld [vmem:[%s5753_s0 + $0x130] sm:$0xff] }
 0x133   :  { %v788_v30 = vmul.f32 0.044715, %v4370_v6  ;;  %2244 = vmatmul.bf16.gmra.mxu3 %v1855_v25  ;;  %379 = vmatmul.bf16.gmra.mxu0 %v169_v54  ;;  %v1298_v31 = vmul.f32 0.7978846, %v1170_v61  ;;  %v3503_v35 = vpop.eup %3502  ;;  %v127_v25 = vld [vmem:[%s5753_s0 + $0x138] sm:$0xff]  ;;  %v660_v46 = vmul.f32 0.5, %v4370_v6 }
 0x134   :  { %v789_v3 = vmul.f32 0.044715, %v4374_v29  ;;  %548 = vmatmul.bf16.gmra.mxu1 %v169_v54  ;;  %v1299_v32 = vmul.f32 0.7978846, %v1171_v15  ;;  %v3505_v39 = vpop.eup %3504  ;;  %v1552_v2 = vadd.f32 1.0, %v3503_v35  ;;  %v171_v35 = vpack.c.bf16 %v127_v25, %v126_v10 }
 0x135   :  { %3506 = vtanh.f32 %v1298_v31  ;;  %v916_v53 = vmul.f32 %v788_v30, %v4370_v6  ;;  %v1553_v38 = vadd.f32 1.0, %v3505_v39  ;;  %v661_v47 = vmul.f32 0.5, %v4374_v29 }
 0x136   :  { %3508 = vtanh.f32 %v1299_v32  ;;  %v917_v34 = vmul.f32 %v789_v3, %v4374_v29  ;;  %v1680_v44 = vmul.f32 %v1552_v2, %v656_v52 }
 0x137   :  { %v1044_v37 = vmul.f32 %v916_v53, %v4370_v6  ;;  %v1681_v9 = vmul.f32 %v1553_v38, %v657_v1 }
 0x138   :  { %v342_v40 = vpop.f32.mrf.mxu0  ;;  %v1045_v24 = vmul.f32 %v917_v34, %v4374_v29 }
 0x139   :  { %v4384_v42 = vadd.f32 %v342_v40, %v4054_v26  ;;  %v511_v43 = vpop.f32.mrf.mxu1  ;;  %v1172_v14 = vadd.f32 %v1044_v37, %v4370_v6 }
 0x13a   :  { %v4388_v45 = vadd.f32 %v511_v43, %v4059_v28  ;;  %v1173_v49 = vadd.f32 %v1045_v24, %v4374_v29 }
 0x13b   :  { %v3507_v51 = vpop.eup %3506  ;;  %v790_v56 = vmul.f32 0.044715, %v4384_v42  ;;  %v1300_v23 = vmul.f32 0.7978846, %v1172_v14  ;;  %v662_v38 = vmul.f32 0.5, %v4384_v42 }
 0x13c   :  { %v3509_v13 = vpop.eup %3508  ;;  %v1554_v60 = vadd.f32 1.0, %v3507_v51  ;;  %v791_v62 = vmul.f32 0.044715, %v4388_v45  ;;  %v1301_v0 = vmul.f32 0.7978846, %v1173_v49 }
 0x13d   :  { %v1555_v5 = vadd.f32 1.0, %v3509_v13  ;;  %v918_v36 = vmul.f32 %v790_v56, %v4384_v42  ;;  %3510 = vtanh.f32 %v1300_v23  ;;  %v663_v56 = vmul.f32 0.5, %v4388_v45 }
 0x13e   :  { %v1682_v17 = vmul.f32 %v1554_v60, %v658_v59  ;;  %v919_v8 = vmul.f32 %v791_v62, %v4388_v45  ;;  %3512 = vtanh.f32 %v1301_v0 }
 0x13f   :  { %v1683_v27 = vmul.f32 %v1555_v5, %v659_v50  ;;  %v1046_v55 = vmul.f32 %v918_v36, %v4384_v42 }
 0x140   :  { %v345_v11 = vpop.f32.mrf.mxu0  ;;  %v1856_v12 = vpack.c.bf16 %v1682_v17, %v1680_v44  ;;  %v1047_v63 = vmul.f32 %v919_v8, %v4388_v45 }
 0x141   :  { %v4408_v41 = vadd.f32 %v345_v11, %v4054_v26  ;;  %v514_v57 = vpop.f32.mrf.mxu1  ;;  %v1857_v16 = vpack.c.bf16 %v1683_v27, %v1681_v9  ;;  %v1174_v48 = vadd.f32 %v1046_v55, %v4384_v42 }
 0x142   :  { %v4412_v58 = vadd.f32 %v514_v57, %v4059_v28  ;;  %2080 = vmatmul.bf16.gmra.mxu2 %v1856_v12  ;;  %v1175_v4 = vadd.f32 %v1047_v63, %v4388_v45 }
 0x143   :  { %v792_v18 = vmul.f32 0.044715, %v4408_v41  ;;  %2249 = vmatmul.bf16.gmra.mxu3 %v1857_v16  ;;  %384 = vmatmul.bf16.gmra.mxu0 %v170_v7  ;;  %v1302_v19 = vmul.f32 0.7978846, %v1174_v48  ;;  %v3511_v33 = vpop.eup %3510  ;;  %v664_v11 = vmul.f32 0.5, %v4408_v41 }
 0x144   :  { %v793_v54 = vmul.f32 0.044715, %v4412_v58  ;;  %553 = vmatmul.bf16.gmra.mxu1 %v170_v7  ;;  %v1303_v20 = vmul.f32 0.7978846, %v1175_v4  ;;  %v3513_v15 = vpop.eup %3512  ;;  %v1556_v34 = vadd.f32 1.0, %v3511_v33  ;;  %v128_v33 = vld [vmem:[%s5753_s0 + $0x140] sm:$0xff] }
 0x145   :  { %v2041_v21 = vpop.f32.mrf.mxu2  ;;  %3514 = vtanh.f32 %v1302_v19  ;;  %v920_v61 = vmul.f32 %v792_v18, %v4408_v41  ;;  %v1557_v43 = vadd.f32 1.0, %v3513_v15 }
 0x146   :  { %v2210_v30 = vpop.f32.mrf.mxu3  ;;  %3516 = vtanh.f32 %v1303_v20  ;;  %v921_v31 = vmul.f32 %v793_v54, %v4412_v58  ;;  %v1684_v60 = vmul.f32 %v1556_v34, %v660_v46 }
 0x147   :  { %v2211_v3 = vadd.f32 %v2210_v30, %v2041_v21  ;;  %v1048_v32 = vmul.f32 %v920_v61, %v4408_v41  ;;  %v1685_v50 = vmul.f32 %v1557_v43, %v661_v47  ;;  %v129_v21 = vld [vmem:[%s5753_s0 + $0x148] sm:$0xff] }
 0x148   :  { %v347_v53 = vpop.f32.mrf.mxu0  ;;  %v1049_v37 = vmul.f32 %v921_v31, %v4412_v58  ;;  %v4473_v34 = vpack.c.bf16 %v129_v21, %v128_v33 }
 0x149   :  { %v4433_v39 = vadd.f32 %v4420_v22, %v2211_v3  ;;  %v4436_v40 = vadd.f32 %v347_v53, %v4054_v26  ;;  %v516_v24 = vpop.f32.mrf.mxu1  ;;  %v1176_v14 = vadd.f32 %v1048_v32, %v4408_v41  ;;  %v665_v3 = vmul.f32 0.5, %v4412_v58 }
 0x14a   :  { %v4440_v2 = vadd.f32 %v516_v24, %v4059_v28  ;;  %v1177_v49 = vadd.f32 %v1049_v37, %v4412_v58 }
 0x14b   :  { %v3515_v51 = vpop.eup %3514  ;;  %v2697_v52 = vmul.f32 0.044715, %v4433_v39  ;;  %v794_v23 = vmul.f32 0.044715, %v4436_v40  ;;  %v1304_v62 = vmul.f32 0.7978846, %v1176_v14 }
 0x14c   :  { %v3517_v13 = vpop.eup %3516  ;;  %v1558_v59 = vadd.f32 1.0, %v3515_v51  ;;  %v795_v0 = vmul.f32 0.044715, %v4440_v2  ;;  %v1305_v45 = vmul.f32 0.7978846, %v1177_v49  ;;  %v666_v51 = vmul.f32 0.5, %v4436_v40 }
 0x14d   :  { %v2761_v6 = vmul.f32 %v2697_v52, %v4433_v39  ;;  %v2043_v29 = vpop.f32.mrf.mxu2  ;;  %v1559_v1 = vadd.f32 1.0, %v3517_v13  ;;  %v922_v5 = vmul.f32 %v794_v23, %v4436_v40  ;;  %3518 = vtanh.f32 %v1304_v62 }
 0x14e   :  { %v2212_v36 = vpop.f32.mrf.mxu3  ;;  %v1686_v44 = vmul.f32 %v1558_v59, %v662_v38  ;;  %v923_v42 = vmul.f32 %v795_v0, %v4440_v2  ;;  %3520 = vtanh.f32 %v1305_v45  ;;  %v667_v59 = vmul.f32 0.5, %v4440_v2 }
 0x14f   :  { %v2825_v17 = vmul.f32 %v2761_v6, %v4433_v39  ;;  %v2213_v7 = vadd.f32 %v2212_v36, %v2043_v29  ;;  %v1687_v8 = vmul.f32 %v1559_v1, %v663_v56  ;;  %v1050_v9 = vmul.f32 %v922_v5, %v4436_v40 }
 0x150   :  { %v350_v27 = vpop.f32.mrf.mxu0  ;;  %v1858_v55 = vpack.c.bf16 %v1686_v44, %v1684_v60  ;;  %v1051_v12 = vmul.f32 %v923_v42, %v4440_v2 }
 0x151   :  { %v2889_v63 = vadd.f32 %v2825_v17, %v4433_v39  ;;  %v2570_v57 = vadd.f32 %v4420_v22, %v2213_v7  ;;  %v351_v16 = vadd.f32 %v350_v27, %v4054_v26  ;;  %v519_v48 = vpop.f32.mrf.mxu1  ;;  %v1859_v4 = vpack.c.bf16 %v1687_v8, %v1685_v50 }
 0x152   :  { %v4461_v18 = vadd.f32 %v519_v48, %v4059_v28  ;;  %2085 = vmatmul.bf16.gmra.mxu2 %v1858_v55  ;;  %v1178_v19 = vadd.f32 %v1050_v9, %v4436_v40  ;;  %v1179_v54 = vadd.f32 %v1051_v12, %v4440_v2 }
 0x153   :  { %v2953_v41 = vmul.f32 0.7978846, %v2889_v63  ;;  %v2698_v20 = vmul.f32 0.044715, %v2570_v57  ;;  %2254 = vmatmul.bf16.gmra.mxu3 %v1859_v4  ;;  %389 = vmatmul.bf16.gmra.mxu0 %v171_v35  ;;  %v3519_v10 = vpop.eup %3518  ;;  %v796_v25 = vmul.f32 0.044715, %v351_v16 }
 0x154   :  { %v797_v61 = vmul.f32 0.044715, %v4461_v18  ;;  %558 = vmatmul.bf16.gmra.mxu1 %v171_v35  ;;  %v1306_v15 = vmul.f32 0.7978846, %v1178_v19  ;;  %v1307_v32 = vmul.f32 0.7978846, %v1179_v54  ;;  %v3521_v47 = vpop.eup %3520 }
 0x155   :  { %3522 = vtanh.f32 %v2953_v41  ;;  %v2762_v30 = vmul.f32 %v2698_v20, %v2570_v57  ;;  %v2046_v31 = vpop.f32.mrf.mxu2  ;;  %v924_v37 = vmul.f32 %v796_v25, %v351_v16  ;;  %v1560_v46 = vadd.f32 1.0, %v3519_v10 }
 0x156   :  { %v2215_v53 = vpop.f32.mrf.mxu3  ;;  %3524 = vtanh.f32 %v1306_v15  ;;  %v925_v24 = vmul.f32 %v797_v61, %v4461_v18  ;;  %v2633_v35 = vmul.f32 0.5, %v4433_v39  ;;  %v4486_v60 = vmul.f32 0.5, %v2570_v57 }
 0x157   :  { %v2826_v43 = vmul.f32 %v2762_v30, %v2570_v57  ;;  %v2216_v14 = vadd.f32 %v2215_v53, %v2046_v31  ;;  %3526 = vtanh.f32 %v1307_v32  ;;  %v1052_v52 = vmul.f32 %v924_v37, %v351_v16 }
 0x158   :  { %v352_v49 = vpop.f32.mrf.mxu0  ;;  %v1053_v58 = vmul.f32 %v925_v24, %v4461_v18  ;;  %v4491_v62 = vmul.f32 0.5, %v351_v16  ;;  %v1688_v1 = vmul.f32 %v1560_v46, %v664_v11  ;;  %v1561_v50 = vadd.f32 1.0, %v3521_v47  ;;  %v130_v24 = vld [vmem:[%s5753_s0 + $0x150] sm:$0xff] }
 0x159   :  { %v2890_v38 = vadd.f32 %v2826_v43, %v2570_v57  ;;  %v4480_v56 = vadd.f32 %v4420_v22, %v2216_v14  ;;  %v4483_v23 = vadd.f32 %v352_v49, %v4054_v26  ;;  %v521_v13 = vpop.f32.mrf.mxu1  ;;  %v1180_v40 = vadd.f32 %v1052_v52, %v351_v16  ;;  %v131_v43 = vld [vmem:[%s5753_s0 + $0x158] sm:$0xff] }
 0x15a   :  { %v4489_v39 = vadd.f32 %v521_v13, %v4059_v28  ;;  %v1181_v2 = vadd.f32 %v1053_v58, %v4461_v18  ;;  %v1689_v19 = vmul.f32 %v1561_v50, %v665_v3 }
 0x15b   :  { %v3523_v0 = vpop.eup %3522  ;;  %v2954_v6 = vmul.f32 0.7978846, %v2890_v38  ;;  %v2699_v29 = vmul.f32 0.044715, %v4480_v56  ;;  %v798_v44 = vmul.f32 0.044715, %v4483_v23 }
 0x15c   :  { %v3525_v5 = vpop.eup %3524  ;;  %v3081_v36 = vadd.f32 1.0, %v3523_v0  ;;  %v1308_v42 = vmul.f32 0.7978846, %v1180_v40  ;;  %v799_v9 = vmul.f32 0.044715, %v4489_v39  ;;  %v669_v38 = vmul.f32 0.5, %v4461_v18 }
 0x15d   :  { %v3527_v45 = vpop.eup %3526  ;;  %3528 = vtanh.f32 %v2954_v6  ;;  %v2763_v17 = vmul.f32 %v2699_v29, %v4480_v56  ;;  %v2048_v7 = vpop.f32.mrf.mxu2  ;;  %v1562_v8 = vadd.f32 1.0, %v3525_v5  ;;  %v926_v11 = vmul.f32 %v798_v44, %v4483_v23 }
 0x15e   :  { %v3145_v27 = vmul.f32 %v3081_v36, %v2633_v35  ;;  %v2217_v55 = vpop.f32.mrf.mxu3  ;;  %v1563_v12 = vadd.f32 1.0, %v3527_v45  ;;  %3530 = vtanh.f32 %v1308_v42  ;;  %v927_v48 = vmul.f32 %v799_v9, %v4489_v39 }
 0x15f   :  { %v2827_v63 = vmul.f32 %v2763_v17, %v4480_v56  ;;  %v2218_v57 = vadd.f32 %v2217_v55, %v2048_v7  ;;  %v1690_v16 = vmul.f32 %v1562_v8, %v666_v51  ;;  %v1054_v41 = vmul.f32 %v926_v11, %v4483_v23 }
 0x160   :  { %3209 = vst [vmem:[%s5757_s5] sm:$0xff] %v3145_v27  ;;  %v355_v4 = vpop.f32.mrf.mxu0  ;;  %v1691_v54 = vmul.f32 %v1563_v12, %v667_v59  ;;  %v1309_v20 = vmul.f32 0.7978846, %v1181_v2  ;;  %v1055_v3 = vmul.f32 %v927_v48, %v4489_v39  ;;  %v4529_v6 = vpack.c.bf16 %v131_v43, %v130_v24 }
 0x161   :  { %v2891_v33 = vadd.f32 %v2827_v63, %v4480_v56  ;;  %v2572_v21 = vadd.f32 %v4420_v22, %v2218_v57  ;;  %v4508_v10 = vadd.f32 %v355_v4, %v4054_v26  ;;  %v524_v25 = vpop.f32.mrf.mxu1  ;;  %v1860_v61 = vpack.c.bf16 %v1690_v16, %v1688_v1 }
 0x162   :  { %v4511_v15 = vadd.f32 %v524_v25, %v4059_v28  ;;  %v1861_v30 = vpack.c.bf16 %v1691_v54, %v1689_v19  ;;  %v1182_v31 = vadd.f32 %v1054_v41, %v4483_v23  ;;  %3532 = vtanh.f32 %v1309_v20 }
 0x163   :  { %v3529_v32 = vpop.eup %3528  ;;  %v2955_v53 = vmul.f32 0.7978846, %v2891_v33  ;;  %v2700_v37 = vmul.f32 0.044715, %v2572_v21  ;;  %2090 = vmatmul.bf16.gmra.mxu2 %v1860_v61  ;;  %394 = vmatmul.bf16.gmra.mxu0 %v4473_v34  ;;  %v800_v47 = vmul.f32 0.044715, %v4508_v10  ;;  %v1183_v49 = vadd.f32 %v1055_v3, %v4489_v39 }
 0x164   :  { %v3531_v14 = vpop.eup %3530  ;;  %v3082_v46 = vadd.f32 1.0, %v3529_v32  ;;  %v801_v35 = vmul.f32 0.044715, %v4511_v15  ;;  %2259 = vmatmul.bf16.gmra.mxu3 %v1861_v30  ;;  %563 = vmatmul.bf16.gmra.mxu1 %v4473_v34  ;;  %v1310_v58 = vmul.f32 0.7978846, %v1182_v31  ;;  %v2635_v50 = vmul.f32 0.5, %v4480_v56 }
 0x165   :  { %3534 = vtanh.f32 %v2955_v53  ;;  %v2764_v51 = vmul.f32 %v2700_v37, %v2572_v21  ;;  %v2051_v52 = vpop.f32.mrf.mxu2  ;;  %v928_v59 = vmul.f32 %v800_v47, %v4508_v10  ;;  %v1311_v0 = vmul.f32 0.7978846, %v1183_v49 }
 0x166   :  { %v3146_v13 = vmul.f32 %v3082_v46, %v4486_v60  ;;  %v2220_v40 = vpop.f32.mrf.mxu3  ;;  %3536 = vtanh.f32 %v1310_v58  ;;  %v1564_v34 = vadd.f32 1.0, %v3531_v14  ;;  %v929_v18 = vmul.f32 %v801_v35, %v4511_v15 }
 0x167   :  { %v2828_v29 = vmul.f32 %v2764_v51, %v2572_v21  ;;  %v2221_v1 = vadd.f32 %v2220_v40, %v2051_v52  ;;  %3538 = vtanh.f32 %v1311_v0  ;;  %v1056_v60 = vmul.f32 %v928_v59, %v4508_v10 }
 0x168   :  { %3210 = vst [vmem:[%s5757_s5 + $0x8] sm:$0xff] %v3146_v13  ;;  %v357_v5 = vpop.f32.mrf.mxu0  ;;  %v3533_v36 = vpop.eup %3532  ;;  %v670_v17 = vmul.f32 0.5, %v4483_v23  ;;  %v671_v56 = vmul.f32 0.5, %v4489_v39  ;;  %v2636_v55 = vmul.f32 0.5, %v2572_v21  ;;  %v1692_v63 = vmul.f32 %v1564_v34, %v4491_v62 }
 0x169   :  { %v2892_v44 = vadd.f32 %v2828_v29, %v2572_v21  ;;  %v4538_v42 = vadd.f32 %v4420_v22, %v2221_v1  ;;  %v4541_v2 = vadd.f32 %v357_v5, %v4054_v26  ;;  %v526_v45 = vpop.f32.mrf.mxu1  ;;  %v1565_v8 = vadd.f32 1.0, %v3533_v36 }
 0x16a   :  { %v4545_v7 = vadd.f32 %v526_v45, %v4059_v28  ;;  %v1184_v9 = vadd.f32 %v1056_v60, %v4508_v10  ;;  %v1057_v48 = vmul.f32 %v929_v18, %v4511_v15  ;;  %v672_v58 = vmul.f32 0.5, %v4508_v10 }
 0x16b   :  { %v3535_v27 = vpop.eup %3534  ;;  %v2956_v12 = vmul.f32 0.7978846, %v2892_v44  ;;  %v2701_v11 = vmul.f32 0.044715, %v4538_v42  ;;  %v802_v16 = vmul.f32 0.044715, %v4541_v2  ;;  %v1693_v54 = vmul.f32 %v1565_v8, %v669_v38 }
 0x16c   :  { %v3083_v57 = vadd.f32 1.0, %v3535_v27  ;;  %v803_v23 = vmul.f32 0.044715, %v4545_v7  ;;  %v3537_v4 = vpop.eup %3536  ;;  %v1312_v41 = vmul.f32 0.7978846, %v1184_v9  ;;  %v1185_v43 = vadd.f32 %v1057_v48, %v4511_v15 }
 0x16d   :  { %3540 = vtanh.f32 %v2956_v12  ;;  %v2765_v39 = vmul.f32 %v2701_v11, %v4538_v42  ;;  %v2053_v19 = vpop.f32.mrf.mxu2  ;;  %v3539_v20 = vpop.eup %3538  ;;  %v930_v21 = vmul.f32 %v802_v16, %v4541_v2  ;;  %v1566_v61 = vadd.f32 1.0, %v3537_v4 }
 0x16e   :  { %v3147_v33 = vmul.f32 %v3083_v57, %v2635_v50  ;;  %v931_v62 = vmul.f32 %v803_v23, %v4545_v7  ;;  %v2222_v25 = vpop.f32.mrf.mxu3  ;;  %v1567_v3 = vadd.f32 1.0, %v3539_v20  ;;  %3542 = vtanh.f32 %v1312_v41 }
 0x16f   :  { %v2829_v30 = vmul.f32 %v2765_v39, %v4538_v42  ;;  %v2223_v31 = vadd.f32 %v2222_v25, %v2053_v19  ;;  %v1694_v53 = vmul.f32 %v1566_v61, %v670_v17  ;;  %v1058_v37 = vmul.f32 %v930_v21, %v4541_v2 }
 0x170   :  { %3211 = vst [vmem:[%s5757_s5 + $0x10] sm:$0xff] %v3147_v33  ;;  %v360_v32 = vpop.f32.mrf.mxu0  ;;  %v1059_v24 = vmul.f32 %v931_v62, %v4545_v7  ;;  %v1695_v49 = vmul.f32 %v1567_v3, %v671_v56  ;;  %v4580_v10 = vmul.f32 0.5, %v4511_v15  ;;  %v1313_v44 = vmul.f32 0.7978846, %v1185_v43 }
 0x171   :  { %v2893_v14 = vadd.f32 %v2829_v30, %v4538_v42  ;;  %v2574_v46 = vadd.f32 %v4420_v22, %v2223_v31  ;;  %v4567_v47 = vadd.f32 %v360_v32, %v4054_v26  ;;  %v529_v35 = vpop.f32.mrf.mxu1  ;;  %v1862_v52 = vpack.c.bf16 %v1694_v53, %v1692_v63 }
 0x172   :  { %v4570_v51 = vadd.f32 %v529_v35, %v4059_v28  ;;  %v1186_v38 = vadd.f32 %v1058_v37, %v4541_v2  ;;  %v1863_v0 = vpack.c.bf16 %v1695_v49, %v1693_v54  ;;  %v1187_v29 = vadd.f32 %v1059_v24, %v4545_v7 }
 0x173   :  { %v3541_v13 = vpop.eup %3540  ;;  %v2957_v59 = vmul.f32 0.7978846, %v2893_v14  ;;  %v2702_v40 = vmul.f32 0.044715, %v2574_v46  ;;  %399 = vmatmul.bf16.gmra.mxu0 %v4529_v6  ;;  %v804_v34 = vmul.f32 0.044715, %v4567_v47  ;;  %2095 = vmatmul.bf16.gmra.mxu2 %v1862_v52 }
 0x174   :  { %v3084_v1 = vadd.f32 1.0, %v3541_v13  ;;  %v805_v50 = vmul.f32 0.044715, %v4570_v51  ;;  %568 = vmatmul.bf16.gmra.mxu1 %v4529_v6  ;;  %v3543_v18 = vpop.eup %3542  ;;  %2264 = vmatmul.bf16.gmra.mxu3 %v1863_v0  ;;  %v1314_v36 = vmul.f32 0.7978846, %v1186_v38  ;;  %v2637_v17 = vmul.f32 0.5, %v4538_v42 }
 0x175   :  { %3544 = vtanh.f32 %v2957_v59  ;;  %v2766_v5 = vmul.f32 %v2702_v40, %v2574_v46  ;;  %v2056_v60 = vpop.f32.mrf.mxu2  ;;  %v932_v56 = vmul.f32 %v804_v34, %v4567_v47  ;;  %v1315_v15 = vmul.f32 0.7978846, %v1187_v29  ;;  %v132_v42 = vld [vmem:[%s5753_s0 + $0x160] sm:$0xff] }
 0x176   :  { %v3148_v45 = vmul.f32 %v3084_v1, %v2636_v55  ;;  %v933_v8 = vmul.f32 %v805_v50, %v4570_v51  ;;  %v2225_v9 = vpop.f32.mrf.mxu3  ;;  %3546 = vtanh.f32 %v1314_v36  ;;  %v674_v11 = vmul.f32 0.5, %v4541_v2  ;;  %v133_v55 = vld [vmem:[%s5753_s0 + $0x168] sm:$0xff] }
 0x177   :  { %v2830_v27 = vmul.f32 %v2766_v5, %v2574_v46  ;;  %v2226_v6 = vadd.f32 %v2225_v9, %v2056_v60  ;;  %v1568_v63 = vadd.f32 1.0, %v3543_v18  ;;  %3548 = vtanh.f32 %v1313_v44 }
 0x178   :  { %3212 = vst [vmem:[%s5757_s5 + $0x18] sm:$0xff] %v3148_v45  ;;  %v362_v12 = vpop.f32.mrf.mxu0  ;;  %v1060_v57 = vmul.f32 %v932_v56, %v4567_v47  ;;  %3550 = vtanh.f32 %v1315_v15  ;;  %v675_v39 = vmul.f32 0.5, %v4545_v7  ;;  %v1061_v54 = vmul.f32 %v933_v8, %v4570_v51 }
 0x179   :  { %v2894_v16 = vadd.f32 %v2830_v27, %v2574_v46  ;;  %v4597_v23 = vadd.f32 %v4420_v22, %v2226_v6  ;;  %v4600_v48 = vadd.f32 %v362_v12, %v4054_v26  ;;  %v531_v2 = vpop.f32.mrf.mxu1  ;;  %v2638_v20 = vmul.f32 0.5, %v2574_v46 }
 0x17a   :  { %v4603_v4 = vadd.f32 %v531_v2, %v4059_v28  ;;  %v1188_v19 = vadd.f32 %v1060_v57, %v4567_v47  ;;  %v174_v62 = vpack.c.bf16 %v133_v55, %v132_v42  ;;  %v1696_v31 = vmul.f32 %v1568_v63, %v672_v58 }
 0x17b   :  { %v3545_v41 = vpop.eup %3544  ;;  %v2958_v33 = vmul.f32 0.7978846, %v2894_v16  ;;  %v2703_v21 = vmul.f32 0.044715, %v4597_v23  ;;  %v806_v61 = vmul.f32 0.044715, %v4600_v48  ;;  %v1189_v37 = vadd.f32 %v1061_v54, %v4570_v51 }
 0x17c   :  { %v3085_v25 = vadd.f32 1.0, %v3545_v41  ;;  %v807_v30 = vmul.f32 0.044715, %v4603_v4  ;;  %v3547_v3 = vpop.eup %3546  ;;  %v1316_v53 = vmul.f32 0.7978846, %v1188_v19  ;;  %v676_v27 = vmul.f32 0.5, %v4567_v47 }
 0x17d   :  { %3552 = vtanh.f32 %v2958_v33  ;;  %v2767_v7 = vmul.f32 %v2703_v21, %v4597_v23  ;;  %v2058_v32 = vpop.f32.mrf.mxu2  ;;  %v3549_v24 = vpop.eup %3548  ;;  %v934_v14 = vmul.f32 %v806_v61, %v4600_v48  ;;  %v1570_v49 = vadd.f32 1.0, %v3547_v3 }
 0x17e   :  { %v3149_v43 = vmul.f32 %v3085_v25, %v2637_v17  ;;  %v935_v46 = vmul.f32 %v807_v30, %v4603_v4  ;;  %v2227_v35 = vpop.f32.mrf.mxu3  ;;  %v3551_v52 = vpop.eup %3550  ;;  %v1569_v13 = vadd.f32 1.0, %v3549_v24  ;;  %3554 = vtanh.f32 %v1316_v53 }
 0x17f   :  { %v2831_v38 = vmul.f32 %v2767_v7, %v4597_v23  ;;  %v2228_v58 = vadd.f32 %v2227_v35, %v2058_v32  ;;  %v1698_v40 = vmul.f32 %v1570_v49, %v674_v11  ;;  %v1571_v0 = vadd.f32 1.0, %v3551_v52 }
 0x180   :  { %3213 = vst [vmem:[%s5757_s5 + $0x20] sm:$0xff] %v3149_v43  ;;  %v365_v59 = vpop.f32.mrf.mxu0  ;;  %v1062_v29 = vmul.f32 %v934_v14, %v4600_v48  ;;  %v1063_v1 = vmul.f32 %v935_v46, %v4603_v4  ;;  %v1697_v60 = vmul.f32 %v1569_v13, %v4580_v10  ;;  %v1317_v16 = vmul.f32 0.7978846, %v1189_v37 }
 0x181   :  { %v2895_v34 = vadd.f32 %v2831_v38, %v4597_v23  ;;  %v2576_v50 = vadd.f32 %v4420_v22, %v2228_v58  ;;  %v4624_v18 = vadd.f32 %v365_v59, %v4054_v26  ;;  %v534_v5 = vpop.f32.mrf.mxu1  ;;  %v1864_v44 = vpack.c.bf16 %v1698_v40, %v1696_v31 }
 0x182   :  { %v4628_v36 = vadd.f32 %v534_v5, %v4059_v28  ;;  %v1699_v45 = vmul.f32 %v1571_v0, %v675_v39  ;;  %v1190_v17 = vadd.f32 %v1062_v29, %v4600_v48  ;;  %v1191_v6 = vadd.f32 %v1063_v1, %v4603_v4 }
 0x183   :  { %v3553_v56 = vpop.eup %3552  ;;  %v2959_v8 = vmul.f32 0.7978846, %v2895_v34  ;;  %v2704_v9 = vmul.f32 0.044715, %v2576_v50  ;;  %404 = vmatmul.bf16.gmra.mxu0 %v174_v62  ;;  %v808_v12 = vmul.f32 0.044715, %v4624_v18  ;;  %2100 = vmatmul.bf16.gmra.mxu2 %v1864_v44 }
 0x184   :  { %v3086_v15 = vadd.f32 1.0, %v3553_v56  ;;  %v809_v10 = vmul.f32 0.044715, %v4628_v36  ;;  %v1865_v11 = vpack.c.bf16 %v1699_v45, %v1697_v60  ;;  %573 = vmatmul.bf16.gmra.mxu1 %v174_v62  ;;  %v3555_v63 = vpop.eup %3554  ;;  %v1318_v57 = vmul.f32 0.7978846, %v1190_v17 }
 0x185   :  { %3556 = vtanh.f32 %v2959_v8  ;;  %v2768_v42 = vmul.f32 %v2704_v9, %v2576_v50  ;;  %v2061_v55 = vpop.f32.mrf.mxu2  ;;  %v936_v39 = vmul.f32 %v808_v12, %v4624_v18  ;;  %v1572_v54 = vadd.f32 1.0, %v3555_v63 }
 0x186   :  { %v3150_v2 = vmul.f32 %v3086_v15, %v2638_v20  ;;  %v937_v47 = vmul.f32 %v809_v10, %v4628_v36  ;;  %2269 = vmatmul.bf16.gmra.mxu3 %v1865_v11  ;;  %v2230_v19 = vpop.f32.mrf.mxu3  ;;  %3558 = vtanh.f32 %v1318_v57  ;;  %v1319_v21 = vmul.f32 0.7978846, %v1191_v6 }
 0x187   :  { %v2832_v41 = vmul.f32 %v2768_v42, %v2576_v50  ;;  %v2231_v33 = vadd.f32 %v2230_v19, %v2061_v55  ;;  %v2639_v62 = vmul.f32 0.5, %v4597_v23  ;;  %v678_v20 = vmul.f32 0.5, %v4600_v48  ;;  %v134_v48 = vld [vmem:[%s5753_s0 + $0x170] sm:$0xff] }
 0x188   :  { %3214 = vst [vmem:[%s5757_s5 + $0x28] sm:$0xff] %v3150_v2  ;;  %v367_v25 = vpop.f32.mrf.mxu0  ;;  %v677_v61 = vmul.f32 0.5, %v4570_v51  ;;  %3560 = vtanh.f32 %v1317_v16  ;;  %v679_v23 = vmul.f32 0.5, %v4603_v4  ;;  %v135_v51 = vld [vmem:[%s5753_s0 + $0x178] sm:$0xff]  ;;  %v1064_v53 = vmul.f32 %v936_v39, %v4624_v18 }
 0x189   :  { %v2896_v30 = vadd.f32 %v2832_v41, %v2576_v50  ;;  %v4644_v31 = vadd.f32 %v4420_v22, %v2231_v33  ;;  %v4647_v3 = vadd.f32 %v367_v25, %v4054_v26  ;;  %v536_v7 = vpop.f32.mrf.mxu1  ;;  %3562 = vtanh.f32 %v1319_v21 }
 0x18a   :  { %v4650_v32 = vadd.f32 %v536_v7, %v4059_v28  ;;  %v1065_v37 = vmul.f32 %v937_v47, %v4628_v36  ;;  %v2640_v43 = vmul.f32 0.5, %v2576_v50  ;;  %v1700_v35 = vmul.f32 %v1572_v54, %v676_v27 }
 0x18b   :  { %v3557_v24 = vpop.eup %3556  ;;  %v2960_v14 = vmul.f32 0.7978846, %v2896_v30  ;;  %v2705_v46 = vmul.f32 0.044715, %v4644_v31  ;;  %v810_v4 = vmul.f32 0.044715, %v4647_v3  ;;  %v1192_v38 = vadd.f32 %v1064_v53, %v4624_v18 }
 0x18c   :  { %v3087_v49 = vadd.f32 1.0, %v3557_v24  ;;  %v811_v52 = vmul.f32 0.044715, %v4650_v32  ;;  %v3559_v58 = vpop.eup %3558  ;;  %v175_v40 = vpack.c.bf16 %v135_v51, %v134_v48  ;;  %v1193_v0 = vadd.f32 %v1065_v37, %v4628_v36 }
 0x18d   :  { %3564 = vtanh.f32 %v2960_v14  ;;  %v2769_v13 = vmul.f32 %v2705_v46, %v4644_v31  ;;  %v2063_v59 = vpop.f32.mrf.mxu2  ;;  %v938_v34 = vmul.f32 %v810_v4, %v4647_v3  ;;  %v1574_v60 = vadd.f32 1.0, %v3559_v58 }
 0x18e   :  { %v3561_v29 = vpop.eup %3560  ;;  %v3151_v1 = vmul.f32 %v3087_v49, %v2639_v62  ;;  %v939_v50 = vmul.f32 %v811_v52, %v4650_v32  ;;  %v2232_v5 = vpop.f32.mrf.mxu3  ;;  %v1320_v8 = vmul.f32 0.7978846, %v1192_v38  ;;  %v4685_v41 = vmul.f32 0.5, %v4624_v18  ;;  %v137_v49 = vld [vmem:[%s5753_s0 + $0x188] sm:$0xff] }
 0x18f   :  { %v3563_v44 = vpop.eup %3562  ;;  %v2833_v45 = vmul.f32 %v2769_v13, %v4644_v31  ;;  %v2233_v17 = vadd.f32 %v2232_v5, %v2063_v59  ;;  %v1573_v56 = vadd.f32 1.0, %v3561_v29  ;;  %v1702_v27 = vmul.f32 %v1574_v60, %v678_v20 }
 0x190   :  { %3215 = vst [vmem:[%s5757_s5 + $0x30] sm:$0xff] %v3151_v1  ;;  %v370_v9 = vpop.f32.mrf.mxu0  ;;  %v1575_v6 = vadd.f32 1.0, %v3563_v44  ;;  %v1066_v15 = vmul.f32 %v938_v34, %v4647_v3  ;;  %v1067_v12 = vmul.f32 %v939_v50, %v4650_v32  ;;  %3566 = vtanh.f32 %v1320_v8 }
 0x191   :  { %v2897_v10 = vadd.f32 %v2833_v45, %v4644_v31  ;;  %v2578_v11 = vadd.f32 %v4420_v22, %v2233_v17  ;;  %v4678_v63 = vadd.f32 %v370_v9, %v4054_v26  ;;  %v539_v42 = vpop.f32.mrf.mxu1  ;;  %v1701_v55 = vmul.f32 %v1573_v56, %v677_v61 }
 0x192   :  { %v4681_v57 = vadd.f32 %v539_v42, %v4059_v28  ;;  %v1866_v16 = vpack.c.bf16 %v1702_v27, %v1700_v35  ;;  %v1703_v2 = vmul.f32 %v1575_v6, %v679_v23  ;;  %v1194_v39 = vadd.f32 %v1066_v15, %v4647_v3  ;;  %v136_v35 = vld [vmem:[%s5753_s0 + $0x180] sm:$0xff] }
 0x193   :  { %v3565_v47 = vpop.eup %3564  ;;  %v2961_v19 = vmul.f32 0.7978846, %v2897_v10  ;;  %v2706_v54 = vmul.f32 0.044715, %v2578_v11  ;;  %409 = vmatmul.bf16.gmra.mxu0 %v175_v40  ;;  %v812_v21 = vmul.f32 0.044715, %v4678_v63  ;;  %v1195_v7 = vadd.f32 %v1067_v12, %v4650_v32 }
 0x194   :  { %v3088_v33 = vadd.f32 1.0, %v3565_v47  ;;  %2105 = vmatmul.bf16.gmra.mxu2 %v1866_v16  ;;  %v1867_v62 = vpack.c.bf16 %v1703_v2, %v1701_v55  ;;  %578 = vmatmul.bf16.gmra.mxu1 %v175_v40  ;;  %v4689_v25 = vmul.f32 0.5, %v4628_v36  ;;  %v1322_v30 = vmul.f32 0.7978846, %v1194_v39 }
 0x195   :  { %3568 = vtanh.f32 %v2961_v19  ;;  %v2770_v20 = vmul.f32 %v2706_v54, %v2578_v11  ;;  %v2066_v61 = vpop.f32.mrf.mxu2  ;;  %v940_v18 = vmul.f32 %v812_v21, %v4678_v63  ;;  %v813_v48 = vmul.f32 0.044715, %v4681_v57 }
 0x196   :  { %v3152_v23 = vmul.f32 %v3088_v33, %v2640_v43  ;;  %2274 = vmatmul.bf16.gmra.mxu3 %v1867_v62  ;;  %v2235_v51 = vpop.f32.mrf.mxu3  ;;  %v1321_v53 = vmul.f32 0.7978846, %v1193_v0  ;;  %3570 = vtanh.f32 %v1322_v30  ;;  %v1323_v14 = vmul.f32 0.7978846, %v1195_v7  ;;  %v3567_v52 = vpop.eup %3566 }
 0x197   :  { %v2834_v37 = vmul.f32 %v2770_v20, %v2578_v11  ;;  %v2236_v24 = vadd.f32 %v2235_v51, %v2066_v61  ;;  %v2641_v36 = vmul.f32 0.5, %v4644_v31  ;;  %v682_v43 = vmul.f32 0.5, %v4647_v3 }
 0x198   :  { %3216 = vst [vmem:[%s5757_s5 + $0x38] sm:$0xff] %v3152_v23  ;;  %v372_v46 = vpop.f32.mrf.mxu0  ;;  %3572 = vtanh.f32 %v1321_v53  ;;  %v1068_v4 = vmul.f32 %v940_v18, %v4678_v63  ;;  %v4712_v13 = vmul.f32 0.5, %v2578_v11  ;;  %v683_v40 = vmul.f32 0.5, %v4650_v32 }
 0x199   :  { %v2898_v38 = vadd.f32 %v2834_v37, %v2578_v11  ;;  %v4707_v58 = vadd.f32 %v4420_v22, %v2236_v24  ;;  %v4710_v31 = vadd.f32 %v372_v46, %v4054_v26  ;;  %v541_v3 = vpop.f32.mrf.mxu1  ;;  %3574 = vtanh.f32 %v1323_v14 }
 0x19a   :  { %v4715_v59 = vadd.f32 %v541_v3, %v4059_v28  ;;  %v1196_v0 = vadd.f32 %v1068_v4, %v4678_v63  ;;  %v941_v34 = vmul.f32 %v813_v48, %v4681_v57  ;;  %v176_v5 = vpack.c.bf16 %v137_v49, %v136_v35 }
 0x19b   :  { %v3569_v29 = vpop.eup %3568  ;;  %v2962_v1 = vmul.f32 0.7978846, %v2898_v38  ;;  %v2707_v50 = vmul.f32 0.044715, %v4707_v58  ;;  %v814_v44 = vmul.f32 0.044715, %v4710_v31 }
 0x19c   :  { %v3089_v60 = vadd.f32 1.0, %v3569_v29  ;;  %v815_v45 = vmul.f32 0.044715, %v4715_v59  ;;  %v1576_v17 = vadd.f32 1.0, %v3567_v52  ;;  %v3571_v56 = vpop.eup %3570  ;;  %v4725_v9 = vmul.f32 0.5, %v4678_v63 }
 0x19d   :  { %3576 = vtanh.f32 %v2962_v1  ;;  %v2771_v8 = vmul.f32 %v2707_v50, %v4707_v58  ;;  %v2068_v32 = vpop.f32.mrf.mxu2  ;;  %v1324_v27 = vmul.f32 0.7978846, %v1196_v0  ;;  %v942_v12 = vmul.f32 %v814_v44, %v4710_v31 }
 0x19e   :  { %v3573_v6 = vpop.eup %3572  ;;  %v3153_v15 = vmul.f32 %v3089_v60, %v2641_v36  ;;  %v943_v10 = vmul.f32 %v815_v45, %v4715_v59  ;;  %v2237_v11 = vpop.f32.mrf.mxu3  ;;  %v1578_v42 = vadd.f32 1.0, %v3571_v56  ;;  %v1704_v47 = vmul.f32 %v1576_v17, %v4685_v41  ;;  %v4764_v60 = vld [vmem:[%s5756_s4] ss:$0 sm:$0xff] }
 0x19f   :  { %v3575_v55 = vpop.eup %3574  ;;  %v2835_v16 = vmul.f32 %v2771_v8, %v4707_v58  ;;  %v2238_v2 = vadd.f32 %v2237_v11, %v2068_v32  ;;  %v1577_v39 = vadd.f32 1.0, %v3573_v6  ;;  %3578 = vtanh.f32 %v1324_v27  ;;  %v138_v27 = vld [vmem:[%s5753_s0 + $0x190] sm:$0xff]  ;;  %v139_v6 = vld [vmem:[%s5753_s0 + $0x198] sm:$0xff] }
 0x1a0   :  { %3217 = vst [vmem:[%s5757_s5 + $0x40] sm:$0xff] %v3153_v15  ;;  %v375_v63 = vpop.f32.mrf.mxu0  ;;  %v1706_v19 = vmul.f32 %v1578_v42, %v682_v43  ;;  %v1579_v54 = vadd.f32 1.0, %v3575_v55  ;;  %v1070_v33 = vmul.f32 %v942_v12, %v4710_v31  ;;  %v1069_v30 = vmul.f32 %v941_v34, %v4681_v57 }
 0x1a1   :  { %v2899_v21 = vadd.f32 %v2835_v16, %v4707_v58  ;;  %v2580_v62 = vadd.f32 %v4420_v22, %v2238_v2  ;;  %v4738_v20 = vadd.f32 %v375_v63, %v4054_v26  ;;  %v544_v61 = vpop.f32.mrf.mxu1  ;;  %v1705_v23 = vmul.f32 %v1577_v39, %v4689_v25 }
 0x1a2   :  { %v1868_v7 = vpack.c.bf16 %v1706_v19, %v1704_v47  ;;  %v1707_v18 = vmul.f32 %v1579_v54, %v683_v40  ;;  %v1198_v41 = vadd.f32 %v1070_v33, %v4710_v31  ;;  %v4744_v37 = vmul.f32 0.5, %v4681_v57 }
 0x1a3   :  { %v3577_v48 = vpop.eup %3576  ;;  %v2963_v51 = vmul.f32 0.7978846, %v2899_v21  ;;  %v2708_v53 = vmul.f32 0.044715, %v2580_v62  ;;  %414 = vmatmul.bf16.gmra.mxu0 %v176_v5  ;;  %v1071_v22 = vmul.f32 %v943_v10, %v4715_v59  ;;  %v816_v14 = vmul.f32 0.044715, %v4738_v20 }
 0x1a4   :  { %v3090_v24 = vadd.f32 1.0, %v3577_v48  ;;  %v4749_v36 = vadd.f32 %v544_v61, %v4059_v28  ;;  %2110 = vmatmul.bf16.gmra.mxu2 %v1868_v7  ;;  %v1869_v25 = vpack.c.bf16 %v1707_v18, %v1705_v23  ;;  %583 = vmatmul.bf16.gmra.mxu1 %v176_v5  ;;  %v1326_v49 = vmul.f32 0.7978846, %v1198_v41 }
 0x1a5   :  { %v3579_v46 = vpop.eup %3578  ;;  %3580 = vtanh.f32 %v2963_v51  ;;  %v2772_v43 = vmul.f32 %v2708_v53, %v2580_v62  ;;  %v2071_v35 = vpop.f32.mrf.mxu2  ;;  %v1197_v4 = vadd.f32 %v1069_v30, %v4681_v57  ;;  %v2643_v38 = vmul.f32 0.5, %v4707_v58 }
 0x1a6   :  { %v3154_v52 = vmul.f32 %v3090_v24, %v4712_v13  ;;  %v944_v3 = vmul.f32 %v816_v14, %v4738_v20  ;;  %2279 = vmatmul.bf16.gmra.mxu3 %v1869_v25  ;;  %v2240_v40 = vpop.f32.mrf.mxu3  ;;  %v686_v0 = vmul.f32 0.5, %v4710_v31  ;;  %3582 = vtanh.f32 %v1326_v49 }
 0x1a7   :  { %v2836_v29 = vmul.f32 %v2772_v43, %v2580_v62  ;;  %v2241_v1 = vadd.f32 %v2240_v40, %v2071_v35  ;;  %v1199_v34 = vadd.f32 %v1071_v22, %v4715_v59  ;;  %v817_v57 = vmul.f32 0.044715, %v4749_v36 }
 0x1a8   :  { %3218 = vst [vmem:[%s5757_s5 + $0x48] sm:$0xff] %v3154_v52  ;;  %v377_v13 = vpop.f32.mrf.mxu0  ;;  %v1580_v50 = vadd.f32 1.0, %v3579_v46  ;;  %v1325_v58 = vmul.f32 0.7978846, %v1197_v4  ;;  %v4770_v56 = vmul.f32 0.5, %v2580_v62  ;;  %v687_v32 = vmul.f32 0.5, %v4715_v59 }
 0x1a9   :  { %v2900_v5 = vadd.f32 %v2836_v29, %v2580_v62  ;;  %v2581_v31 = vadd.f32 %v4764_v60, %v2241_v1  ;;  %v4768_v44 = vadd.f32 %v377_v13, %v4054_v26  ;;  %v546_v45 = vpop.f32.mrf.mxu1  ;;  %v1327_v17 = vmul.f32 0.7978846, %v1199_v34 }
 0x1aa   :  { %v4773_v8 = vadd.f32 %v546_v45, %v4059_v28  ;;  %3584 = vtanh.f32 %v1325_v58  ;;  %v1072_v11 = vmul.f32 %v944_v3, %v4738_v20  ;;  %v945_v55 = vmul.f32 %v817_v57, %v4749_v36 }
 0x1ab   :  { %v3581_v15 = vpop.eup %3580  ;;  %v2964_v12 = vmul.f32 0.7978846, %v2900_v5  ;;  %v2709_v10 = vmul.f32 0.044715, %v2581_v31  ;;  %3586 = vtanh.f32 %v1327_v17  ;;  %v818_v59 = vmul.f32 0.044715, %v4768_v44 }
 0x1ac   :  { %v3091_v42 = vadd.f32 1.0, %v3581_v15  ;;  %v819_v16 = vmul.f32 0.044715, %v4773_v8  ;;  %v3583_v2 = vpop.eup %3582  ;;  %v1708_v47 = vmul.f32 %v1580_v50, %v4725_v9  ;;  %v177_v19 = vpack.c.bf16 %v139_v6, %v138_v27 }
 0x1ad   :  { %3588 = vtanh.f32 %v2964_v12  ;;  %v2773_v39 = vmul.f32 %v2709_v10, %v2581_v31  ;;  %v2073_v63 = vpop.f32.mrf.mxu2  ;;  %v946_v33 = vmul.f32 %v818_v59, %v4768_v44  ;;  %v1582_v62 = vadd.f32 1.0, %v3583_v2 }
 0x1ae   :  { %v3155_v54 = vmul.f32 %v3091_v42, %v2643_v38  ;;  %v2242_v21 = vpop.f32.mrf.mxu3  ;;  %v4789_v61 = vmul.f32 0.5, %v4738_v20  ;;  %v947_v7 = vmul.f32 %v819_v16, %v4773_v8  ;;  %v1200_v18 = vadd.f32 %v1072_v11, %v4738_v20 }
 0x1af   :  { %v2837_v30 = vmul.f32 %v2773_v39, %v2581_v31  ;;  %v2243_v23 = vadd.f32 %v2242_v21, %v2073_v63  ;;  %v1710_v48 = vmul.f32 %v1582_v62, %v686_v0  ;;  %v1074_v51 = vmul.f32 %v946_v33, %v4768_v44  ;;  %v140_v39 = vld [vmem:[%s5753_s0 + $0x1a0] sm:$0xff] }
 0x1b0   :  { %v3585_v41 = vpop.eup %3584  ;;  %3219 = vst [vmem:[%s5757_s5 + $0x50] sm:$0xff] %v3155_v54  ;;  %v380_v9 = vpop.f32.mrf.mxu0  ;;  %v4798_v53 = vmul.f32 0.5, %v4749_v36  ;;  %v1073_v22 = vmul.f32 %v945_v55, %v4749_v36  ;;  %v4805_v35 = vmul.f32 0.5, %v2581_v31  ;;  %v1328_v0 = vmul.f32 0.7978846, %v1200_v18 }
 0x1b1   :  { %v3587_v24 = vpop.eup %3586  ;;  %v2901_v14 = vadd.f32 %v2837_v30, %v2581_v31  ;;  %v2582_v25 = vadd.f32 %v4764_v60, %v2243_v23  ;;  %v4803_v20 = vadd.f32 %v380_v9, %v4054_v26  ;;  %v549_v46 = vpop.f32.mrf.mxu1  ;;  %v1581_v43 = vadd.f32 1.0, %v3585_v41 }
 0x1b2   :  { %v1870_v49 = vpack.c.bf16 %v1710_v48, %v1708_v47  ;;  %v1583_v4 = vadd.f32 1.0, %v3587_v24  ;;  %v1202_v52 = vadd.f32 %v1074_v51, %v4768_v44  ;;  %v1075_v29 = vmul.f32 %v947_v7, %v4773_v8 }
 0x1b3   :  { %v3589_v38 = vpop.eup %3588  ;;  %v2965_v3 = vmul.f32 0.7978846, %v2901_v14  ;;  %v2710_v40 = vmul.f32 0.044715, %v2582_v25  ;;  %419 = vmatmul.bf16.gmra.mxu0 %v177_v19  ;;  %v820_v34 = vmul.f32 0.044715, %v4803_v20  ;;  %v1709_v57 = vmul.f32 %v1581_v43, %v4744_v37 }
 0x1b4   :  { %v3092_v1 = vadd.f32 1.0, %v3589_v38  ;;  %2115 = vmatmul.bf16.gmra.mxu2 %v1870_v49  ;;  %v1711_v13 = vmul.f32 %v1583_v4, %v687_v32  ;;  %588 = vmatmul.bf16.gmra.mxu1 %v177_v19  ;;  %v1330_v5 = vmul.f32 0.7978846, %v1202_v52  ;;  %v1201_v31 = vadd.f32 %v1073_v22, %v4749_v36 }
 0x1b5   :  { %3590 = vtanh.f32 %v2965_v3  ;;  %v2774_v50 = vmul.f32 %v2710_v40, %v2582_v25  ;;  %v2076_v58 = vpop.f32.mrf.mxu2  ;;  %v948_v17 = vmul.f32 %v820_v34, %v4803_v20  ;;  %v4815_v27 = vadd.f32 %v549_v46, %v4059_v28 }
 0x1b6   :  { %v3156_v45 = vmul.f32 %v3092_v1, %v4770_v56  ;;  %v1871_v6 = vpack.c.bf16 %v1711_v13, %v1709_v57  ;;  %v2245_v15 = vpop.f32.mrf.mxu3  ;;  %3592 = vtanh.f32 %v1328_v0  ;;  %v1203_v37 = vadd.f32 %v1075_v29, %v4773_v8 }
 0x1b7   :  { %v2838_v12 = vmul.f32 %v2774_v50, %v2582_v25  ;;  %v2246_v10 = vadd.f32 %v2245_v15, %v2076_v58  ;;  %v690_v56 = vmul.f32 0.5, %v4768_v44  ;;  %3594 = vtanh.f32 %v1330_v5  ;;  %v141_v44 = vld [vmem:[%s5753_s0 + $0x1a8] sm:$0xff] }
 0x1b8   :  { %3220 = vst [vmem:[%s5757_s5 + $0x58] sm:$0xff] %v3156_v45  ;;  %2284 = vmatmul.bf16.gmra.mxu3 %v1871_v6  ;;  %v382_v36 = vpop.f32.mrf.mxu0  ;;  %v1329_v32 = vmul.f32 0.7978846, %v1201_v31  ;;  %v1076_v11 = vmul.f32 %v948_v17, %v4803_v20  ;;  %v1331_v2 = vmul.f32 0.7978846, %v1203_v37  ;;  %v691_v62 = vmul.f32 0.5, %v4773_v8 }
 0x1b9   :  { %v2902_v42 = vadd.f32 %v2838_v12, %v2582_v25  ;;  %v4824_v55 = vadd.f32 %v4764_v60, %v2246_v10  ;;  %v4827_v59 = vadd.f32 %v382_v36, %v4054_v26  ;;  %v551_v16 = vpop.f32.mrf.mxu1  ;;  %v821_v63 = vmul.f32 0.044715, %v4815_v27 }
 0x1ba   :  { %v4837_v47 = vadd.f32 %v551_v16, %v4059_v28  ;;  %3596 = vtanh.f32 %v1329_v32  ;;  %v1204_v19 = vadd.f32 %v1076_v11, %v4803_v20  ;;  %v178_v18 = vpack.c.bf16 %v141_v44, %v140_v39 }
 0x1bb   :  { %v3591_v54 = vpop.eup %3590  ;;  %v2966_v33 = vmul.f32 0.7978846, %v2902_v42  ;;  %v2711_v21 = vmul.f32 0.044715, %v4824_v55  ;;  %3598 = vtanh.f32 %v1331_v2  ;;  %v822_v7 = vmul.f32 0.044715, %v4827_v59 }
 0x1bc   :  { %v3093_v30 = vadd.f32 1.0, %v3591_v54  ;;  %v823_v23 = vmul.f32 0.044715, %v4837_v47  ;;  %v3593_v41 = vpop.eup %3592  ;;  %v2646_v9 = vmul.f32 0.5, %v2582_v25  ;;  %v1332_v22 = vmul.f32 0.7978846, %v1204_v19 }
 0x1bd   :  { %3600 = vtanh.f32 %v2966_v33  ;;  %v2775_v48 = vmul.f32 %v2711_v21, %v4824_v55  ;;  %v2078_v51 = vpop.f32.mrf.mxu2  ;;  %v3595_v24 = vpop.eup %3594  ;;  %v949_v46 = vmul.f32 %v821_v63, %v4815_v27  ;;  %v950_v8 = vmul.f32 %v822_v7, %v4827_v59 }
 0x1be   :  { %v3157_v14 = vmul.f32 %v3093_v30, %v4805_v35  ;;  %v2247_v43 = vpop.f32.mrf.mxu3  ;;  %v1584_v49 = vadd.f32 1.0, %v3593_v41  ;;  %v1586_v38 = vadd.f32 1.0, %v3595_v24  ;;  %v4850_v25 = vmul.f32 0.5, %v4803_v20 }
 0x1bf   :  { %v2839_v4 = vmul.f32 %v2775_v48, %v4824_v55  ;;  %v2248_v52 = vadd.f32 %v2247_v43, %v2078_v51  ;;  %v951_v35 = vmul.f32 %v823_v23, %v4837_v47  ;;  %v1078_v29 = vmul.f32 %v950_v8, %v4827_v59 }
 0x1c0   :  { %v3597_v3 = vpop.eup %3596  ;;  %3221 = vst [vmem:[%s5757_s5 + $0x60] sm:$0xff] %v3157_v14  ;;  %v385_v40 = vpop.f32.mrf.mxu0  ;;  %v1712_v0 = vmul.f32 %v1584_v49, %v4789_v61  ;;  %3602 = vtanh.f32 %v1332_v22  ;;  %v1714_v50 = vmul.f32 %v1586_v38, %v690_v56  ;;  %v1077_v12 = vmul.f32 %v949_v46, %v4815_v27  ;;  %v143_v14 = vld [vmem:[%s5753_s0 + $0x1b8] sm:$0xff] }
 0x1c1   :  { %v3599_v1 = vpop.eup %3598  ;;  %v2903_v34 = vadd.f32 %v2839_v4, %v4824_v55  ;;  %v4860_v57 = vadd.f32 %v4764_v60, %v2248_v52  ;;  %v4863_v20 = vadd.f32 %v385_v40, %v4054_v26  ;;  %v554_v13 = vpop.f32.mrf.mxu1  ;;  %v1585_v5 = vadd.f32 1.0, %v3597_v3 }
 0x1c2   :  { %v4866_v58 = vadd.f32 %v554_v13, %v4059_v28  ;;  %v1587_v31 = vadd.f32 1.0, %v3599_v1  ;;  %v1206_v61 = vadd.f32 %v1078_v29, %v4827_v59  ;;  %v1872_v15 = vpack.c.bf16 %v1714_v50, %v1712_v0 }
 0x1c3   :  { %v3601_v45 = vpop.eup %3600  ;;  %v2967_v17 = vmul.f32 0.7978846, %v2903_v34  ;;  %v2712_v6 = vmul.f32 0.044715, %v4860_v57  ;;  %424 = vmatmul.bf16.gmra.mxu0 %v178_v18  ;;  %v824_v37 = vmul.f32 0.044715, %v4863_v20  ;;  %v1713_v36 = vmul.f32 %v1585_v5, %v4798_v53 }
 0x1c4   :  { %v3094_v10 = vadd.f32 1.0, %v3601_v45  ;;  %593 = vmatmul.bf16.gmra.mxu1 %v178_v18  ;;  %v1079_v56 = vmul.f32 %v951_v35, %v4837_v47  ;;  %2120 = vmatmul.bf16.gmra.mxu2 %v1872_v15  ;;  %v1715_v11 = vmul.f32 %v1587_v31, %v691_v62  ;;  %v1334_v16 = vmul.f32 0.7978846, %v1206_v61 }
 0x1c5   :  { %3604 = vtanh.f32 %v2967_v17  ;;  %v2776_v32 = vmul.f32 %v2712_v6, %v4860_v57  ;;  %v2081_v42 = vpop.f32.mrf.mxu2  ;;  %v952_v44 = vmul.f32 %v824_v37, %v4863_v20  ;;  %v825_v63 = vmul.f32 0.044715, %v4866_v58 }
 0x1c6   :  { %v3603_v2 = vpop.eup %3602  ;;  %v3158_v39 = vmul.f32 %v3094_v10, %v2646_v9  ;;  %v2250_v19 = vpop.f32.mrf.mxu3  ;;  %v4878_v54 = vmul.f32 0.5, %v4815_v27  ;;  %v1873_v33 = vpack.c.bf16 %v1715_v11, %v1713_v36  ;;  %3606 = vtanh.f32 %v1334_v16 }
 0x1c7   :  { %v2840_v53 = vmul.f32 %v2776_v32, %v4860_v57  ;;  %v2251_v21 = vadd.f32 %v2250_v19, %v2081_v42  ;;  %v2647_v62 = vmul.f32 0.5, %v4824_v55  ;;  %v694_v7 = vmul.f32 0.5, %v4827_v59 }
 0x1c8   :  { %3222 = vst [vmem:[%s5757_s5 + $0x68] sm:$0xff] %v3158_v39  ;;  %v387_v30 = vpop.f32.mrf.mxu0  ;;  %v1205_v23 = vadd.f32 %v1077_v12, %v4815_v27  ;;  %v1207_v18 = vadd.f32 %v1079_v56, %v4837_v47  ;;  %2289 = vmatmul.bf16.gmra.mxu3 %v1873_v33  ;;  %v4894_v22 = vmul.f32 0.5, %v4837_v47  ;;  %v1588_v59 = vadd.f32 1.0, %v3603_v2  ;;  %v142_v27 = vld [vmem:[%s5753_s0 + $0x1b0] sm:$0xff] }
 0x1c9   :  { %v2904_v41 = vadd.f32 %v2840_v53, %v4860_v57  ;;  %v2585_v9 = vadd.f32 %v4764_v60, %v2251_v21  ;;  %v4891_v48 = vadd.f32 %v387_v30, %v4054_v26  ;;  %v556_v51 = vpop.f32.mrf.mxu1  ;;  %v1080_v46 = vmul.f32 %v952_v44, %v4863_v20 }
 0x1ca   :  { %v4897_v55 = vadd.f32 %v556_v51, %v4059_v28  ;;  %v1333_v24 = vmul.f32 0.7978846, %v1205_v23  ;;  %v953_v47 = vmul.f32 %v825_v63, %v4866_v58  ;;  %v1335_v4 = vmul.f32 0.7978846, %v1207_v18 }
 0x1cb   :  { %v3605_v8 = vpop.eup %3604  ;;  %v2968_v43 = vmul.f32 0.7978846, %v2904_v41  ;;  %v2713_v49 = vmul.f32 0.044715, %v2585_v9  ;;  %v826_v38 = vmul.f32 0.044715, %v4891_v48  ;;  %v179_v29 = vpack.c.bf16 %v143_v14, %v142_v27 }
 0x1cc   :  { %v3095_v52 = vadd.f32 1.0, %v3605_v8  ;;  %v827_v3 = vmul.f32 0.044715, %v4897_v55  ;;  %3608 = vtanh.f32 %v1333_v24  ;;  %v3607_v35 = vpop.eup %3606  ;;  %v1208_v1 = vadd.f32 %v1080_v46, %v4863_v20 }
 0x1cd   :  { %3610 = vtanh.f32 %v2968_v43  ;;  %v2777_v40 = vmul.f32 %v2713_v49, %v2585_v9  ;;  %v2083_v0 = vpop.f32.mrf.mxu2  ;;  %v954_v13 = vmul.f32 %v826_v38, %v4891_v48  ;;  %v1590_v31 = vadd.f32 1.0, %v3607_v35 }
 0x1ce   :  { %v3159_v34 = vmul.f32 %v3095_v52, %v2647_v62  ;;  %v955_v50 = vmul.f32 %v827_v3, %v4897_v55  ;;  %v2252_v5 = vpop.f32.mrf.mxu3  ;;  %3612 = vtanh.f32 %v1335_v4  ;;  %v1336_v17 = vmul.f32 0.7978846, %v1208_v1 }
 0x1cf   :  { %v2841_v61 = vmul.f32 %v2777_v40, %v2585_v9  ;;  %v2253_v45 = vadd.f32 %v2252_v5, %v2083_v0  ;;  %v1716_v15 = vmul.f32 %v1588_v59, %v4850_v25  ;;  %v1718_v12 = vmul.f32 %v1590_v31, %v694_v7  ;;  %v144_v5 = vld [vmem:[%s5753_s0 + $0x1c0] sm:$0xff]  ;;  %v145_v31 = vld [vmem:[%s5753_s0 + $0x1c8] sm:$0xff] }
 0x1d0   :  { %3223 = vst [vmem:[%s5757_s5 + $0x70] sm:$0xff] %v3159_v34  ;;  %v390_v6 = vpop.f32.mrf.mxu0  ;;  %v1082_v10 = vmul.f32 %v954_v13, %v4891_v48  ;;  %v1081_v37 = vmul.f32 %v953_v47, %v4866_v58  ;;  %3614 = vtanh.f32 %v1336_v17  ;;  %v2648_v16 = vmul.f32 0.5, %v4860_v57 }
 0x1d1   :  { %v2905_v36 = vadd.f32 %v2841_v61, %v2585_v9  ;;  %v2586_v56 = vadd.f32 %v4764_v60, %v2253_v45  ;;  %v4920_v32 = vadd.f32 %v390_v6, %v4054_v26  ;;  %v559_v11 = vpop.f32.mrf.mxu1  ;;  %v1874_v25 = vpack.c.bf16 %v1718_v12, %v1716_v15 }
 0x1d2   :  { %v3609_v42 = vpop.eup %3608  ;;  %v4924_v2 = vadd.f32 %v559_v11, %v4059_v28  ;;  %v1210_v39 = vadd.f32 %v1082_v10, %v4891_v48  ;;  %v4928_v53 = vmul.f32 0.5, %v4863_v20  ;;  %v1083_v33 = vmul.f32 %v955_v50, %v4897_v55 }
 0x1d3   :  { %v3611_v44 = vpop.eup %3610  ;;  %v2969_v63 = vmul.f32 0.7978846, %v2905_v36  ;;  %v2714_v19 = vmul.f32 0.044715, %v2586_v56  ;;  %429 = vmatmul.bf16.gmra.mxu0 %v179_v29  ;;  %v828_v62 = vmul.f32 0.044715, %v4920_v32  ;;  %v1209_v57 = vadd.f32 %v1081_v37, %v4866_v58 }
 0x1d4   :  { %v3096_v21 = vadd.f32 1.0, %v3611_v44  ;;  %v1589_v30 = vadd.f32 1.0, %v3609_v42  ;;  %598 = vmatmul.bf16.gmra.mxu1 %v179_v29  ;;  %v3613_v7 = vpop.eup %3612  ;;  %v2649_v23 = vmul.f32 0.5, %v2585_v9  ;;  %2125 = vmatmul.bf16.gmra.mxu2 %v1874_v25  ;;  %v1338_v51 = vmul.f32 0.7978846, %v1210_v39 }
 0x1d5   :  { %3616 = vtanh.f32 %v2969_v63  ;;  %v2778_v18 = vmul.f32 %v2714_v19, %v2586_v56  ;;  %v2086_v41 = vpop.f32.mrf.mxu2  ;;  %v829_v20 = vmul.f32 0.044715, %v4924_v2  ;;  %v1591_v24 = vadd.f32 1.0, %v3613_v7 }
 0x1d6   :  { %v3160_v59 = vmul.f32 %v3096_v21, %v2648_v16  ;;  %v2255_v27 = vpop.f32.mrf.mxu3  ;;  %v698_v14 = vmul.f32 0.5, %v4891_v48  ;;  %v3615_v46 = vpop.eup %3614  ;;  %3618 = vtanh.f32 %v1338_v51  ;;  %v1211_v47 = vadd.f32 %v1083_v33, %v4897_v55 }
 0x1d7   :  { %v2842_v8 = vmul.f32 %v2778_v18, %v2586_v56  ;;  %v2256_v43 = vadd.f32 %v2255_v27, %v2086_v41  ;;  %v956_v9 = vmul.f32 %v828_v62, %v4920_v32  ;;  %v1717_v49 = vmul.f32 %v1589_v30, %v4878_v54 }
 0x1d8   :  { %3224 = vst [vmem:[%s5757_s5 + $0x78] sm:$0xff] %v3160_v59  ;;  %v1719_v4 = vmul.f32 %v1591_v24, %v4894_v22  ;;  %v392_v52 = vpop.f32.mrf.mxu0  ;;  %v1337_v38 = vmul.f32 0.7978846, %v1209_v57  ;;  %v1339_v0 = vmul.f32 0.7978846, %v1211_v47  ;;  %v1592_v1 = vadd.f32 1.0, %v3615_v46 }
 0x1d9   :  { %v2906_v3 = vadd.f32 %v2842_v8, %v2586_v56  ;;  %v2587_v48 = vadd.f32 %v4764_v60, %v2256_v43  ;;  %v4944_v35 = vadd.f32 %v392_v52, %v4054_v26  ;;  %v561_v40 = vpop.f32.mrf.mxu1  ;;  %v4947_v34 = vmul.f32 0.5, %v4866_v58 }
 0x1da   :  { %v1875_v29 = vpack.c.bf16 %v1719_v4, %v1717_v49  ;;  %3620 = vtanh.f32 %v1337_v38  ;;  %v4950_v22 = vadd.f32 %v561_v40, %v4059_v28  ;;  %v2650_v45 = vmul.f32 0.5, %v2586_v56 }
 0x1db   :  { %v3617_v13 = vpop.eup %3616  ;;  %v2970_v54 = vmul.f32 0.7978846, %v2906_v3  ;;  %v2715_v50 = vmul.f32 0.044715, %v2587_v48  ;;  %3622 = vtanh.f32 %v1339_v0  ;;  %v830_v58 = vmul.f32 0.044715, %v4944_v35 }
 0x1dc   :  { %v3097_v61 = vadd.f32 1.0, %v3617_v13  ;;  %2294 = vmatmul.bf16.gmra.mxu3 %v1875_v29  ;;  %v699_v17 = vmul.f32 0.5, %v4897_v55  ;;  %v3619_v6 = vpop.eup %3618  ;;  %v957_v15 = vmul.f32 %v829_v20, %v4924_v2  ;;  %v1084_v37 = vmul.f32 %v956_v9, %v4920_v32 }
 0x1dd   :  { %3624 = vtanh.f32 %v2970_v54  ;;  %v2779_v12 = vmul.f32 %v2715_v50, %v2587_v48  ;;  %v2088_v10 = vpop.f32.mrf.mxu2  ;;  %v958_v11 = vmul.f32 %v830_v58, %v4944_v35  ;;  %v1594_v16 = vadd.f32 1.0, %v3619_v6 }
 0x1de   :  { %v3161_v36 = vmul.f32 %v3097_v61, %v2649_v23  ;;  %v2257_v42 = vpop.f32.mrf.mxu3  ;;  %v180_v25 = vpack.c.bf16 %v145_v31, %v144_v5  ;;  %v831_v39 = vmul.f32 0.044715, %v4950_v22  ;;  %v1720_v55 = vmul.f32 %v1592_v1, %v4928_v53 }
 0x1df   :  { %v2843_v56 = vmul.f32 %v2779_v12, %v2587_v48  ;;  %v2258_v44 = vadd.f32 %v2257_v42, %v2088_v10  ;;  %v4968_v19 = vmul.f32 0.5, %v2587_v48  ;;  %v1722_v21 = vmul.f32 %v1594_v16, %v698_v14 }
 0x1e0   :  { %v3621_v63 = vpop.eup %3620  ;;  %3225 = vst [vmem:[%s5757_s5 + $0x80] sm:$0xff] %v3161_v36  ;;  %v395_v33 = vpop.f32.mrf.mxu0  ;;  %v4971_v62 = vmul.f32 0.5, %v4920_v32  ;;  %v1086_v30 = vmul.f32 %v958_v11, %v4944_v35  ;;  %v1212_v41 = vadd.f32 %v1084_v37, %v4920_v32  ;;  %v959_v46 = vmul.f32 %v831_v39, %v4950_v22  ;;  %v146_v37 = vld [vmem:[%s5753_s0 + $0x1d0] sm:$0xff]  ;;  %v147_v36 = vld [vmem:[%s5753_s0 + $0x1d8] sm:$0xff] }
 0x1e1   :  { %v3623_v57 = vpop.eup %3622  ;;  %v2907_v7 = vadd.f32 %v2843_v56, %v2587_v48  ;;  %v4975_v23 = vadd.f32 %v4764_v60, %v2258_v44  ;;  %v4978_v53 = vadd.f32 %v395_v33, %v4054_v26  ;;  %v564_v18 = vpop.f32.mrf.mxu1  ;;  %v1876_v51 = vpack.c.bf16 %v1722_v21, %v1720_v55 }
 0x1e2   :  { %v1593_v59 = vadd.f32 1.0, %v3621_v63  ;;  %v1595_v20 = vadd.f32 1.0, %v3623_v57  ;;  %v1214_v24 = vadd.f32 %v1086_v30, %v4944_v35  ;;  %v1085_v43 = vmul.f32 %v957_v15, %v4924_v2 }
 0x1e3   :  { %v3625_v27 = vpop.eup %3624  ;;  %v2971_v14 = vmul.f32 0.7978846, %v2907_v7  ;;  %v2716_v8 = vmul.f32 0.044715, %v4975_v23  ;;  %434 = vmatmul.bf16.gmra.mxu0 %v180_v25  ;;  %v832_v9 = vmul.f32 0.044715, %v4978_v53  ;;  %v4987_v49 = vadd.f32 %v564_v18, %v4059_v28 }
 0x1e4   :  { %v3098_v47 = vadd.f32 1.0, %v3625_v27  ;;  %v1723_v32 = vmul.f32 %v1595_v20, %v699_v17  ;;  %603 = vmatmul.bf16.gmra.mxu1 %v180_v25  ;;  %2130 = vmatmul.bf16.gmra.mxu2 %v1876_v51  ;;  %v1340_v52 = vmul.f32 0.7978846, %v1212_v41  ;;  %v1342_v38 = vmul.f32 0.7978846, %v1214_v24 }
 0x1e5   :  { %3626 = vtanh.f32 %v2971_v14  ;;  %v2780_v4 = vmul.f32 %v2716_v8, %v4975_v23  ;;  %v960_v48 = vmul.f32 %v832_v9, %v4978_v53  ;;  %v1721_v40 = vmul.f32 %v1593_v59, %v4947_v34 }
 0x1e6   :  { %v3162_v3 = vmul.f32 %v3098_v47, %v2650_v45  ;;  %v2091_v0 = vpop.f32.mrf.mxu2  ;;  %v702_v29 = vmul.f32 0.5, %v4944_v35  ;;  %3628 = vtanh.f32 %v1340_v52  ;;  %v1087_v54 = vmul.f32 %v959_v46, %v4950_v22 }
 0x1e7   :  { %v2844_v1 = vmul.f32 %v2780_v4, %v4975_v23  ;;  %v2260_v13 = vpop.f32.mrf.mxu3  ;;  %v1213_v50 = vadd.f32 %v1085_v43, %v4924_v2  ;;  %v833_v5 = vmul.f32 0.044715, %v4987_v49  ;;  %v1877_v31 = vpack.c.bf16 %v1723_v32, %v1721_v40 }
 0x1e8   :  { %3226 = vst [vmem:[%s5757_s5 + $0x88] sm:$0xff] %v3162_v3  ;;  %v2261_v61 = vadd.f32 %v2260_v13, %v2091_v0  ;;  %v397_v34 = vpop.f32.mrf.mxu0  ;;  %3630 = vtanh.f32 %v1342_v38  ;;  %v1215_v17 = vadd.f32 %v1087_v54, %v4950_v22  ;;  %v5010_v10 = vmul.f32 0.5, %v4924_v2 }
 0x1e9   :  { %v2908_v35 = vadd.f32 %v2844_v1, %v4975_v23  ;;  %v5002_v45 = vadd.f32 %v397_v34, %v4054_v26  ;;  %v566_v58 = vpop.f32.mrf.mxu1  ;;  %v1341_v6 = vmul.f32 0.7978846, %v1213_v50  ;;  %v1088_v11 = vmul.f32 %v960_v48, %v4978_v53 }
 0x1ea   :  { %v2589_v15 = vadd.f32 %v4764_v60, %v2261_v61  ;;  %v5007_v12 = vadd.f32 %v566_v58, %v4059_v28  ;;  %v1343_v56 = vmul.f32 0.7978846, %v1215_v17  ;;  %v961_v2 = vmul.f32 %v833_v5, %v4987_v49 }
 0x1eb   :  { %v3627_v42 = vpop.eup %3626  ;;  %v2972_v16 = vmul.f32 0.7978846, %v2908_v35  ;;  %v834_v25 = vmul.f32 0.044715, %v5002_v45  ;;  %3632 = vtanh.f32 %v1341_v6  ;;  %v5022_v55 = vmul.f32 0.5, %v4950_v22 }
 0x1ec   :  { %v3099_v39 = vadd.f32 1.0, %v3627_v42  ;;  %2299 = vmatmul.bf16.gmra.mxu3 %v1877_v31  ;;  %v2717_v44 = vmul.f32 0.044715, %v2589_v15  ;;  %v3629_v63 = vpop.eup %3628  ;;  %v181_v21 = vpack.c.bf16 %v147_v36, %v146_v37  ;;  %v1216_v30 = vadd.f32 %v1088_v11, %v4978_v53 }
 0x1ed   :  { %3634 = vtanh.f32 %v2972_v16  ;;  %v962_v33 = vmul.f32 %v834_v25, %v5002_v45  ;;  %v835_v41 = vmul.f32 0.044715, %v5007_v12  ;;  %v1596_v59 = vadd.f32 1.0, %v3629_v63 }
 0x1ee   :  { %v3631_v57 = vpop.eup %3630  ;;  %v3163_v7 = vmul.f32 %v3099_v39, %v4968_v19  ;;  %v2781_v18 = vmul.f32 %v2717_v44, %v2589_v15  ;;  %v2093_v51 = vpop.f32.mrf.mxu2  ;;  %3636 = vtanh.f32 %v1343_v56  ;;  %v1344_v27 = vmul.f32 0.7978846, %v1216_v30 }
 0x1ef   :  { %v2262_v20 = vpop.f32.mrf.mxu3  ;;  %v1598_v24 = vadd.f32 1.0, %v3631_v57  ;;  %v1090_v22 = vmul.f32 %v962_v33, %v5002_v45  ;;  %v2652_v14 = vmul.f32 0.5, %v4975_v23  ;;  %v1724_v43 = vmul.f32 %v1596_v59, %v4971_v62 }
 0x1f0   :  { %3227 = vst [vmem:[%s5757_s5 + $0x90] sm:$0xff] %v3163_v7  ;;  %v2845_v46 = vmul.f32 %v2781_v18, %v2589_v15  ;;  %v2263_v8 = vadd.f32 %v2262_v20, %v2093_v51  ;;  %v400_v19 = vpop.f32.mrf.mxu0  ;;  %3638 = vtanh.f32 %v1344_v27  ;;  %v963_v3 = vmul.f32 %v835_v41, %v5007_v12 }
 0x1f1   :  { %v3633_v47 = vpop.eup %3632  ;;  %v5035_v9 = vadd.f32 %v400_v19, %v4054_v26  ;;  %v569_v32 = vpop.f32.mrf.mxu1  ;;  %v1726_v4 = vmul.f32 %v1598_v24, %v702_v29  ;;  %v1218_v52 = vadd.f32 %v1090_v22, %v5002_v45  ;;  %v1089_v29 = vmul.f32 %v961_v2, %v4987_v49 }
 0x1f2   :  { %v2909_v38 = vadd.f32 %v2845_v46, %v2589_v15  ;;  %v5040_v48 = vadd.f32 %v4764_v60, %v2263_v8  ;;  %v5043_v23 = vadd.f32 %v569_v32, %v4059_v28  ;;  %v1597_v5 = vadd.f32 1.0, %v3633_v47 }
 0x1f3   :  { %v3635_v40 = vpop.eup %3634  ;;  %v836_v62 = vmul.f32 0.044715, %v5035_v9  ;;  %v1878_v0 = vpack.c.bf16 %v1726_v4, %v1724_v43  ;;  %439 = vmatmul.bf16.gmra.mxu0 %v181_v21  ;;  %v1346_v1 = vmul.f32 0.7978846, %v1218_v52  ;;  %v2653_v61 = vmul.f32 0.5, %v2589_v15 }
 0x1f4   :  { %v3100_v13 = vadd.f32 1.0, %v3635_v40  ;;  %v2973_v54 = vmul.f32 0.7978846, %v2909_v38  ;;  %v2718_v50 = vmul.f32 0.044715, %v5040_v48  ;;  %608 = vmatmul.bf16.gmra.mxu1 %v181_v21  ;;  %v3637_v31 = vpop.eup %3636  ;;  %v704_v34 = vmul.f32 0.5, %v4978_v53 }
 0x1f5   :  { %2135 = vmatmul.bf16.gmra.mxu2 %v1878_v0  ;;  %3640 = vtanh.f32 %v1346_v1  ;;  %v5050_v35 = vmul.f32 0.5, %v4987_v49  ;;  %v1599_v6 = vadd.f32 1.0, %v3637_v31  ;;  %v964_v36 = vmul.f32 %v836_v62, %v5035_v9 }
 0x1f6   :  { %v3164_v58 = vmul.f32 %v3100_v13, %v2652_v14  ;;  %3642 = vtanh.f32 %v2973_v54  ;;  %v2782_v17 = vmul.f32 %v2718_v50, %v5040_v48  ;;  %v3639_v37 = vpop.eup %3638  ;;  %v2096_v11 = vpop.f32.mrf.mxu2  ;;  %v706_v42 = vmul.f32 0.5, %v5002_v45 }
 0x1f7   :  { %v1091_v15 = vmul.f32 %v963_v3, %v5007_v12  ;;  %v1217_v16 = vadd.f32 %v1089_v29, %v4987_v49  ;;  %v837_v25 = vmul.f32 0.044715, %v5043_v23  ;;  %v1725_v56 = vmul.f32 %v1597_v5, %v5010_v10  ;;  %v2265_v2 = vpop.f32.mrf.mxu3  ;;  %v148_v10 = vld [vmem:[%s5753_s0 + $0x1e0] sm:$0xff] }
 0x1f8   :  { %3228 = vst [vmem:[%s5757_s5 + $0x98] sm:$0xff] %v3164_v58  ;;  %v2846_v53 = vmul.f32 %v2782_v17, %v5040_v48  ;;  %v1727_v39 = vmul.f32 %v1599_v6, %v5022_v55  ;;  %v402_v44 = vpop.f32.mrf.mxu0  ;;  %v2266_v63 = vadd.f32 %v2265_v2, %v2096_v11  ;;  %v1600_v18 = vadd.f32 1.0, %v3639_v37  ;;  %v149_v55 = vld [vmem:[%s5753_s0 + $0x1e8] sm:$0xff] }
 0x1f9   :  { %v403_v45 = vadd.f32 %v402_v44, %v4054_v26  ;;  %v571_v33 = vpop.f32.mrf.mxu1  ;;  %v1219_v49 = vadd.f32 %v1091_v15, %v5007_v12  ;;  %v1345_v21 = vmul.f32 0.7978846, %v1217_v16  ;;  %v965_v27 = vmul.f32 %v837_v25, %v5043_v23 }
 0x1fa   :  { %v2910_v30 = vadd.f32 %v2846_v53, %v5040_v48  ;;  %v1879_v57 = vpack.c.bf16 %v1727_v39, %v1725_v56  ;;  %v5068_v7 = vadd.f32 %v571_v33, %v4059_v28  ;;  %v2591_v51 = vadd.f32 %v4764_v60, %v2266_v63 }
 0x1fb   :  { %v3641_v41 = vpop.eup %3640  ;;  %v838_v59 = vmul.f32 0.044715, %v403_v45  ;;  %v1347_v20 = vmul.f32 0.7978846, %v1219_v49  ;;  %3644 = vtanh.f32 %v1345_v21  ;;  %v182_v47 = vpack.c.bf16 %v149_v55, %v148_v10 }
 0x1fc   :  { %v3643_v24 = vpop.eup %3642  ;;  %v2974_v22 = vmul.f32 0.7978846, %v2910_v30  ;;  %2304 = vmatmul.bf16.gmra.mxu3 %v1879_v57  ;;  %v839_v14 = vmul.f32 0.044715, %v5068_v7  ;;  %v1602_v46 = vadd.f32 1.0, %v3641_v41  ;;  %v1728_v32 = vmul.f32 %v1600_v18, %v704_v34 }
 0x1fd   :  { %v3101_v8 = vadd.f32 1.0, %v3643_v24  ;;  %v2719_v19 = vmul.f32 0.044715, %v2591_v51  ;;  %v966_v43 = vmul.f32 %v838_v59, %v403_v45  ;;  %v1092_v52 = vmul.f32 %v964_v36, %v5035_v9 }
 0x1fe   :  { %3646 = vtanh.f32 %v2974_v22  ;;  %v1730_v4 = vmul.f32 %v1602_v46, %v706_v42  ;;  %v2098_v40 = vpop.f32.mrf.mxu2  ;;  %v967_v0 = vmul.f32 %v839_v14, %v5068_v7  ;;  %v707_v54 = vmul.f32 0.5, %v5007_v12 }
 0x1ff   :  { %v3165_v38 = vmul.f32 %v3101_v8, %v2653_v61  ;;  %v2783_v3 = vmul.f32 %v2719_v19, %v2591_v51  ;;  %3648 = vtanh.f32 %v1347_v20  ;;  %v1094_v62 = vmul.f32 %v966_v43, %v403_v45  ;;  %v2267_v1 = vpop.f32.mrf.mxu3 }
 0x200   :  { %v405_v29 = vpop.f32.mrf.mxu0  ;;  %v1880_v13 = vpack.c.bf16 %v1730_v4, %v1728_v32  ;;  %v1220_v50 = vadd.f32 %v1092_v52, %v5035_v9  ;;  %v2268_v61 = vadd.f32 %v2267_v1, %v2098_v40  ;;  %v2654_v6 = vmul.f32 0.5, %v5040_v48  ;;  %v150_v4 = vld [vmem:[%s5753_s0 + $0x1f0] sm:$0xff]  ;;  %v151_v52 = vld [vmem:[%s5753_s0 + $0x1f8] sm:$0xff]  ;;  %v5134_v40 = vld [vmem:[%s5756_s4] ss:$0 sm:$0xff] }
 0x201   :  { %v3645_v5 = vpop.eup %3644  ;;  %3229 = vst [vmem:[%s5757_s5 + $0xa0] sm:$0xff] %v3165_v38  ;;  %v2847_v31 = vmul.f32 %v2783_v3, %v2591_v51  ;;  %v5087_v34 = vadd.f32 %v405_v29, %v4054_v26  ;;  %v574_v58 = vpop.f32.mrf.mxu1  ;;  %v1222_v17 = vadd.f32 %v1094_v62, %v403_v45  ;;  %v5091_v37 = vmul.f32 0.5, %v5035_v9 }
 0x202   :  { %v1348_v12 = vmul.f32 0.7978846, %v1220_v50  ;;  %v1093_v36 = vmul.f32 %v965_v27, %v5043_v23  ;;  %v5095_v42 = vadd.f32 %v4764_v60, %v2268_v61  ;;  %v1601_v25 = vadd.f32 1.0, %v3645_v5 }
 0x203   :  { %v2911_v11 = vadd.f32 %v2847_v31, %v2591_v51  ;;  %v840_v15 = vmul.f32 0.044715, %v5087_v34  ;;  %444 = vmatmul.bf16.gmra.mxu0 %v182_v47  ;;  %v1350_v16 = vmul.f32 0.7978846, %v1222_v17  ;;  %v710_v56 = vmul.f32 0.5, %v403_v45 }
 0x204   :  { %v3647_v53 = vpop.eup %3646  ;;  %613 = vmatmul.bf16.gmra.mxu1 %v182_v47  ;;  %3650 = vtanh.f32 %v1348_v12  ;;  %v1095_v48 = vmul.f32 %v967_v0, %v5068_v7  ;;  %v2655_v2 = vmul.f32 0.5, %v2591_v51  ;;  %v2720_v63 = vmul.f32 0.044715, %v5095_v42 }
 0x205   :  { %v3649_v9 = vpop.eup %3648  ;;  %v3102_v39 = vadd.f32 1.0, %v3647_v53  ;;  %v2975_v44 = vmul.f32 0.7978846, %v2911_v11  ;;  %2140 = vmatmul.bf16.gmra.mxu2 %v1880_v13  ;;  %v968_v60 = vmul.f32 %v840_v15, %v5087_v34  ;;  %3652 = vtanh.f32 %v1350_v16 }
 0x206   :  { %v1603_v33 = vadd.f32 1.0, %v3649_v9  ;;  %v5102_v49 = vmul.f32 0.5, %v5043_v23  ;;  %v2784_v45 = vmul.f32 %v2720_v63, %v5095_v42  ;;  %v2101_v30 = vpop.f32.mrf.mxu2  ;;  %v1221_v57 = vadd.f32 %v1093_v36, %v5043_v23 }
 0x207   :  { %v3166_v21 = vmul.f32 %v3102_v39, %v2654_v6  ;;  %3654 = vtanh.f32 %v2975_v44  ;;  %v5107_v18 = vadd.f32 %v574_v58, %v4059_v28  ;;  %v1729_v10 = vmul.f32 %v1601_v25, %v5050_v35 }
 0x208   :  { %v1731_v55 = vmul.f32 %v1603_v33, %v707_v54  ;;  %v407_v41 = vpop.f32.mrf.mxu0  ;;  %v1223_v51 = vadd.f32 %v1095_v48, %v5068_v7  ;;  %v2848_v59 = vmul.f32 %v2784_v45, %v5095_v42  ;;  %v1349_v22 = vmul.f32 0.7978846, %v1221_v57 }
 0x209   :  { %3230 = vst [vmem:[%s5757_s5 + $0xa8] sm:$0xff] %v3166_v21  ;;  %v2270_v20 = vpop.f32.mrf.mxu3  ;;  %v5116_v24 = vadd.f32 %v407_v41, %v4054_v26  ;;  %v576_v23 = vpop.f32.mrf.mxu1  ;;  %v1096_v27 = vmul.f32 %v968_v60, %v5087_v34  ;;  %v841_v3 = vmul.f32 0.044715, %v5107_v18  ;;  %v711_v50 = vmul.f32 0.5, %v5068_v7 }
 0x20a   :  { %v3651_v14 = vpop.eup %3650  ;;  %v1881_v35 = vpack.c.bf16 %v1731_v55, %v1729_v10  ;;  %v2271_v46 = vadd.f32 %v2270_v20, %v2101_v30  ;;  %v5120_v8 = vadd.f32 %v576_v23, %v4059_v28  ;;  %v1351_v19 = vmul.f32 0.7978846, %v1223_v51 }
 0x20b   :  { %v2912_v43 = vadd.f32 %v2848_v59, %v5095_v42  ;;  %v842_v47 = vmul.f32 0.044715, %v5116_v24  ;;  %v1604_v32 = vadd.f32 1.0, %v3651_v14  ;;  %3656 = vtanh.f32 %v1349_v22  ;;  %v3653_v38 = vpop.eup %3652 }
 0x20c   :  { %2309 = vmatmul.bf16.gmra.mxu3 %v1881_v35  ;;  %v5137_v62 = vadd.f32 %v5134_v40, %v2271_v46  ;;  %v843_v0 = vmul.f32 0.044715, %v5120_v8  ;;  %3658 = vtanh.f32 %v1351_v19  ;;  %v1606_v54 = vadd.f32 1.0, %v3653_v38 }
 0x20d   :  { %v3655_v1 = vpop.eup %3654  ;;  %v2976_v29 = vmul.f32 0.7978846, %v2912_v43  ;;  %v970_v13 = vmul.f32 %v842_v47, %v5116_v24  ;;  %v1732_v61 = vmul.f32 %v1604_v32, %v5091_v37  ;;  %v183_v58 = vpack.c.bf16 %v151_v52, %v150_v4 }
 0x20e   :  { %v3103_v5 = vadd.f32 1.0, %v3655_v1  ;;  %v2721_v31 = vmul.f32 0.044715, %v5137_v62  ;;  %v2103_v17 = vpop.f32.mrf.mxu2  ;;  %v1734_v6 = vmul.f32 %v1606_v54, %v710_v56  ;;  %v1224_v36 = vadd.f32 %v1096_v27, %v5087_v34 }
 0x20f   :  { %3660 = vtanh.f32 %v2976_v29  ;;  %v1098_v12 = vmul.f32 %v970_v13, %v5116_v24  ;;  %v969_v15 = vmul.f32 %v841_v3, %v5107_v18  ;;  %v971_v7 = vmul.f32 %v843_v0, %v5120_v8 }
 0x210   :  { %v3167_v11 = vmul.f32 %v3103_v5, %v2655_v2  ;;  %v2785_v16 = vmul.f32 %v2721_v31, %v5137_v62  ;;  %v410_v53 = vpop.f32.mrf.mxu0  ;;  %v1882_v39 = vpack.c.bf16 %v1734_v6, %v1732_v61  ;;  %v1352_v44 = vmul.f32 0.7978846, %v1224_v36 }
 0x211   :  { %v3657_v25 = vpop.eup %3656  ;;  %v2272_v48 = vpop.f32.mrf.mxu3  ;;  %v5150_v37 = vadd.f32 %v410_v53, %v4054_v26  ;;  %v1226_v56 = vadd.f32 %v1098_v12, %v5116_v24  ;;  %v2656_v10 = vmul.f32 0.5, %v5095_v42  ;;  %v712_v51 = vmul.f32 0.5, %v5087_v34 }
 0x212   :  { %v579_v9 = vpop.f32.mrf.mxu1  ;;  %v3659_v63 = vpop.eup %3658  ;;  %3231 = vst [vmem:[%s5757_s5 + $0xb0] sm:$0xff] %v3167_v11  ;;  %v2849_v2 = vmul.f32 %v2785_v16, %v5137_v62  ;;  %v2273_v60 = vadd.f32 %v2272_v48, %v2103_v17  ;;  %v1605_v21 = vadd.f32 1.0, %v3657_v25  ;;  %3662 = vtanh.f32 %v1352_v44 }
 0x213   :  { %v5158_v33 = vadd.f32 %v579_v9, %v4059_v28  ;;  %v844_v45 = vmul.f32 0.044715, %v5150_v37  ;;  %v1607_v30 = vadd.f32 1.0, %v3659_v63  ;;  %449 = vmatmul.bf16.gmra.mxu0 %v183_v58  ;;  %v1354_v57 = vmul.f32 0.7978846, %v1226_v56 }
 0x214   :  { %v2913_v55 = vadd.f32 %v2849_v2, %v5137_v62  ;;  %v5164_v41 = vadd.f32 %v5134_v40, %v2273_v60  ;;  %618 = vmatmul.bf16.gmra.mxu1 %v183_v58  ;;  %v1097_v22 = vmul.f32 %v969_v15, %v5107_v18  ;;  %v1733_v35 = vmul.f32 %v1605_v21, %v5102_v49 }
 0x215   :  { %v3661_v59 = vpop.eup %3660  ;;  %v972_v20 = vmul.f32 %v844_v45, %v5150_v37  ;;  %2145 = vmatmul.bf16.gmra.mxu2 %v1882_v39  ;;  %v1735_v23 = vmul.f32 %v1607_v30, %v711_v50  ;;  %3664 = vtanh.f32 %v1354_v57  ;;  %v845_v46 = vmul.f32 0.044715, %v5158_v33 }
 0x216   :  { %v3104_v27 = vadd.f32 1.0, %v3661_v59  ;;  %v2977_v14 = vmul.f32 0.7978846, %v2913_v55  ;;  %v2722_v42 = vmul.f32 0.044715, %v5164_v41  ;;  %v714_v43 = vmul.f32 0.5, %v5116_v24 }
 0x217   :  { %v2106_v19 = vpop.f32.mrf.mxu2  ;;  %v1099_v34 = vmul.f32 %v971_v7, %v5120_v8  ;;  %v1225_v47 = vadd.f32 %v1097_v22, %v5107_v18  ;;  %v1883_v52 = vpack.c.bf16 %v1735_v23, %v1733_v35  ;;  %v1100_v24 = vmul.f32 %v972_v20, %v5150_v37 }
 0x218   :  { %v3168_v32 = vmul.f32 %v3104_v27, %v2656_v10  ;;  %3666 = vtanh.f32 %v2977_v14  ;;  %v2786_v4 = vmul.f32 %v2722_v42, %v5164_v41  ;;  %v412_v38 = vpop.f32.mrf.mxu0  ;;  %v3663_v3 = vpop.eup %3662  ;;  %v2657_v58 = vmul.f32 0.5, %v5137_v62 }
 0x219   :  { %v2275_v0 = vpop.f32.mrf.mxu3  ;;  %v5177_v1 = vadd.f32 %v412_v38, %v4054_v26  ;;  %v1227_v29 = vadd.f32 %v1099_v34, %v5120_v8  ;;  %v1353_v13 = vmul.f32 0.7978846, %v1225_v47  ;;  %v1608_v31 = vadd.f32 1.0, %v3663_v3 }
 0x21a   :  { %v581_v49 = vpop.f32.mrf.mxu1  ;;  %3232 = vst [vmem:[%s5757_s5 + $0xb8] sm:$0xff] %v3168_v32  ;;  %v2850_v54 = vmul.f32 %v2786_v4, %v5164_v41  ;;  %v2276_v50 = vadd.f32 %v2275_v0, %v2106_v19  ;;  %v713_v7 = vmul.f32 0.5, %v5107_v18  ;;  %v1228_v62 = vadd.f32 %v1100_v24, %v5150_v37 }
 0x21b   :  { %v5186_v5 = vadd.f32 %v581_v49, %v4059_v28  ;;  %v3665_v61 = vpop.eup %3664  ;;  %v846_v17 = vmul.f32 0.044715, %v5177_v1  ;;  %v1355_v6 = vmul.f32 0.7978846, %v1227_v29  ;;  %3668 = vtanh.f32 %v1353_v13 }
 0x21c   :  { %v2914_v12 = vadd.f32 %v2850_v54, %v5164_v41  ;;  %2314 = vmatmul.bf16.gmra.mxu3 %v1883_v52  ;;  %v5192_v36 = vadd.f32 %v5134_v40, %v2276_v50  ;;  %v1610_v15 = vadd.f32 1.0, %v3665_v61  ;;  %v973_v48 = vmul.f32 %v845_v46, %v5158_v33 }
 0x21d   :  { %v847_v11 = vmul.f32 0.044715, %v5186_v5  ;;  %v974_v16 = vmul.f32 %v846_v17, %v5177_v1  ;;  %3670 = vtanh.f32 %v1355_v6  ;;  %v1736_v39 = vmul.f32 %v1608_v31, %v712_v51 }
 0x21e   :  { %v3667_v53 = vpop.eup %3666  ;;  %v2978_v25 = vmul.f32 0.7978846, %v2914_v12  ;;  %v2723_v9 = vmul.f32 0.044715, %v5192_v36  ;;  %v1738_v63 = vmul.f32 %v1610_v15, %v714_v43  ;;  %v1356_v60 = vmul.f32 0.7978846, %v1228_v62 }
 0x21f   :  { %v3105_v56 = vadd.f32 1.0, %v3667_v53  ;;  %v2108_v44 = vpop.f32.mrf.mxu2  ;;  %v1102_v2 = vmul.f32 %v974_v16, %v5177_v1  ;;  %v975_v18 = vmul.f32 %v847_v11, %v5186_v5  ;;  %v715_v30 = vmul.f32 0.5, %v5120_v8 }
 0x220   :  { %3672 = vtanh.f32 %v2978_v25  ;;  %v2787_v21 = vmul.f32 %v2723_v9, %v5192_v36  ;;  %v415_v45 = vpop.f32.mrf.mxu0  ;;  %v1884_v20 = vpack.c.bf16 %v1738_v63, %v1736_v39  ;;  %v2658_v22 = vmul.f32 0.5, %v5164_v41 }
 0x221   :  { %v3669_v57 = vpop.eup %3668  ;;  %v3169_v10 = vmul.f32 %v3105_v56, %v2657_v58  ;;  %v2277_v55 = vpop.f32.mrf.mxu3  ;;  %v5205_v59 = vadd.f32 %v415_v45, %v4054_v26  ;;  %v1230_v23 = vadd.f32 %v1102_v2, %v5177_v1  ;;  %3674 = vtanh.f32 %v1356_v60 }
 0x222   :  { %v584_v51 = vpop.f32.mrf.mxu1  ;;  %v2851_v27 = vmul.f32 %v2787_v21, %v5192_v36  ;;  %v2278_v14 = vadd.f32 %v2277_v55, %v2108_v44  ;;  %v1609_v42 = vadd.f32 1.0, %v3669_v57  ;;  %v1101_v19 = vmul.f32 %v973_v48, %v5158_v33 }
 0x223   :  { %v3671_v35 = vpop.eup %3670  ;;  %3233 = vst [vmem:[%s5757_s5 + $0xc0] sm:$0xff] %v3169_v10  ;;  %v848_v8 = vmul.f32 0.044715, %v5205_v59  ;;  %v1358_v46 = vmul.f32 0.7978846, %v1230_v23  ;;  %v5220_v41 = vadd.f32 %v584_v51, %v4059_v28  ;;  %v716_v4 = vmul.f32 0.5, %v5150_v37 }
 0x224   :  { %v2915_v43 = vadd.f32 %v2851_v27, %v5192_v36  ;;  %v5217_v34 = vadd.f32 %v5134_v40, %v2278_v14  ;;  %v1611_v47 = vadd.f32 1.0, %v3671_v35  ;;  %v1103_v52 = vmul.f32 %v975_v18, %v5186_v5 }
 0x225   :  { %v976_v32 = vmul.f32 %v848_v8, %v5205_v59  ;;  %2150 = vmatmul.bf16.gmra.mxu2 %v1884_v20  ;;  %3676 = vtanh.f32 %v1358_v46  ;;  %v1737_v49 = vmul.f32 %v1609_v42, %v713_v7  ;;  %v718_v29 = vmul.f32 0.5, %v5177_v1 }
 0x226   :  { %v3673_v38 = vpop.eup %3672  ;;  %v2979_v3 = vmul.f32 0.7978846, %v2915_v43  ;;  %v2724_v0 = vmul.f32 0.044715, %v5217_v34  ;;  %v1739_v24 = vmul.f32 %v1611_v47, %v715_v30  ;;  %v1229_v50 = vadd.f32 %v1101_v19, %v5158_v33 }
 0x227   :  { %v3106_v13 = vadd.f32 1.0, %v3673_v38  ;;  %v2111_v54 = vpop.f32.mrf.mxu2  ;;  %v1231_v31 = vadd.f32 %v1103_v52, %v5186_v5  ;;  %v849_v61 = vmul.f32 0.044715, %v5220_v41  ;;  %v1104_v17 = vmul.f32 %v976_v32, %v5205_v59  ;;  %v3675_v6 = vpop.eup %3674 }
 0x228   :  { %3678 = vtanh.f32 %v2979_v3  ;;  %v2788_v37 = vmul.f32 %v2724_v0, %v5217_v34  ;;  %v417_v58 = vpop.f32.mrf.mxu0  ;;  %v1885_v11 = vpack.c.bf16 %v1739_v24, %v1737_v49  ;;  %v1357_v7 = vmul.f32 0.7978846, %v1229_v50 }
 0x229   :  { %v3170_v12 = vmul.f32 %v3106_v13, %v2658_v22  ;;  %v2280_v15 = vpop.f32.mrf.mxu3  ;;  %v5233_v1 = vadd.f32 %v417_v58, %v4054_v26  ;;  %v1612_v48 = vadd.f32 1.0, %v3675_v6  ;;  %v2659_v39 = vmul.f32 0.5, %v5192_v36 }
 0x22a   :  { %v586_v16 = vpop.f32.mrf.mxu1  ;;  %v2852_v62 = vmul.f32 %v2788_v37, %v5217_v34  ;;  %v2281_v53 = vadd.f32 %v2280_v15, %v2111_v54  ;;  %v1359_v44 = vmul.f32 0.7978846, %v1231_v31  ;;  %3680 = vtanh.f32 %v1357_v7 }
 0x22b   :  { %v5237_v25 = vadd.f32 %v586_v16, %v4059_v28  ;;  %v3677_v9 = vpop.eup %3676  ;;  %3234 = vst [vmem:[%s5757_s5 + $0xc8] sm:$0xff] %v3170_v12  ;;  %v850_v56 = vmul.f32 0.044715, %v5233_v1  ;;  %v717_v45 = vmul.f32 0.5, %v5158_v33  ;;  %v1232_v36 = vadd.f32 %v1104_v17, %v5205_v59 }
 0x22c   :  { %v2916_v63 = vadd.f32 %v2852_v62, %v5217_v34  ;;  %2319 = vmatmul.bf16.gmra.mxu3 %v1885_v11  ;;  %v5246_v2 = vadd.f32 %v5134_v40, %v2281_v53  ;;  %v1614_v21 = vadd.f32 1.0, %v3677_v9  ;;  %3682 = vtanh.f32 %v1359_v44 }
 0x22d   :  { %v851_v60 = vmul.f32 0.044715, %v5237_v25  ;;  %v978_v18 = vmul.f32 %v850_v56, %v5233_v1  ;;  %v977_v10 = vmul.f32 %v849_v61, %v5220_v41  ;;  %v1740_v51 = vmul.f32 %v1612_v48, %v716_v4 }
 0x22e   :  { %v3679_v30 = vpop.eup %3678  ;;  %v2980_v57 = vmul.f32 0.7978846, %v2916_v63  ;;  %v2725_v55 = vmul.f32 0.044715, %v5246_v2  ;;  %v1742_v22 = vmul.f32 %v1614_v21, %v718_v29  ;;  %v1360_v14 = vmul.f32 0.7978846, %v1232_v36 }
 0x22f   :  { %v3107_v20 = vadd.f32 1.0, %v3679_v30  ;;  %v2113_v23 = vpop.f32.mrf.mxu2  ;;  %v1106_v27 = vmul.f32 %v978_v18, %v5233_v1  ;;  %v979_v33 = vmul.f32 %v851_v60, %v5237_v25  ;;  %v719_v8 = vmul.f32 0.5, %v5186_v5 }
 0x230   :  { %3684 = vtanh.f32 %v2980_v57  ;;  %v2789_v42 = vmul.f32 %v2725_v55, %v5246_v2  ;;  %v420_v35 = vpop.f32.mrf.mxu0  ;;  %v3681_v46 = vpop.eup %3680  ;;  %v1886_v4 = vpack.c.bf16 %v1742_v22, %v1740_v51  ;;  %v2660_v38 = vmul.f32 0.5, %v5217_v34 }
 0x231   :  { %v3171_v19 = vmul.f32 %v3107_v20, %v2659_v39  ;;  %v2282_v43 = vpop.f32.mrf.mxu3  ;;  %v5259_v47 = vadd.f32 %v420_v35, %v4054_v26  ;;  %v1234_v52 = vadd.f32 %v1106_v27, %v5233_v1  ;;  %v1613_v49 = vadd.f32 1.0, %v3681_v46 }
 0x232   :  { %v589_v32 = vpop.f32.mrf.mxu1  ;;  %v2853_v3 = vmul.f32 %v2789_v42, %v5246_v2  ;;  %v2283_v0 = vadd.f32 %v2282_v43, %v2113_v23  ;;  %v3683_v29 = vpop.eup %3682  ;;  %3686 = vtanh.f32 %v1360_v14  ;;  %v1105_v24 = vmul.f32 %v977_v10, %v5220_v41 }
 0x233   :  { %3235 = vst [vmem:[%s5757_s5 + $0xd0] sm:$0xff] %v3171_v19  ;;  %v852_v5 = vmul.f32 0.044715, %v5259_v47  ;;  %v1362_v13 = vmul.f32 0.7978846, %v1234_v52  ;;  %v5274_v34 = vadd.f32 %v589_v32, %v4059_v28  ;;  %v1615_v31 = vadd.f32 1.0, %v3683_v29 }
 0x234   :  { %v2917_v54 = vadd.f32 %v2853_v3, %v5246_v2  ;;  %v5271_v50 = vadd.f32 %v5134_v40, %v2283_v0  ;;  %v720_v61 = vmul.f32 0.5, %v5205_v59  ;;  %v1107_v58 = vmul.f32 %v979_v33, %v5237_v25 }
 0x235   :  { %v980_v37 = vmul.f32 %v852_v5, %v5259_v47  ;;  %2155 = vmatmul.bf16.gmra.mxu2 %v1886_v4  ;;  %3688 = vtanh.f32 %v1362_v13  ;;  %v1741_v11 = vmul.f32 %v1613_v49, %v717_v45  ;;  %v722_v15 = vmul.f32 0.5, %v5233_v1 }
 0x236   :  { %v3685_v17 = vpop.eup %3684  ;;  %v2981_v6 = vmul.f32 0.7978846, %v2917_v54  ;;  %v2726_v12 = vmul.f32 0.044715, %v5271_v50  ;;  %v1743_v7 = vmul.f32 %v1615_v31, %v719_v8  ;;  %v1233_v53 = vadd.f32 %v1105_v24, %v5220_v41 }
 0x237   :  { %v3108_v16 = vadd.f32 1.0, %v3685_v17  ;;  %v2116_v62 = vpop.f32.mrf.mxu2  ;;  %v1235_v48 = vadd.f32 %v1107_v58, %v5237_v25  ;;  %v853_v9 = vmul.f32 0.044715, %v5274_v34  ;;  %v1108_v56 = vmul.f32 %v980_v37, %v5259_v47 }
 0x238   :  { %3690 = vtanh.f32 %v2981_v6  ;;  %v2790_v59 = vmul.f32 %v2726_v12, %v5271_v50  ;;  %v422_v39 = vpop.f32.mrf.mxu0  ;;  %v3687_v44 = vpop.eup %3686  ;;  %v1887_v60 = vpack.c.bf16 %v1743_v7, %v1741_v11  ;;  %v1361_v18 = vmul.f32 0.7978846, %v1233_v53 }
 0x239   :  { %v3172_v63 = vmul.f32 %v3108_v16, %v2660_v38  ;;  %v5287_v1 = vadd.f32 %v422_v39, %v4054_v26  ;;  %v1616_v30 = vadd.f32 1.0, %v3687_v44  ;;  %v1363_v57 = vmul.f32 0.7978846, %v1235_v48 }
 0x23a   :  { %v591_v21 = vpop.f32.mrf.mxu1  ;;  %v2854_v45 = vmul.f32 %v2790_v59, %v5271_v50  ;;  %v2661_v55 = vmul.f32 0.5, %v5246_v2  ;;  %3692 = vtanh.f32 %v1361_v18  ;;  %v1236_v23 = vadd.f32 %v1108_v56, %v5259_v47 }
 0x23b   :  { %v5291_v36 = vadd.f32 %v591_v21, %v4059_v28  ;;  %v3689_v10 = vpop.eup %3688  ;;  %3236 = vst [vmem:[%s5757_s5 + $0xd8] sm:$0xff] %v3172_v63  ;;  %v2285_v51 = vpop.f32.mrf.mxu3  ;;  %v854_v20 = vmul.f32 0.044715, %v5287_v1  ;;  %v981_v33 = vmul.f32 %v853_v9, %v5274_v34  ;;  %3694 = vtanh.f32 %v1363_v57 }
 0x23c   :  { %v2918_v22 = vadd.f32 %v2854_v45, %v5271_v50  ;;  %2324 = vmatmul.bf16.gmra.mxu3 %v1887_v60  ;;  %v2286_v27 = vadd.f32 %v2285_v51, %v2116_v62  ;;  %v1618_v42 = vadd.f32 1.0, %v3689_v10  ;;  %v1364_v8 = vmul.f32 0.7978846, %v1236_v23 }
 0x23d   :  { %v855_v14 = vmul.f32 0.044715, %v5291_v36  ;;  %v982_v35 = vmul.f32 %v854_v20, %v5287_v1  ;;  %v1744_v43 = vmul.f32 %v1616_v30, %v720_v61  ;;  %v721_v29 = vmul.f32 0.5, %v5220_v41 }
 0x23e   :  { %v3691_v2 = vpop.eup %3690  ;;  %v2982_v46 = vmul.f32 0.7978846, %v2918_v22  ;;  %v5304_v19 = vadd.f32 %v5134_v40, %v2286_v27  ;;  %v1746_v32 = vmul.f32 %v1618_v42, %v722_v15  ;;  %3696 = vtanh.f32 %v1364_v8 }
 0x23f   :  { %v3109_v4 = vadd.f32 1.0, %v3691_v2  ;;  %v983_v52 = vmul.f32 %v855_v14, %v5291_v36  ;;  %v2118_v38 = vpop.f32.mrf.mxu2  ;;  %v1110_v3 = vmul.f32 %v982_v35, %v5287_v1  ;;  %v1109_v6 = vmul.f32 %v981_v33, %v5274_v34 }
 0x240   :  { %3698 = vtanh.f32 %v2982_v46  ;;  %v2727_v0 = vmul.f32 0.044715, %v5304_v19  ;;  %v425_v49 = vpop.f32.mrf.mxu0  ;;  %v3693_v5 = vpop.eup %3692  ;;  %v1888_v31 = vpack.c.bf16 %v1746_v32, %v1744_v43  ;;  %v723_v15 = vmul.f32 0.5, %v5237_v25 }
 0x241   :  { %v3173_v13 = vmul.f32 %v3109_v4, %v2661_v55  ;;  %v5311_v24 = vadd.f32 %v425_v49, %v4054_v26  ;;  %v1238_v37 = vadd.f32 %v1110_v3, %v5287_v1  ;;  %v1617_v17 = vadd.f32 1.0, %v3693_v5  ;;  %v3695_v12 = vpop.eup %3694 }
 0x242   :  { %v594_v54 = vpop.f32.mrf.mxu1  ;;  %v2791_v61 = vmul.f32 %v2727_v0, %v5304_v19  ;;  %v1111_v7 = vmul.f32 %v983_v52, %v5291_v36  ;;  %v1619_v59 = vadd.f32 1.0, %v3695_v12  ;;  %v1237_v56 = vadd.f32 %v1109_v6, %v5274_v34 }
 0x243   :  { %v5316_v58 = vadd.f32 %v594_v54, %v4059_v28  ;;  %3237 = vst [vmem:[%s5757_s5 + $0xe0] sm:$0xff] %v3173_v13  ;;  %v2287_v41 = vpop.f32.mrf.mxu3  ;;  %v856_v11 = vmul.f32 0.044715, %v5311_v24  ;;  %v1366_v16 = vmul.f32 0.7978846, %v1238_v37  ;;  %v1745_v60 = vmul.f32 %v1617_v17, %v721_v29 }
 0x244   :  { %v2855_v62 = vmul.f32 %v2791_v61, %v5304_v19  ;;  %v2288_v53 = vadd.f32 %v2287_v41, %v2118_v38  ;;  %v3697_v9 = vpop.eup %3696  ;;  %v1747_v21 = vmul.f32 %v1619_v59, %v723_v15  ;;  %v2662_v18 = vmul.f32 0.5, %v5271_v50 }
 0x245   :  { %v857_v48 = vmul.f32 0.044715, %v5316_v58  ;;  %v984_v39 = vmul.f32 %v856_v11, %v5311_v24  ;;  %2160 = vmatmul.bf16.gmra.mxu2 %v1888_v31  ;;  %3700 = vtanh.f32 %v1366_v16  ;;  %v1239_v30 = vadd.f32 %v1111_v7, %v5291_v36 }
 0x246   :  { %v3699_v44 = vpop.eup %3698  ;;  %v2919_v63 = vadd.f32 %v2855_v62, %v5304_v19  ;;  %v5331_v25 = vadd.f32 %v5134_v40, %v2288_v53  ;;  %v1365_v57 = vmul.f32 0.7978846, %v1237_v56  ;;  %v1889_v20 = vpack.c.bf16 %v1747_v21, %v1745_v60 }
 0x247   :  { %v3110_v45 = vadd.f32 1.0, %v3699_v44  ;;  %v985_v51 = vmul.f32 %v857_v48, %v5316_v58  ;;  %v2121_v23 = vpop.f32.mrf.mxu2  ;;  %v1620_v33 = vadd.f32 1.0, %v3697_v9  ;;  %v1367_v35 = vmul.f32 0.7978846, %v1239_v30 }
 0x248   :  { %v2983_v10 = vmul.f32 0.7978846, %v2919_v63  ;;  %v2728_v55 = vmul.f32 0.044715, %v5331_v25  ;;  %v427_v22 = vpop.f32.mrf.mxu0  ;;  %v1112_v2 = vmul.f32 %v984_v39, %v5311_v24  ;;  %v724_v32 = vmul.f32 0.5, %v5259_v47 }
 0x249   :  { %v3174_v27 = vmul.f32 %v3110_v45, %v2662_v18  ;;  %v5338_v14 = vadd.f32 %v427_v22, %v4054_v26  ;;  %v726_v4 = vmul.f32 0.5, %v5287_v1  ;;  %v1113_v31 = vmul.f32 %v985_v51, %v5316_v58 }
 0x24a   :  { %v596_v42 = vpop.f32.mrf.mxu1  ;;  %3702 = vtanh.f32 %v2983_v10  ;;  %v2792_v50 = vmul.f32 %v2728_v55, %v5331_v25  ;;  %v1748_v5 = vmul.f32 %v1620_v33, %v724_v32  ;;  %v1240_v13 = vadd.f32 %v1112_v2, %v5311_v24 }
 0x24b   :  { %v5342_v8 = vadd.f32 %v596_v42, %v4059_v28  ;;  %v3701_v46 = vpop.eup %3700  ;;  %3238 = vst [vmem:[%s5757_s5 + $0xe8] sm:$0xff] %v3174_v27  ;;  %v858_v43 = vmul.f32 0.044715, %v5338_v14  ;;  %3704 = vtanh.f32 %v1365_v57  ;;  %v2290_v38 = vpop.f32.mrf.mxu3  ;;  %v2663_v37 = vmul.f32 0.5, %v5304_v19 }
 0x24c   :  { %v2856_v52 = vmul.f32 %v2792_v50, %v5331_v25  ;;  %2329 = vmatmul.bf16.gmra.mxu3 %v1889_v20  ;;  %v1622_v0 = vadd.f32 1.0, %v3701_v46  ;;  %3706 = vtanh.f32 %v1367_v35  ;;  %v2291_v49 = vadd.f32 %v2290_v38, %v2121_v23 }
 0x24d   :  { %v859_v3 = vmul.f32 0.044715, %v5342_v8  ;;  %v986_v29 = vmul.f32 %v858_v43, %v5338_v14  ;;  %v725_v17 = vmul.f32 0.5, %v5274_v34  ;;  %v1368_v7 = vmul.f32 0.7978846, %v1240_v13 }
 0x24e   :  { %v2920_v54 = vadd.f32 %v2856_v52, %v5331_v25  ;;  %v1750_v1 = vmul.f32 %v1622_v0, %v726_v4  ;;  %v5360_v61 = vadd.f32 %v5134_v40, %v2291_v49  ;;  %v1241_v34 = vadd.f32 %v1113_v31, %v5316_v58 }
 0x24f   :  { %v987_v47 = vmul.f32 %v859_v3, %v5342_v8  ;;  %v1114_v6 = vmul.f32 %v986_v29, %v5338_v14  ;;  %v2123_v11 = vpop.f32.mrf.mxu2  ;;  %v727_v10 = vmul.f32 0.5, %v5291_v36  ;;  %v2664_v2 = vmul.f32 0.5, %v5331_v25 }
 0x250   :  { %v3703_v12 = vpop.eup %3702  ;;  %v2984_v41 = vmul.f32 0.7978846, %v2920_v54  ;;  %v430_v15 = vpop.f32.mrf.mxu0  ;;  %v1890_v16 = vpack.c.bf16 %v1750_v1, %v1748_v5  ;;  %v2729_v59 = vmul.f32 0.044715, %v5360_v61  ;;  %v1369_v22 = vmul.f32 0.7978846, %v1241_v34 }
 0x251   :  { %v1115_v62 = vmul.f32 %v987_v47, %v5342_v8  ;;  %v3705_v53 = vpop.eup %3704  ;;  %v3111_v48 = vadd.f32 1.0, %v3703_v12  ;;  %v5367_v19 = vadd.f32 %v430_v15, %v4054_v26  ;;  %v1242_v63 = vadd.f32 %v1114_v6, %v5338_v14 }
 0x252   :  { %v599_v9 = vpop.f32.mrf.mxu1  ;;  %v3707_v39 = vpop.eup %3706  ;;  %3708 = vtanh.f32 %v2984_v41  ;;  %v1621_v44 = vadd.f32 1.0, %v3705_v53  ;;  %v2793_v21 = vmul.f32 %v2729_v59, %v5360_v61  ;;  %v728_v12 = vmul.f32 0.5, %v5311_v24 }
 0x253   :  { %v5371_v56 = vadd.f32 %v599_v9, %v4059_v28  ;;  %v3175_v60 = vmul.f32 %v3111_v48, %v2663_v37  ;;  %v860_v18 = vmul.f32 0.044715, %v5367_v19  ;;  %v1623_v45 = vadd.f32 1.0, %v3707_v39  ;;  %v2292_v30 = vpop.f32.mrf.mxu3 }
 0x254   :  { %v1370_v55 = vmul.f32 0.7978846, %v1242_v63  ;;  %3710 = vtanh.f32 %v1368_v7  ;;  %v2857_v51 = vmul.f32 %v2793_v21, %v5360_v61  ;;  %v2293_v20 = vadd.f32 %v2292_v30, %v2123_v11 }
 0x255   :  { %v861_v57 = vmul.f32 0.044715, %v5371_v56  ;;  %3239 = vst [vmem:[%s5757_s5 + $0xf0] sm:$0xff] %v3175_v60  ;;  %v988_v23 = vmul.f32 %v860_v18, %v5367_v19  ;;  %2165 = vmatmul.bf16.gmra.mxu2 %v1890_v16  ;;  %v1749_v27 = vmul.f32 %v1621_v44, %v725_v17  ;;  %v1751_v42 = vmul.f32 %v1623_v45, %v727_v10 }
 0x256   :  { %3712 = vtanh.f32 %v1370_v55  ;;  %v1243_v33 = vadd.f32 %v1115_v62, %v5342_v8  ;;  %v2921_v36 = vadd.f32 %v2857_v51, %v5360_v61  ;;  %v5386_v35 = vadd.f32 %v5134_v40, %v2293_v20 }
 0x257   :  { %3714 = vtanh.f32 %v1369_v22  ;;  %v1891_v46 = vpack.c.bf16 %v1751_v42, %v1749_v27  ;;  %v2126_v43 = vpop.f32.mrf.mxu2  ;;  %v1116_v52 = vmul.f32 %v988_v23, %v5367_v19  ;;  %v989_v49 = vmul.f32 %v861_v57, %v5371_v56 }
 0x258   :  { %v3709_v50 = vpop.eup %3708  ;;  %v432_v32 = vpop.f32.mrf.mxu0  ;;  %v1371_v4 = vmul.f32 0.7978846, %v1243_v33  ;;  %v2985_v3 = vmul.f32 0.7978846, %v2921_v36  ;;  %v2730_v0 = vmul.f32 0.044715, %v5386_v35 }
 0x259   :  { %v3112_v38 = vadd.f32 1.0, %v3709_v50  ;;  %v5393_v13 = vadd.f32 %v432_v32, %v4054_v26  ;;  %v1244_v25 = vadd.f32 %v1116_v52, %v5367_v19  ;;  %v730_v41 = vmul.f32 0.5, %v5338_v14 }
 0x25a   :  { %v601_v29 = vpop.f32.mrf.mxu1  ;;  %v3711_v5 = vpop.eup %3710  ;;  %3716 = vtanh.f32 %v1371_v4  ;;  %v2794_v1 = vmul.f32 %v2730_v0, %v5386_v35  ;;  %v731_v7 = vmul.f32 0.5, %v5342_v8  ;;  %v2665_v53 = vmul.f32 0.5, %v5360_v61 }
 0x25b   :  { %v5396_v54 = vadd.f32 %v601_v29, %v4059_v28  ;;  %v3176_v47 = vmul.f32 %v3112_v38, %v2664_v2  ;;  %3718 = vtanh.f32 %v2985_v3  ;;  %v1624_v31 = vadd.f32 1.0, %v3711_v5 }
 0x25c   :  { %v3713_v37 = vpop.eup %3712  ;;  %2334 = vmatmul.bf16.gmra.mxu3 %v1891_v46  ;;  %v862_v17 = vmul.f32 0.044715, %v5393_v13  ;;  %v2858_v15 = vmul.f32 %v2794_v1, %v5386_v35  ;;  %v1372_v62 = vmul.f32 0.7978846, %v1244_v25  ;;  %v1117_v44 = vmul.f32 %v989_v49, %v5371_v56 }
 0x25d   :  { %v863_v6 = vmul.f32 0.044715, %v5396_v54  ;;  %v3715_v11 = vpop.eup %3714  ;;  %3240 = vst [vmem:[%s5757_s5 + $0xf8] sm:$0xff] %v3176_v47  ;;  %v1626_v16 = vadd.f32 1.0, %v3713_v37  ;;  %v1752_v24 = vmul.f32 %v1624_v31, %v728_v12  ;;  %v729_v33 = vmul.f32 0.5, %v5316_v58 }
 0x25e   :  { %v990_v48 = vmul.f32 %v862_v17, %v5393_v13  ;;  %v2922_v14 = vadd.f32 %v2858_v15, %v5386_v35  ;;  %v1625_v39 = vadd.f32 1.0, %v3715_v11  ;;  %3720 = vtanh.f32 %v1372_v62 }
 0x25f   :  { %v991_v59 = vmul.f32 %v863_v6, %v5396_v54  ;;  %v2295_v9 = vpop.f32.mrf.mxu3  ;;  %v1754_v34 = vmul.f32 %v1626_v16, %v730_v41  ;;  %v2128_v21 = vpop.f32.mrf.mxu2  ;;  %v1245_v36 = vadd.f32 %v1117_v44, %v5371_v56  ;;  %v2666_v58 = vmul.f32 0.5, %v5386_v35 }
 0x260   :  { %v3717_v63 = vpop.eup %3716  ;;  %v2296_v60 = vadd.f32 %v2295_v9, %v2126_v43  ;;  %v435_v18 = vpop.f32.mrf.mxu0  ;;  %v1118_v8 = vmul.f32 %v990_v48, %v5393_v13  ;;  %v2986_v30 = vmul.f32 0.7978846, %v2922_v14  ;;  %v1753_v0 = vmul.f32 %v1625_v39, %v729_v33 }
 0x261   :  { %v1119_v61 = vmul.f32 %v991_v59, %v5396_v54  ;;  %v3719_v45 = vpop.eup %3718  ;;  %v5417_v57 = vadd.f32 %v435_v18, %v4054_v26  ;;  %v1892_v55 = vpack.c.bf16 %v1754_v34, %v1752_v24  ;;  %v1627_v51 = vadd.f32 1.0, %v3717_v63 }
 0x262   :  { %v604_v10 = vpop.f32.mrf.mxu1  ;;  %v3113_v20 = vadd.f32 1.0, %v3719_v45  ;;  %v5420_v23 = vadd.f32 %v5134_v40, %v2296_v60  ;;  %v1246_v27 = vadd.f32 %v1118_v8, %v5393_v13  ;;  %3722 = vtanh.f32 %v2986_v30 }
 0x263   :  { %v5423_v22 = vadd.f32 %v604_v10, %v4059_v28  ;;  %v864_v42 = vmul.f32 0.044715, %v5417_v57  ;;  %v1755_v43 = vmul.f32 %v1627_v51, %v731_v7  ;;  %v1247_v52 = vadd.f32 %v1119_v61, %v5396_v54 }
 0x264   :  { %v3177_v50 = vmul.f32 %v3113_v20, %v2665_v53  ;;  %v2731_v2 = vmul.f32 0.044715, %v5420_v23  ;;  %v1374_v4 = vmul.f32 0.7978846, %v1246_v27  ;;  %v3721_v38 = vpop.eup %3720  ;;  %v1373_v49 = vmul.f32 0.7978846, %v1245_v36 }
 0x265   :  { %v865_v46 = vmul.f32 0.044715, %v5423_v22  ;;  %v992_v32 = vmul.f32 %v864_v42, %v5417_v57  ;;  %2170 = vmatmul.bf16.gmra.mxu2 %v1892_v55  ;;  %v1375_v25 = vmul.f32 0.7978846, %v1247_v52  ;;  %v1893_v37 = vpack.c.bf16 %v1755_v43, %v1753_v0 }
 0x266   :  { %3241 = vst [vmem:[%s5757_s5 + $0x100] sm:$0xff] %v3177_v50  ;;  %v2795_v3 = vmul.f32 %v2731_v2, %v5420_v23  ;;  %3724 = vtanh.f32 %v1374_v4  ;;  %v1628_v11 = vadd.f32 1.0, %v3721_v38  ;;  %v732_v39 = vmul.f32 0.5, %v5367_v19  ;;  %v5477_v4 = vld [vmem:[%s5756_s4] ss:$0 sm:$0xff] }
 0x267   :  { %v2297_v29 = vpop.f32.mrf.mxu3  ;;  %v993_v5 = vmul.f32 %v865_v46, %v5423_v22  ;;  %v1120_v47 = vmul.f32 %v992_v32, %v5417_v57  ;;  %v2131_v17 = vpop.f32.mrf.mxu2  ;;  %3726 = vtanh.f32 %v1373_v49  ;;  %v734_v60 = vmul.f32 0.5, %v5393_v13 }
 0x268   :  { %v2859_v1 = vmul.f32 %v2795_v3, %v5420_v23  ;;  %v2298_v31 = vadd.f32 %v2297_v29, %v2128_v21  ;;  %v437_v6 = vpop.f32.mrf.mxu0  ;;  %v3723_v12 = vpop.eup %3722  ;;  %3728 = vtanh.f32 %v1375_v25  ;;  %v735_v21 = vmul.f32 0.5, %v5396_v54 }
 0x269   :  { %v5442_v35 = vadd.f32 %v437_v6, %v4054_v26  ;;  %v1248_v15 = vadd.f32 %v1120_v47, %v5417_v57  ;;  %v3114_v16 = vadd.f32 1.0, %v3723_v12  ;;  %v1121_v24 = vmul.f32 %v993_v5, %v5423_v22 }
 0x26a   :  { %v606_v41 = vpop.f32.mrf.mxu1  ;;  %v2923_v7 = vadd.f32 %v2859_v1, %v5420_v23  ;;  %v5447_v62 = vadd.f32 %v5134_v40, %v2298_v31  ;;  %v1756_v45 = vmul.f32 %v1628_v11, %v732_v39  ;;  %v733_v0 = vmul.f32 0.5, %v5371_v56 }
 0x26b   :  { %v5450_v53 = vadd.f32 %v606_v41, %v4059_v28  ;;  %v866_v48 = vmul.f32 0.044715, %v5442_v35  ;;  %v1376_v59 = vmul.f32 0.7978846, %v1248_v15  ;;  %v3178_v14 = vmul.f32 %v3114_v16, %v2666_v58 }
 0x26c   :  { %v2987_v9 = vmul.f32 0.7978846, %v2923_v7  ;;  %v2732_v34 = vmul.f32 0.044715, %v5447_v62  ;;  %2339 = vmatmul.bf16.gmra.mxu3 %v1893_v37  ;;  %v3725_v44 = vpop.eup %3724  ;;  %v1249_v13 = vadd.f32 %v1121_v24, %v5423_v22  ;;  %v2667_v37 = vmul.f32 0.5, %v5420_v23 }
 0x26d   :  { %v994_v63 = vmul.f32 %v866_v48, %v5442_v35  ;;  %v867_v40 = vmul.f32 0.044715, %v5450_v53  ;;  %v3727_v18 = vpop.eup %3726  ;;  %3242 = vst [vmem:[%s5757_s5 + $0x108] sm:$0xff] %v3178_v14  ;;  %v1630_v61 = vadd.f32 1.0, %v3725_v44  ;;  %v736_v7 = vmul.f32 0.5, %v5417_v57 }
 0x26e   :  { %3730 = vtanh.f32 %v2987_v9  ;;  %v2796_v8 = vmul.f32 %v2732_v34, %v5447_v62  ;;  %v3729_v19 = vpop.eup %3728  ;;  %v1629_v2 = vadd.f32 1.0, %v3727_v18  ;;  %v1377_v11 = vmul.f32 0.7978846, %v1249_v13 }
 0x26f   :  { %v2300_v30 = vpop.f32.mrf.mxu3  ;;  %v995_v10 = vmul.f32 %v867_v40, %v5450_v53  ;;  %v1122_v55 = vmul.f32 %v994_v63, %v5442_v35  ;;  %3732 = vtanh.f32 %v1376_v59  ;;  %v2133_v20 = vpop.f32.mrf.mxu2  ;;  %v1758_v42 = vmul.f32 %v1630_v61, %v734_v60 }
 0x270   :  { %v2860_v54 = vmul.f32 %v2796_v8, %v5447_v62  ;;  %v2301_v51 = vadd.f32 %v2300_v30, %v2131_v17  ;;  %v440_v27 = vpop.f32.mrf.mxu0  ;;  %v1631_v33 = vadd.f32 1.0, %v3729_v19  ;;  %v1757_v12 = vmul.f32 %v1629_v2, %v733_v0 }
 0x271   :  { %v5469_v36 = vadd.f32 %v440_v27, %v4054_v26  ;;  %v1250_v46 = vadd.f32 %v1122_v55, %v5442_v35  ;;  %v1123_v43 = vmul.f32 %v995_v10, %v5450_v53  ;;  %v1894_v58 = vpack.c.bf16 %v1758_v42, %v1756_v45 }
 0x272   :  { %v609_v50 = vpop.f32.mrf.mxu1  ;;  %v2924_v32 = vadd.f32 %v2860_v54, %v5447_v62  ;;  %v5480_v52 = vadd.f32 %v5477_v4, %v2301_v51  ;;  %v1759_v1 = vmul.f32 %v1631_v33, %v735_v21  ;;  %v737_v44 = vmul.f32 0.5, %v5423_v22 }
 0x273   :  { %v5483_v38 = vadd.f32 %v609_v50, %v4059_v28  ;;  %v868_v3 = vmul.f32 0.044715, %v5469_v36  ;;  %v1378_v49 = vmul.f32 0.7978846, %v1250_v46  ;;  %v1251_v29 = vadd.f32 %v1123_v43, %v5450_v53 }
 0x274   :  { %v3731_v5 = vpop.eup %3730  ;;  %v2988_v25 = vmul.f32 0.7978846, %v2924_v32  ;;  %v2733_v47 = vmul.f32 0.044715, %v5480_v52  ;;  %v1895_v24 = vpack.c.bf16 %v1759_v1, %v1757_v12  ;;  %v738_v8 = vmul.f32 0.5, %v5442_v35 }
 0x275   :  { %v3733_v31 = vpop.eup %3732  ;;  %v3115_v17 = vadd.f32 1.0, %v3731_v5  ;;  %v996_v6 = vmul.f32 %v868_v3, %v5469_v36  ;;  %2175 = vmatmul.bf16.gmra.mxu2 %v1894_v58  ;;  %v869_v56 = vmul.f32 0.044715, %v5483_v38  ;;  %v1379_v48 = vmul.f32 0.7978846, %v1251_v29 }
 0x276   :  { %3734 = vtanh.f32 %v2988_v25  ;;  %v2797_v41 = vmul.f32 %v2733_v47, %v5480_v52  ;;  %v1632_v61 = vadd.f32 1.0, %v3733_v31  ;;  %v2668_v19 = vmul.f32 0.5, %v5447_v62 }
 0x277   :  { %v3179_v15 = vmul.f32 %v3115_v17, %v2667_v37  ;;  %v2302_v16 = vpop.f32.mrf.mxu3  ;;  %3736 = vtanh.f32 %v1378_v49  ;;  %v1124_v57 = vmul.f32 %v996_v6, %v5469_v36  ;;  %v997_v60 = vmul.f32 %v869_v56, %v5483_v38 }
 0x278   :  { %v2861_v59 = vmul.f32 %v2797_v41, %v5480_v52  ;;  %v2303_v23 = vadd.f32 %v2302_v16, %v2133_v20  ;;  %v2136_v14 = vpop.f32.mrf.mxu2  ;;  %v442_v9 = vpop.f32.mrf.mxu0  ;;  %3738 = vtanh.f32 %v1377_v11  ;;  %v739_v55 = vmul.f32 0.5, %v5450_v53 }
 0x279   :  { %3243 = vst [vmem:[%s5757_s5 + $0x110] sm:$0xff] %v3179_v15  ;;  %v5499_v34 = vadd.f32 %v442_v9, %v4054_v26  ;;  %3740 = vtanh.f32 %v1379_v48  ;;  %v1252_v22 = vadd.f32 %v1124_v57, %v5469_v36  ;;  %v1125_v62 = vmul.f32 %v997_v60, %v5483_v38 }
 0x27a   :  { %v611_v39 = vpop.f32.mrf.mxu1  ;;  %v2925_v63 = vadd.f32 %v2861_v59, %v5480_v52  ;;  %v5505_v40 = vadd.f32 %v5477_v4, %v2303_v23  ;;  %v1760_v53 = vmul.f32 %v1632_v61, %v736_v7  ;;  %v2669_v7 = vmul.f32 0.5, %v5480_v52 }
 0x27b   :  { %v5509_v21 = vadd.f32 %v611_v39, %v4059_v28  ;;  %v870_v18 = vmul.f32 0.044715, %v5499_v34  ;;  %v1380_v27 = vmul.f32 0.7978846, %v1252_v22  ;;  %v1253_v12 = vadd.f32 %v1125_v62, %v5483_v38 }
 0x27c   :  { %v3735_v45 = vpop.eup %3734  ;;  %v2989_v30 = vmul.f32 0.7978846, %v2925_v63  ;;  %v2734_v10 = vmul.f32 0.044715, %v5505_v40  ;;  %2344 = vmatmul.bf16.gmra.mxu3 %v1895_v24  ;;  %v740_v39 = vmul.f32 0.5, %v5469_v36 }
 0x27d   :  { %v3737_v13 = vpop.eup %3736  ;;  %v3116_v54 = vadd.f32 1.0, %v3735_v45  ;;  %v998_v51 = vmul.f32 %v870_v18, %v5499_v34  ;;  %v871_v20 = vmul.f32 0.044715, %v5509_v21  ;;  %v1381_v60 = vmul.f32 0.7978846, %v1253_v12 }
 0x27e   :  { %v3739_v35 = vpop.eup %3738  ;;  %3742 = vtanh.f32 %v2989_v30  ;;  %v2798_v42 = vmul.f32 %v2734_v10, %v5505_v40  ;;  %v1634_v33 = vadd.f32 1.0, %v3737_v13 }
 0x27f   :  { %v3741_v50 = vpop.eup %3740  ;;  %v3180_v2 = vmul.f32 %v3116_v54, %v2668_v19  ;;  %v2305_v46 = vpop.f32.mrf.mxu3  ;;  %v999_v43 = vmul.f32 %v871_v20, %v5509_v21  ;;  %v1126_v32 = vmul.f32 %v998_v51, %v5499_v34  ;;  %v1633_v1 = vadd.f32 1.0, %v3739_v35 }
 0x280   :  { %v2862_v58 = vmul.f32 %v2798_v42, %v5505_v40  ;;  %v2306_v3 = vadd.f32 %v2305_v46, %v2136_v14  ;;  %v2138_v0 = vpop.f32.mrf.mxu2  ;;  %v445_v49 = vpop.f32.mrf.mxu0  ;;  %v1762_v29 = vmul.f32 %v1634_v33, %v738_v8  ;;  %v1635_v5 = vadd.f32 1.0, %v3741_v50 }
 0x281   :  { %3244 = vst [vmem:[%s5757_s5 + $0x118] sm:$0xff] %v3180_v2  ;;  %v5528_v25 = vadd.f32 %v445_v49, %v4054_v26  ;;  %v1254_v31 = vadd.f32 %v1126_v32, %v5499_v34  ;;  %3744 = vtanh.f32 %v1380_v27  ;;  %v1127_v15 = vmul.f32 %v999_v43, %v5509_v21 }
 0x282   :  { %v614_v47 = vpop.f32.mrf.mxu1  ;;  %v2926_v37 = vadd.f32 %v2862_v58, %v5505_v40  ;;  %v5533_v17 = vadd.f32 %v5477_v4, %v2306_v3  ;;  %v1896_v6 = vpack.c.bf16 %v1762_v29, %v1760_v53  ;;  %v1763_v23 = vmul.f32 %v1635_v5, %v739_v55 }
 0x283   :  { %v872_v41 = vmul.f32 0.044715, %v5528_v25  ;;  %v5538_v56 = vadd.f32 %v614_v47, %v4059_v28  ;;  %v1382_v11 = vmul.f32 0.7978846, %v1254_v31  ;;  %v1761_v9 = vmul.f32 %v1633_v1, %v737_v44 }
 0x284   :  { %v3743_v16 = vpop.eup %3742  ;;  %v2990_v48 = vmul.f32 0.7978846, %v2926_v37  ;;  %v2735_v59 = vmul.f32 0.044715, %v5533_v17  ;;  %v1255_v63 = vadd.f32 %v1127_v15, %v5509_v21  ;;  %v741_v54 = vmul.f32 0.5, %v5483_v38 }
 0x285   :  { %v3117_v24 = vadd.f32 1.0, %v3743_v16  ;;  %v1000_v14 = vmul.f32 %v872_v41, %v5528_v25  ;;  %2180 = vmatmul.bf16.gmra.mxu2 %v1896_v6  ;;  %v873_v61 = vmul.f32 0.044715, %v5538_v56  ;;  %v1897_v44 = vpack.c.bf16 %v1763_v23, %v1761_v9 }
 0x286   :  { %3746 = vtanh.f32 %v2990_v48  ;;  %v2799_v57 = vmul.f32 %v2735_v59, %v5533_v17  ;;  %v1383_v10 = vmul.f32 0.7978846, %v1255_v63  ;;  %v742_v50 = vmul.f32 0.5, %v5499_v34 }
 0x287   :  { %v3745_v18 = vpop.eup %3744  ;;  %v3181_v8 = vmul.f32 %v3117_v24, %v2669_v7  ;;  %v2307_v52 = vpop.f32.mrf.mxu3  ;;  %3748 = vtanh.f32 %v1382_v11  ;;  %v1128_v22 = vmul.f32 %v1000_v14, %v5528_v25  ;;  %v1001_v33 = vmul.f32 %v873_v61, %v5538_v56 }
 0x288   :  { %v2863_v45 = vmul.f32 %v2799_v57, %v5533_v17  ;;  %v2308_v19 = vadd.f32 %v2307_v52, %v2138_v0  ;;  %v2141_v30 = vpop.f32.mrf.mxu2  ;;  %v447_v36 = vpop.f32.mrf.mxu0  ;;  %3750 = vtanh.f32 %v1381_v60  ;;  %v1636_v42 = vadd.f32 1.0, %v3745_v18 }
 0x289   :  { %3245 = vst [vmem:[%s5757_s5 + $0x120] sm:$0xff] %v3181_v8  ;;  %v5554_v55 = vadd.f32 %v447_v36, %v4054_v26  ;;  %v1256_v51 = vadd.f32 %v1128_v22, %v5528_v25  ;;  %3752 = vtanh.f32 %v1383_v10  ;;  %v2670_v2 = vmul.f32 0.5, %v5505_v40 }
 0x28a   :  { %v616_v13 = vpop.f32.mrf.mxu1  ;;  %v2927_v20 = vadd.f32 %v2863_v45, %v5533_v17  ;;  %v5560_v27 = vadd.f32 %v5477_v4, %v2308_v19  ;;  %v743_v53 = vmul.f32 0.5, %v5509_v21  ;;  %v1764_v5 = vmul.f32 %v1636_v42, %v740_v39 }
 0x28b   :  { %v5563_v35 = vadd.f32 %v616_v13, %v4059_v28  ;;  %v874_v62 = vmul.f32 0.044715, %v5554_v55  ;;  %v1384_v49 = vmul.f32 0.7978846, %v1256_v51  ;;  %v1129_v21 = vmul.f32 %v1001_v33, %v5538_v56 }
 0x28c   :  { %v3747_v38 = vpop.eup %3746  ;;  %v2991_v46 = vmul.f32 0.7978846, %v2927_v20  ;;  %v2736_v43 = vmul.f32 0.044715, %v5560_v27  ;;  %2349 = vmatmul.bf16.gmra.mxu3 %v1897_v44  ;;  %v2671_v63 = vmul.f32 0.5, %v5533_v17 }
 0x28d   :  { %v3749_v32 = vpop.eup %3748  ;;  %v3118_v58 = vadd.f32 1.0, %v3747_v38  ;;  %v1002_v3 = vmul.f32 %v874_v62, %v5554_v55  ;;  %v875_v0 = vmul.f32 0.044715, %v5563_v35  ;;  %v1257_v19 = vadd.f32 %v1129_v21, %v5538_v56 }
 0x28e   :  { %3754 = vtanh.f32 %v2991_v46  ;;  %v2800_v34 = vmul.f32 %v2736_v43, %v5560_v27  ;;  %v1638_v29 = vadd.f32 1.0, %v3749_v32  ;;  %v3751_v47 = vpop.eup %3750 }
 0x28f   :  { %v3182_v40 = vmul.f32 %v3118_v58, %v2670_v2  ;;  %v2310_v1 = vpop.f32.mrf.mxu3  ;;  %v1003_v31 = vmul.f32 %v875_v0, %v5563_v35  ;;  %v1130_v37 = vmul.f32 %v1002_v3, %v5554_v55  ;;  %v1637_v16 = vadd.f32 1.0, %v3751_v47  ;;  %v3753_v7 = vpop.eup %3752 }
 0x290   :  { %v2864_v6 = vmul.f32 %v2800_v34, %v5560_v27  ;;  %v2311_v12 = vadd.f32 %v2310_v1, %v2141_v30  ;;  %v2143_v41 = vpop.f32.mrf.mxu2  ;;  %v450_v11 = vpop.f32.mrf.mxu0  ;;  %v1766_v15 = vmul.f32 %v1638_v29, %v742_v50  ;;  %3756 = vtanh.f32 %v1384_v49 }
 0x291   :  { %3246 = vst [vmem:[%s5757_s5 + $0x128] sm:$0xff] %v3182_v40  ;;  %v5582_v48 = vadd.f32 %v450_v11, %v4054_v26  ;;  %v1258_v23 = vadd.f32 %v1130_v37, %v5554_v55  ;;  %v1131_v24 = vmul.f32 %v1003_v31, %v5563_v35  ;;  %v1639_v18 = vadd.f32 1.0, %v3753_v7 }
 0x292   :  { %v619_v59 = vpop.f32.mrf.mxu1  ;;  %v2928_v14 = vadd.f32 %v2864_v6, %v5560_v27  ;;  %v5588_v9 = vadd.f32 %v5477_v4, %v2311_v12  ;;  %v1898_v57 = vpack.c.bf16 %v1766_v15, %v1764_v5  ;;  %v1765_v45 = vmul.f32 %v1637_v16, %v741_v54 }
 0x293   :  { %v5591_v39 = vadd.f32 %v619_v59, %v4059_v28  ;;  %v876_v60 = vmul.f32 0.044715, %v5582_v48  ;;  %v1386_v8 = vmul.f32 0.7978846, %v1258_v23  ;;  %v1767_v10 = vmul.f32 %v1639_v18, %v743_v53 }
 0x294   :  { %v3755_v52 = vpop.eup %3754  ;;  %v2992_v61 = vmul.f32 0.7978846, %v2928_v14  ;;  %v2737_v22 = vmul.f32 0.044715, %v5588_v9  ;;  %v1259_v13 = vadd.f32 %v1131_v24, %v5563_v35  ;;  %v744_v54 = vmul.f32 0.5, %v5528_v25 }
 0x295   :  { %v3119_v44 = vadd.f32 1.0, %v3755_v52  ;;  %v1004_v30 = vmul.f32 %v876_v60, %v5582_v48  ;;  %v877_v36 = vmul.f32 0.044715, %v5591_v39  ;;  %2185 = vmatmul.bf16.gmra.mxu2 %v1898_v57  ;;  %v1899_v33 = vpack.c.bf16 %v1767_v10, %v1765_v45 }
 0x296   :  { %3758 = vtanh.f32 %v2992_v61  ;;  %v2801_v17 = vmul.f32 %v2737_v22, %v5588_v9  ;;  %v3757_v51 = vpop.eup %3756  ;;  %v1385_v46 = vmul.f32 0.7978846, %v1257_v19  ;;  %v1387_v43 = vmul.f32 0.7978846, %v1259_v13 }
 0x297   :  { %v3183_v20 = vmul.f32 %v3119_v44, %v2671_v63  ;;  %v2312_v42 = vpop.f32.mrf.mxu3  ;;  %3760 = vtanh.f32 %v1386_v8  ;;  %v1005_v53 = vmul.f32 %v877_v36, %v5591_v39  ;;  %v746_v25 = vmul.f32 0.5, %v5554_v55 }
 0x298   :  { %v2865_v62 = vmul.f32 %v2801_v17, %v5588_v9  ;;  %v2313_v50 = vadd.f32 %v2312_v42, %v2143_v41  ;;  %v2146_v38 = vpop.f32.mrf.mxu2  ;;  %v452_v2 = vpop.f32.mrf.mxu0  ;;  %v1132_v3 = vmul.f32 %v1004_v30, %v5582_v48  ;;  %3762 = vtanh.f32 %v1385_v46 }
 0x299   :  { %3247 = vst [vmem:[%s5757_s5 + $0x130] sm:$0xff] %v3183_v20  ;;  %v5608_v32 = vadd.f32 %v452_v2, %v4054_v26  ;;  %v1640_v5 = vadd.f32 1.0, %v3757_v51  ;;  %3764 = vtanh.f32 %v1387_v43  ;;  %v2672_v55 = vmul.f32 0.5, %v5560_v27 }
 0x29a   :  { %v621_v58 = vpop.f32.mrf.mxu1  ;;  %v2929_v0 = vadd.f32 %v2865_v62, %v5588_v9  ;;  %v5614_v49 = vadd.f32 %v5477_v4, %v2313_v50  ;;  %v1260_v26 = vadd.f32 %v1132_v3, %v5582_v48  ;;  %v747_v31 = vmul.f32 0.5, %v5563_v35 }
 0x29b   :  { %v5617_v34 = vadd.f32 %v621_v58, %v4059_v28  ;;  %v878_v29 = vmul.f32 0.044715, %v5608_v32  ;;  %v1133_v15 = vmul.f32 %v1005_v53, %v5591_v39  ;;  %v1768_v59 = vmul.f32 %v1640_v5, %v744_v54 }
 0x29c   :  { %v3759_v47 = vpop.eup %3758  ;;  %v2993_v40 = vmul.f32 0.7978846, %v2929_v0  ;;  %v2738_v1 = vmul.f32 0.044715, %v5614_v49  ;;  %2354 = vmatmul.bf16.gmra.mxu3 %v1899_v33  ;;  %v1388_v12 = vmul.f32 0.7978846, %v1260_v26 }
 0x29d   :  { %v3761_v37 = vpop.eup %3760  ;;  %v3120_v21 = vadd.f32 1.0, %v3759_v47  ;;  %v1006_v28 = vmul.f32 %v878_v29, %v5608_v32  ;;  %v879_v6 = vmul.f32 0.044715, %v5617_v34  ;;  %v1261_v61 = vadd.f32 %v1133_v15, %v5591_v39 }
 0x29e   :  { %3766 = vtanh.f32 %v2993_v40  ;;  %v2802_v41 = vmul.f32 %v2738_v1, %v5614_v49  ;;  %v1642_v11 = vadd.f32 1.0, %v3761_v37  ;;  %v3763_v23 = vpop.eup %3762  ;;  %v745_v30 = vmul.f32 0.5, %v5538_v56 }
 0x29f   :  { %v3184_v27 = vmul.f32 %v3120_v21, %v2672_v55  ;;  %v2315_v16 = vpop.f32.mrf.mxu3  ;;  %v1007_v7 = vmul.f32 %v879_v6, %v5617_v34  ;;  %v1134_v35 = vmul.f32 %v1006_v28, %v5608_v32  ;;  %3768 = vtanh.f32 %v1388_v12  ;;  %v3765_v60 = vpop.eup %3764 }
 0x2a0   :  { %v2866_v24 = vmul.f32 %v2802_v41, %v5614_v49  ;;  %v2316_v14 = vadd.f32 %v2315_v16, %v2146_v38  ;;  %v2148_v57 = vpop.f32.mrf.mxu2  ;;  %v1770_v63 = vmul.f32 %v1642_v11, %v746_v25  ;;  %v1641_v18 = vadd.f32 1.0, %v3763_v23 }
 0x2a1   :  { %3248 = vst [vmem:[%s5757_s5 + $0x138] sm:$0xff] %v3184_v27  ;;  %v1262_v8 = vadd.f32 %v1134_v35, %v5608_v32  ;;  %v1135_v52 = vmul.f32 %v1007_v7, %v5617_v34  ;;  %v1643_v44 = vadd.f32 1.0, %v3765_v60  ;;  %v2673_v13 = vmul.f32 0.5, %v5588_v9 }
 0x2a2   :  { %v2930_v22 = vadd.f32 %v2866_v24, %v5614_v49  ;;  %v5639_v45 = vadd.f32 %v5477_v4, %v2316_v14  ;;  %v1900_v19 = vpack.c.bf16 %v1770_v63, %v1768_v59  ;;  %v1389_v54 = vmul.f32 0.7978846, %v1261_v61 }
 0x2a3   :  { %v1390_v36 = vmul.f32 0.7978846, %v1262_v8  ;;  %v1263_v10 = vadd.f32 %v1135_v52, %v5617_v34  ;;  %v1771_v42 = vmul.f32 %v1643_v44, %v747_v31  ;;  %v1769_v56 = vmul.f32 %v1641_v18, %v745_v30 }
 0x2a4   :  { %v3767_v17 = vpop.eup %3766  ;;  %v2994_v51 = vmul.f32 0.7978846, %v2930_v22  ;;  %v2739_v20 = vmul.f32 0.044715, %v5639_v45  ;;  %v750_v55 = vmul.f32 0.5, %v5608_v32  ;;  %v2674_v1 = vmul.f32 0.5, %v5614_v49 }
 0x2a5   :  { %v3121_v33 = vadd.f32 1.0, %v3767_v17  ;;  %2190 = vmatmul.bf16.gmra.mxu2 %v1900_v19  ;;  %3770 = vtanh.f32 %v1390_v36  ;;  %v1391_v62 = vmul.f32 0.7978846, %v1263_v10  ;;  %v3769_v50 = vpop.eup %3768  ;;  %v1901_v9 = vpack.c.bf16 %v1771_v42, %v1769_v56 }
 0x2a6   :  { %3772 = vtanh.f32 %v2994_v51  ;;  %v2803_v38 = vmul.f32 %v2739_v20, %v5639_v45  ;;  %v1644_v29 = vadd.f32 1.0, %v3769_v50  ;;  %v748_v37 = vmul.f32 0.5, %v5582_v48 }
 0x2a7   :  { %v3185_v2 = vmul.f32 %v3121_v33, %v2673_v13  ;;  %v2317_v46 = vpop.f32.mrf.mxu3  ;;  %3774 = vtanh.f32 %v1391_v62  ;;  %v751_v35 = vmul.f32 0.5, %v5617_v34  ;;  %v749_v63 = vmul.f32 0.5, %v5591_v39 }
 0x2a8   :  { %v2867_v43 = vmul.f32 %v2803_v38, %v5639_v45  ;;  %v2318_v53 = vadd.f32 %v2317_v46, %v2148_v57  ;;  %v2151_v58 = vpop.f32.mrf.mxu2  ;;  %3776 = vtanh.f32 %v1389_v54  ;;  %v1772_v15 = vmul.f32 %v1644_v29, %v748_v37 }
 0x2a9   :  { %3249 = vst [vmem:[%s5757_s5 + $0x140] sm:$0xff] %v3185_v2  ;;  %v2675_v18 = vmul.f32 0.5, %v5639_v45 }
 0x2aa   :  { %v2931_v25 = vadd.f32 %v2867_v43, %v5639_v45  ;;  %v2612_v3 = vadd.f32 %v5477_v4, %v2318_v53 }
 0x2ab   :  { %v3771_v0 = vpop.eup %3770 }
 0x2ac   :  { %v3773_v5 = vpop.eup %3772  ;;  %v2995_v26 = vmul.f32 0.7978846, %v2931_v25  ;;  %v2740_v47 = vmul.f32 0.044715, %v2612_v3  ;;  %2359 = vmatmul.bf16.gmra.mxu3 %v1901_v9  ;;  %v1646_v40 = vadd.f32 1.0, %v3771_v0  ;;  %v2676_v51 = vmul.f32 0.5, %v2612_v3 }
 0x2ad   :  { %v3122_v31 = vadd.f32 1.0, %v3773_v5  ;;  %v3775_v21 = vpop.eup %3774 }
 0x2ae   :  { %3778 = vtanh.f32 %v2995_v26  ;;  %v2804_v28 = vmul.f32 %v2740_v47, %v2612_v3  ;;  %v1774_v6 = vmul.f32 %v1646_v40, %v750_v55  ;;  %v3777_v12 = vpop.eup %3776  ;;  %v1647_v59 = vadd.f32 1.0, %v3775_v21 }
 0x2af   :  { %v3186_v41 = vmul.f32 %v3122_v31, %v2674_v1  ;;  %v2320_v11 = vpop.f32.mrf.mxu3  ;;  %v1645_v23 = vadd.f32 1.0, %v3777_v12 }
 0x2b0   :  { %v2868_v27 = vmul.f32 %v2804_v28, %v2612_v3  ;;  %v2321_v16 = vadd.f32 %v2320_v11, %v2151_v58  ;;  %v2153_v7 = vpop.f32.mrf.mxu2  ;;  %v1902_v32 = vpack.c.bf16 %v1774_v6, %v1772_v15  ;;  %v1775_v60 = vmul.f32 %v1647_v59, %v751_v35 }
 0x2b1   :  { %3250 = vst [vmem:[%s5757_s5 + $0x148] sm:$0xff] %v3186_v41  ;;  %v1773_v61 = vmul.f32 %v1645_v23, %v749_v63 }
 0x2b2   :  { %v2932_v49 = vadd.f32 %v2868_v27, %v2612_v3  ;;  %v2613_v48 = vadd.f32 %v5477_v4, %v2321_v16 }
 0x2b3   :  { %v1903_v36 = vpack.c.bf16 %v1775_v60, %v1773_v61 }
 0x2b4   :  { %v3779_v24 = vpop.eup %3778  ;;  %v2996_v14 = vmul.f32 0.7978846, %v2932_v49  ;;  %v2741_v57 = vmul.f32 0.044715, %v2613_v48  ;;  %v2677_v9 = vmul.f32 0.5, %v2613_v48 }
 0x2b5   :  { %v3123_v8 = vadd.f32 1.0, %v3779_v24  ;;  %2195 = vmatmul.bf16.gmra.mxu2 %v1902_v32 }
 0x2b6   :  { %3780 = vtanh.f32 %v2996_v14  ;;  %v2805_v52 = vmul.f32 %v2741_v57, %v2613_v48 }
 0x2b7   :  { %v3187_v22 = vmul.f32 %v3123_v8, %v2675_v18  ;;  %v2322_v19 = vpop.f32.mrf.mxu3 }
 0x2b8   :  { %v2869_v44 = vmul.f32 %v2805_v52, %v2613_v48  ;;  %v2323_v30 = vadd.f32 %v2322_v19, %v2153_v7  ;;  %v2156_v34 = vpop.f32.mrf.mxu2 }
 0x2b9   :  { %3251 = vst [vmem:[%s5757_s5 + $0x150] sm:$0xff] %v3187_v22 }
 0x2ba   :  { %v2933_v10 = vadd.f32 %v2869_v44, %v2613_v48  ;;  %v2614_v39 = vadd.f32 %v5477_v4, %v2323_v30 }
 0x2bc   :  { %v3781_v17 = vpop.eup %3780  ;;  %v2997_v45 = vmul.f32 0.7978846, %v2933_v10  ;;  %v2742_v13 = vmul.f32 0.044715, %v2614_v39  ;;  %2364 = vmatmul.bf16.gmra.mxu3 %v1903_v36  ;;  %v2678_v37 = vmul.f32 0.5, %v2614_v39 }
 0x2bd   :  { %v3124_v20 = vadd.f32 1.0, %v3781_v17 }
 0x2be   :  { %3782 = vtanh.f32 %v2997_v45  ;;  %v2806_v42 = vmul.f32 %v2742_v13, %v2614_v39 }
 0x2bf   :  { %v3188_v33 = vmul.f32 %v3124_v20, %v2676_v51  ;;  %v2325_v54 = vpop.f32.mrf.mxu3 }
 0x2c0   :  { %v2870_v62 = vmul.f32 %v2806_v42, %v2614_v39  ;;  %v2326_v50 = vadd.f32 %v2325_v54, %v2156_v34  ;;  %v2158_v38 = vpop.f32.mrf.mxu2 }
 0x2c1   :  { %3252 = vst [vmem:[%s5757_s5 + $0x158] sm:$0xff] %v3188_v33 }
 0x2c2   :  { %v2934_v56 = vadd.f32 %v2870_v62, %v2614_v39  ;;  %v2615_v2 = vadd.f32 %v5477_v4, %v2326_v50 }
 0x2c4   :  { %v3783_v46 = vpop.eup %3782  ;;  %v2998_v43 = vmul.f32 0.7978846, %v2934_v56  ;;  %v2743_v53 = vmul.f32 0.044715, %v2615_v2  ;;  %v2679_v49 = vmul.f32 0.5, %v2615_v2 }
 0x2c5   :  { %v3125_v58 = vadd.f32 1.0, %v3783_v46 }
 0x2c6   :  { %3784 = vtanh.f32 %v2998_v43  ;;  %v2807_v25 = vmul.f32 %v2743_v53, %v2615_v2 }
 0x2c7   :  { %v3189_v3 = vmul.f32 %v3125_v58, %v2677_v9  ;;  %v2327_v0 = vpop.f32.mrf.mxu3 }
 0x2c8   :  { %v2871_v29 = vmul.f32 %v2807_v25, %v2615_v2  ;;  %v2328_v5 = vadd.f32 %v2327_v0, %v2158_v38  ;;  %v2161_v26 = vpop.f32.mrf.mxu2 }
 0x2c9   :  { %3253 = vst [vmem:[%s5757_s5 + $0x160] sm:$0xff] %v3189_v3 }
 0x2ca   :  { %v2935_v47 = vadd.f32 %v2871_v29, %v2615_v2  ;;  %v2616_v55 = vadd.f32 %v5477_v4, %v2328_v5 }
 0x2cc   :  { %v3785_v40 = vpop.eup %3784  ;;  %v2999_v1 = vmul.f32 0.7978846, %v2935_v47  ;;  %v2744_v31 = vmul.f32 0.044715, %v2616_v55  ;;  %v2680_v22 = vmul.f32 0.5, %v2616_v55 }
 0x2cd   :  { %v3126_v21 = vadd.f32 1.0, %v3785_v40 }
 0x2ce   :  { %3786 = vtanh.f32 %v2999_v1  ;;  %v2808_v28 = vmul.f32 %v2744_v31, %v2616_v55 }
 0x2cf   :  { %v3190_v6 = vmul.f32 %v3126_v21, %v2678_v37  ;;  %v2330_v12 = vpop.f32.mrf.mxu3 }
 0x2d0   :  { %v2872_v41 = vmul.f32 %v2808_v28, %v2616_v55  ;;  %v2331_v11 = vadd.f32 %v2330_v12, %v2161_v26  ;;  %v2163_v15 = vpop.f32.mrf.mxu2 }
 0x2d1   :  { %3254 = vst [vmem:[%s5757_s5 + $0x168] sm:$0xff] %v3190_v6 }
 0x2d2   :  { %v2936_v27 = vadd.f32 %v2872_v41, %v2616_v55  ;;  %v2617_v16 = vadd.f32 %v5477_v4, %v2331_v11 }
 0x2d4   :  { %v3787_v7 = vpop.eup %3786  ;;  %v3000_v59 = vmul.f32 0.7978846, %v2936_v27  ;;  %v2745_v32 = vmul.f32 0.044715, %v2617_v16  ;;  %v2681_v42 = vmul.f32 0.5, %v2617_v16 }
 0x2d5   :  { %v3127_v48 = vadd.f32 1.0, %v3787_v7 }
 0x2d6   :  { %3788 = vtanh.f32 %v3000_v59  ;;  %v2809_v35 = vmul.f32 %v2745_v32, %v2617_v16 }
 0x2d7   :  { %v3191_v23 = vmul.f32 %v3127_v48, %v2679_v49  ;;  %v2332_v24 = vpop.f32.mrf.mxu3 }
 0x2d8   :  { %v2873_v14 = vmul.f32 %v2809_v35, %v2617_v16  ;;  %v2333_v57 = vadd.f32 %v2332_v24, %v2163_v15  ;;  %v2166_v63 = vpop.f32.mrf.mxu2 }
 0x2d9   :  { %3255 = vst [vmem:[%s5757_s5 + $0x170] sm:$0xff] %v3191_v23 }
 0x2da   :  { %v2937_v60 = vadd.f32 %v2873_v14, %v2617_v16  ;;  %v2618_v18 = vadd.f32 %v5477_v4, %v2333_v57 }
 0x2dc   :  { %v3789_v8 = vpop.eup %3788  ;;  %v3001_v52 = vmul.f32 0.7978846, %v2937_v60  ;;  %v2746_v61 = vmul.f32 0.044715, %v2618_v18  ;;  %v2682_v25 = vmul.f32 0.5, %v2618_v18 }
 0x2dd   :  { %v3128_v19 = vadd.f32 1.0, %v3789_v8 }
 0x2de   :  { %3790 = vtanh.f32 %v3001_v52  ;;  %v2810_v44 = vmul.f32 %v2746_v61, %v2618_v18 }
 0x2df   :  { %v3192_v30 = vmul.f32 %v3128_v19, %v2680_v22  ;;  %v2335_v36 = vpop.f32.mrf.mxu3 }
 0x2e0   :  { %v2874_v34 = vmul.f32 %v2810_v44, %v2618_v18  ;;  %v2336_v10 = vadd.f32 %v2335_v36, %v2166_v63  ;;  %v2168_v39 = vpop.f32.mrf.mxu2 }
 0x2e1   :  { %3256 = vst [vmem:[%s5757_s5 + $0x178] sm:$0xff] %v3192_v30 }
 0x2e2   :  { %v2938_v17 = vadd.f32 %v2874_v34, %v2618_v18  ;;  %v2619_v45 = vadd.f32 %v5477_v4, %v2336_v10 }
 0x2e4   :  { %v3791_v13 = vpop.eup %3790  ;;  %v3002_v51 = vmul.f32 0.7978846, %v2938_v17  ;;  %v2747_v20 = vmul.f32 0.044715, %v2619_v45  ;;  %v2683_v28 = vmul.f32 0.5, %v2619_v45 }
 0x2e5   :  { %v3129_v33 = vadd.f32 1.0, %v3791_v13 }
 0x2e6   :  { %3792 = vtanh.f32 %v3002_v51  ;;  %v2811_v54 = vmul.f32 %v2747_v20, %v2619_v45 }
 0x2e7   :  { %v3193_v62 = vmul.f32 %v3129_v33, %v2681_v42  ;;  %v2337_v50 = vpop.f32.mrf.mxu3 }
 0x2e8   :  { %v2875_v38 = vmul.f32 %v2811_v54, %v2619_v45  ;;  %v2338_v56 = vadd.f32 %v2337_v50, %v2168_v39  ;;  %v2171_v2 = vpop.f32.mrf.mxu2 }
 0x2e9   :  { %3257 = vst [vmem:[%s5757_s5 + $0x180] sm:$0xff] %v3193_v62 }
 0x2ea   :  { %v2939_v46 = vadd.f32 %v2875_v38, %v2619_v45  ;;  %v2620_v43 = vadd.f32 %v5477_v4, %v2338_v56 }
 0x2ec   :  { %v3793_v53 = vpop.eup %3792  ;;  %v3003_v9 = vmul.f32 0.7978846, %v2939_v46  ;;  %v2748_v58 = vmul.f32 0.044715, %v2620_v43  ;;  %v2684_v35 = vmul.f32 0.5, %v2620_v43 }
 0x2ed   :  { %v3130_v3 = vadd.f32 1.0, %v3793_v53 }
 0x2ee   :  { %3794 = vtanh.f32 %v3003_v9  ;;  %v2812_v0 = vmul.f32 %v2748_v58, %v2620_v43 }
 0x2ef   :  { %v3194_v29 = vmul.f32 %v3130_v3, %v2682_v25  ;;  %v2340_v5 = vpop.f32.mrf.mxu3 }
 0x2f0   :  { %v2876_v26 = vmul.f32 %v2812_v0, %v2620_v43  ;;  %v2341_v47 = vadd.f32 %v2340_v5, %v2171_v2  ;;  %v2173_v55 = vpop.f32.mrf.mxu2 }
 0x2f1   :  { %3258 = vst [vmem:[%s5757_s5 + $0x188] sm:$0xff] %v3194_v29 }
 0x2f2   :  { %v2940_v40 = vadd.f32 %v2876_v26, %v2620_v43  ;;  %v2621_v1 = vadd.f32 %v5477_v4, %v2341_v47 }
 0x2f4   :  { %v3795_v31 = vpop.eup %3794  ;;  %v3004_v37 = vmul.f32 0.7978846, %v2940_v40  ;;  %v2749_v21 = vmul.f32 0.044715, %v2621_v1  ;;  %v2685_v44 = vmul.f32 0.5, %v2621_v1 }
 0x2f5   :  { %v3131_v6 = vadd.f32 1.0, %v3795_v31 }
 0x2f6   :  { %3796 = vtanh.f32 %v3004_v37  ;;  %v2813_v12 = vmul.f32 %v2749_v21, %v2621_v1 }
 0x2f7   :  { %v3195_v41 = vmul.f32 %v3131_v6, %v2683_v28  ;;  %v2342_v11 = vpop.f32.mrf.mxu3 }
 0x2f8   :  { %v2877_v15 = vmul.f32 %v2813_v12, %v2621_v1  ;;  %v2343_v27 = vadd.f32 %v2342_v11, %v2173_v55  ;;  %v2176_v16 = vpop.f32.mrf.mxu2 }
 0x2f9   :  { %3259 = vst [vmem:[%s5757_s5 + $0x190] sm:$0xff] %v3195_v41 }
 0x2fa   :  { %v2941_v7 = vadd.f32 %v2877_v15, %v2621_v1  ;;  %v2622_v59 = vadd.f32 %v5477_v4, %v2343_v27 }
 0x2fc   :  { %v3797_v32 = vpop.eup %3796  ;;  %v3005_v49 = vmul.f32 0.7978846, %v2941_v7  ;;  %v2750_v48 = vmul.f32 0.044715, %v2622_v59  ;;  %v2686_v54 = vmul.f32 0.5, %v2622_v59 }
 0x2fd   :  { %v3132_v23 = vadd.f32 1.0, %v3797_v32 }
 0x2fe   :  { %3798 = vtanh.f32 %v3005_v49  ;;  %v2814_v24 = vmul.f32 %v2750_v48, %v2622_v59 }
 0x2ff   :  { %v3196_v14 = vmul.f32 %v3132_v23, %v2684_v35  ;;  %v2345_v57 = vpop.f32.mrf.mxu3 }
 0x300   :  { %v2878_v63 = vmul.f32 %v2814_v24, %v2622_v59  ;;  %v2346_v60 = vadd.f32 %v2345_v57, %v2176_v16  ;;  %v2178_v18 = vpop.f32.mrf.mxu2 }
 0x301   :  { %3260 = vst [vmem:[%s5757_s5 + $0x198] sm:$0xff] %v3196_v14 }
 0x302   :  { %v2942_v8 = vadd.f32 %v2878_v63, %v2622_v59  ;;  %v2623_v52 = vadd.f32 %v5477_v4, %v2346_v60 }
 0x304   :  { %v3799_v61 = vpop.eup %3798  ;;  %v3006_v22 = vmul.f32 0.7978846, %v2942_v8  ;;  %v2751_v19 = vmul.f32 0.044715, %v2623_v52  ;;  %v2687_v0 = vmul.f32 0.5, %v2623_v52 }
 0x305   :  { %v3133_v30 = vadd.f32 1.0, %v3799_v61 }
 0x306   :  { %3800 = vtanh.f32 %v3006_v22  ;;  %v2815_v36 = vmul.f32 %v2751_v19, %v2623_v52 }
 0x307   :  { %v3197_v34 = vmul.f32 %v3133_v30, %v2685_v44  ;;  %v2347_v10 = vpop.f32.mrf.mxu3 }
 0x308   :  { %v2879_v39 = vmul.f32 %v2815_v36, %v2623_v52  ;;  %v2348_v17 = vadd.f32 %v2347_v10, %v2178_v18  ;;  %v2181_v45 = vpop.f32.mrf.mxu2 }
 0x309   :  { %3261 = vst [vmem:[%s5757_s5 + $0x1a0] sm:$0xff] %v3197_v34 }
 0x30a   :  { %v2943_v13 = vadd.f32 %v2879_v39, %v2623_v52  ;;  %v2624_v51 = vadd.f32 %v5477_v4, %v2348_v17 }
 0x30c   :  { %v3801_v20 = vpop.eup %3800  ;;  %v3007_v42 = vmul.f32 0.7978846, %v2943_v13  ;;  %v2752_v33 = vmul.f32 0.044715, %v2624_v51  ;;  %v2688_v12 = vmul.f32 0.5, %v2624_v51 }
 0x30d   :  { %v3134_v62 = vadd.f32 1.0, %v3801_v20 }
 0x30e   :  { %3802 = vtanh.f32 %v3007_v42  ;;  %v2816_v50 = vmul.f32 %v2752_v33, %v2624_v51 }
 0x30f   :  { %v3198_v38 = vmul.f32 %v3134_v62, %v2686_v54  ;;  %v2350_v56 = vpop.f32.mrf.mxu3 }
 0x310   :  { %v2880_v2 = vmul.f32 %v2816_v50, %v2624_v51  ;;  %v2351_v46 = vadd.f32 %v2350_v56, %v2181_v45  ;;  %v2183_v43 = vpop.f32.mrf.mxu2 }
 0x311   :  { %3262 = vst [vmem:[%s5757_s5 + $0x1a8] sm:$0xff] %v3198_v38 }
 0x312   :  { %v2944_v53 = vadd.f32 %v2880_v2, %v2624_v51  ;;  %v2625_v9 = vadd.f32 %v5477_v4, %v2351_v46 }
 0x314   :  { %v3803_v58 = vpop.eup %3802  ;;  %v3008_v25 = vmul.f32 0.7978846, %v2944_v53  ;;  %v2753_v3 = vmul.f32 0.044715, %v2625_v9  ;;  %v2689_v24 = vmul.f32 0.5, %v2625_v9 }
 0x315   :  { %v3135_v29 = vadd.f32 1.0, %v3803_v58 }
 0x316   :  { %3804 = vtanh.f32 %v3008_v25  ;;  %v2817_v5 = vmul.f32 %v2753_v3, %v2625_v9 }
 0x317   :  { %v3199_v26 = vmul.f32 %v3135_v29, %v2687_v0  ;;  %v2352_v47 = vpop.f32.mrf.mxu3 }
 0x318   :  { %v2881_v55 = vmul.f32 %v2817_v5, %v2625_v9  ;;  %v2353_v40 = vadd.f32 %v2352_v47, %v2183_v43  ;;  %v2186_v1 = vpop.f32.mrf.mxu2 }
 0x319   :  { %3263 = vst [vmem:[%s5757_s5 + $0x1b0] sm:$0xff] %v3199_v26 }
 0x31a   :  { %v2945_v31 = vadd.f32 %v2881_v55, %v2625_v9  ;;  %v2626_v37 = vadd.f32 %v5477_v4, %v2353_v40  ;;  %v5720_v4 = vld [vmem:[%s5756_s4] ss:$0 sm:$0xff] }
 0x31c   :  { %v3805_v21 = vpop.eup %3804  ;;  %v3009_v28 = vmul.f32 0.7978846, %v2945_v31  ;;  %v2754_v6 = vmul.f32 0.044715, %v2626_v37  ;;  %v2690_v36 = vmul.f32 0.5, %v2626_v37 }
 0x31d   :  { %v3136_v41 = vadd.f32 1.0, %v3805_v21 }
 0x31e   :  { %3806 = vtanh.f32 %v3009_v28  ;;  %v2818_v11 = vmul.f32 %v2754_v6, %v2626_v37 }
 0x31f   :  { %v3200_v15 = vmul.f32 %v3136_v41, %v2688_v12  ;;  %v2355_v27 = vpop.f32.mrf.mxu3 }
 0x320   :  { %v2882_v16 = vmul.f32 %v2818_v11, %v2626_v37  ;;  %v2356_v7 = vadd.f32 %v2355_v27, %v2186_v1  ;;  %v2188_v59 = vpop.f32.mrf.mxu2 }
 0x321   :  { %3264 = vst [vmem:[%s5757_s5 + $0x1b8] sm:$0xff] %v3200_v15 }
 0x322   :  { %v2946_v32 = vadd.f32 %v2882_v16, %v2626_v37  ;;  %v2627_v49 = vadd.f32 %v5720_v4, %v2356_v7 }
 0x324   :  { %v3807_v48 = vpop.eup %3806  ;;  %v3010_v35 = vmul.f32 0.7978846, %v2946_v32  ;;  %v2755_v23 = vmul.f32 0.044715, %v2627_v49  ;;  %v2691_v50 = vmul.f32 0.5, %v2627_v49 }
 0x325   :  { %v3137_v14 = vadd.f32 1.0, %v3807_v48 }
 0x326   :  { %3808 = vtanh.f32 %v3010_v35  ;;  %v2819_v57 = vmul.f32 %v2755_v23, %v2627_v49 }
 0x327   :  { %v3201_v63 = vmul.f32 %v3137_v14, %v2689_v24  ;;  %v2357_v60 = vpop.f32.mrf.mxu3 }
 0x328   :  { %v2883_v18 = vmul.f32 %v2819_v57, %v2627_v49  ;;  %v2358_v8 = vadd.f32 %v2357_v60, %v2188_v59  ;;  %v2191_v52 = vpop.f32.mrf.mxu2 }
 0x329   :  { %3265 = vst [vmem:[%s5757_s5 + $0x1c0] sm:$0xff] %v3201_v63 }
 0x32a   :  { %v2947_v61 = vadd.f32 %v2883_v18, %v2627_v49  ;;  %v2628_v22 = vadd.f32 %v5720_v4, %v2358_v8 }
 0x32c   :  { %v3809_v19 = vpop.eup %3808  ;;  %v3011_v44 = vmul.f32 0.7978846, %v2947_v61  ;;  %v2756_v30 = vmul.f32 0.044715, %v2628_v22  ;;  %v2692_v5 = vmul.f32 0.5, %v2628_v22 }
 0x32d   :  { %v3138_v34 = vadd.f32 1.0, %v3809_v19 }
 0x32e   :  { %3810 = vtanh.f32 %v3011_v44  ;;  %v2820_v10 = vmul.f32 %v2756_v30, %v2628_v22 }
 0x32f   :  { %v3202_v39 = vmul.f32 %v3138_v34, %v2690_v36  ;;  %v2360_v17 = vpop.f32.mrf.mxu3 }
 0x330   :  { %v2884_v45 = vmul.f32 %v2820_v10, %v2628_v22  ;;  %v2361_v13 = vadd.f32 %v2360_v17, %v2191_v52  ;;  %v2193_v51 = vpop.f32.mrf.mxu2 }
 0x331   :  { %3266 = vst [vmem:[%s5757_s5 + $0x1c8] sm:$0xff] %v3202_v39 }
 0x332   :  { %v2948_v20 = vadd.f32 %v2884_v45, %v2628_v22  ;;  %v2629_v42 = vadd.f32 %v5720_v4, %v2361_v13 }
 0x334   :  { %v3811_v33 = vpop.eup %3810  ;;  %v3012_v54 = vmul.f32 0.7978846, %v2948_v20  ;;  %v2757_v62 = vmul.f32 0.044715, %v2629_v42  ;;  %v2693_v41 = vmul.f32 0.5, %v2629_v42 }
 0x335   :  { %v3139_v38 = vadd.f32 1.0, %v3811_v33 }
 0x336   :  { %3812 = vtanh.f32 %v3012_v54  ;;  %v2821_v56 = vmul.f32 %v2757_v62, %v2629_v42 }
 0x337   :  { %v3203_v2 = vmul.f32 %v3139_v38, %v2691_v50  ;;  %v2362_v46 = vpop.f32.mrf.mxu3 }
 0x338   :  { %v2885_v43 = vmul.f32 %v2821_v56, %v2629_v42  ;;  %v2363_v53 = vadd.f32 %v2362_v46, %v2193_v51  ;;  %v2196_v25 = vpop.f32.mrf.mxu2 }
 0x339   :  { %3267 = vst [vmem:[%s5757_s5 + $0x1d0] sm:$0xff] %v3203_v2 }
 0x33a   :  { %v2949_v9 = vadd.f32 %v2885_v43, %v2629_v42  ;;  %v2630_v58 = vadd.f32 %v5720_v4, %v2363_v53 }
 0x33c   :  { %v3813_v3 = vpop.eup %3812  ;;  %v3013_v0 = vmul.f32 0.7978846, %v2949_v9  ;;  %v2758_v29 = vmul.f32 0.044715, %v2630_v58  ;;  %v2694_v14 = vmul.f32 0.5, %v2630_v58 }
 0x33d   :  { %v3140_v26 = vadd.f32 1.0, %v3813_v3 }
 0x33e   :  { %3814 = vtanh.f32 %v3013_v0  ;;  %v2822_v47 = vmul.f32 %v2758_v29, %v2630_v58 }
 0x33f   :  { %v3204_v55 = vmul.f32 %v3140_v26, %v2692_v5  ;;  %v2365_v40 = vpop.f32.mrf.mxu3 }
 0x340   :  { %v2886_v1 = vmul.f32 %v2822_v47, %v2630_v58  ;;  %v2366_v31 = vadd.f32 %v2365_v40, %v2196_v25  ;;  %v2198_v15 = vpop.f32.mrf.mxu2 }
 0x341   :  { %3268 = vst [vmem:[%s5757_s5 + $0x1d8] sm:$0xff] %v3204_v55 }
 0x342   :  { %v2950_v37 = vadd.f32 %v2886_v1, %v2630_v58  ;;  %v2631_v21 = vadd.f32 %v5720_v4, %v2366_v31 }
 0x344   :  { %v3815_v28 = vpop.eup %3814  ;;  %v3014_v6 = vmul.f32 0.7978846, %v2950_v37  ;;  %v2759_v12 = vmul.f32 0.044715, %v2631_v21  ;;  %v2695_v22 = vmul.f32 0.5, %v2631_v21 }
 0x345   :  { %v3141_v11 = vadd.f32 1.0, %v3815_v28 }
 0x346   :  { %3816 = vtanh.f32 %v3014_v6  ;;  %v2823_v27 = vmul.f32 %v2759_v12, %v2631_v21 }
 0x347   :  { %v3205_v16 = vmul.f32 %v3141_v11, %v2693_v41  ;;  %v2367_v7 = vpop.f32.mrf.mxu3 }
 0x348   :  { %v2887_v59 = vmul.f32 %v2823_v27, %v2631_v21  ;;  %v2368_v32 = vadd.f32 %v2367_v7, %v2198_v15 }
 0x349   :  { %3269 = vst [vmem:[%s5757_s5 + $0x1e0] sm:$0xff] %v3205_v16 }
 0x34a   :  { %v2951_v49 = vadd.f32 %v2887_v59, %v2631_v21  ;;  %v2632_v48 = vadd.f32 %v5720_v4, %v2368_v32 }
 0x34c   :  { %v3817_v35 = vpop.eup %3816  ;;  %v3015_v23 = vmul.f32 0.7978846, %v2951_v49  ;;  %v2760_v24 = vmul.f32 0.044715, %v2632_v48  ;;  %v2696_v30 = vmul.f32 0.5, %v2632_v48 }
 0x34d   :  { %v3142_v57 = vadd.f32 1.0, %v3817_v35 }
 0x34e   :  { %3818 = vtanh.f32 %v3015_v23  ;;  %v2824_v63 = vmul.f32 %v2760_v24, %v2632_v48 }
 0x34f   :  { %v3206_v60 = vmul.f32 %v3142_v57, %v2694_v14 }
 0x350   :  { %v2888_v18 = vmul.f32 %v2824_v63, %v2632_v48 }
 0x351   :  { %3270 = vst [vmem:[%s5757_s5 + $0x1e8] sm:$0xff] %v3206_v60 }
 0x352   :  { %v2952_v8 = vadd.f32 %v2888_v18, %v2632_v48 }
 0x354   :  { %v3819_v52 = vpop.eup %3818  ;;  %v3016_v61 = vmul.f32 0.7978846, %v2952_v8 }
 0x355   :  { %v3143_v19 = vadd.f32 1.0, %v3819_v52 }
 0x356   :  { %3820 = vtanh.f32 %v3016_v61 }
 0x357   :  { %v3207_v4 = vmul.f32 %v3143_v19, %v2695_v22 }
 0x359   :  { %3271 = vst [vmem:[%s5757_s5 + $0x1f0] sm:$0xff] %v3207_v4 }
 0x35c   :  { %v3821_v44 = vpop.eup %3820 }
 0x35d   :  { %v3144_v36 = vadd.f32 1.0, %v3821_v44 }
 0x35f   :  { %v3208_v34 = vmul.f32 %v3144_v36, %v2696_v30 }
 0x361   :  { %3272 = vst [vmem:[%s5757_s5 + $0x1f8] sm:$0xff] %v3208_v34 }

</bundles_post_ra>
